<compile_context>
chip_gen: v5e
topology: v5e:2x2
jax: 0.10.0
libtpu: 0.0.40
codegen_flags: <defaults>
</compile_context>

<pallas_src>
import functools

import jax
import jax.numpy as jnp
from jax.experimental import pallas as pl
from jax.experimental.pallas import tpu as pltpu

_K = 15      # Conv1d kernel size (all layers)
_PAD = 7     # Conv1d padding (all layers)
_POOL = 4    # MaxPool1d(4) after layer 1
_S1 = 4      # conv1 stride
_S2 = 2      # conv2..conv4 stride
_EPS = 1e-5  # BatchNorm eps (PyTorch default)


def _conv_len(lin, stride):
    return (lin + 2 * _PAD - _K) // stride + 1


def _decim(n_out, n_in, stride):
    """Constant (n_out, n_in) 0/1 matrix selecting rows 0, stride, 2*stride, ..."""
    r = jax.lax.broadcasted_iota(jnp.int32, (n_out, n_in), 0)
    c = jax.lax.broadcasted_iota(jnp.int32, (n_out, n_in), 1)
    return (c == stride * r).astype(jnp.float32)


# ----------------------------------------------------------------------------
# The single fused kernel: whole RawAudioCNN forward for one batch element.
# ----------------------------------------------------------------------------
def _fused_kernel(dims, x_ref, w1_ref, s1_ref, w2_ref, s2_ref, w3_ref, s3_ref,
                  w4_ref, s4_ref, fcw_ref, fcb_ref, o_ref,
                  pad2_ref, pad3_ref, pad4_ref):
    l1, lp, l2, l3, l4 = dims
    f32 = jnp.float32

    # ---- conv1 (Cin=1, stride 4) on the phase-split input -------------------
    # x_ref[0][t, r] == x_padded[4*t + r];  w1_ref[q][r, :] == w1_scaled[4q+r, :]
    nq, c1 = w1_ref.shape[0], w1_ref.shape[2]
    z1 = jnp.zeros((l1, c1), f32)
    for q in range(nq):
        z1 = z1 + jnp.dot(x_ref[0, q:q + l1, :], w1_ref[q],
                          preferred_element_type=f32)

    # ---- fused MaxPool1d(4): shifted-slice max + row decimation --------------
    # (BN shift + ReLU commute with max, so they are applied after pooling.)
    m = jnp.maximum(jnp.maximum(z1[0:l1 - 3], z1[1:l1 - 2]),
                    jnp.maximum(z1[2:l1 - 1], z1[3:l1]))          # (l1-3, c1)
    a = jnp.dot(_decim(lp, l1 - 3, _POOL), m, preferred_element_type=f32)
    a = jnp.maximum(a + s1_ref[...], 0.0)                          # (lp, c1)

    # ---- conv2..conv4 (stride 2) ---------------------------------------------
    # Zero-padded VMEM scratch -> K unit-stride tap matmuls (full stride-1 conv)
    # -> 0/1 decimation matmul for the stride -> BN shift + ReLU epilogue.
    for w_ref, s_ref, pad_ref, lin, lout in (
            (w2_ref, s2_ref, pad2_ref, lp, l2),
            (w3_ref, s3_ref, pad3_ref, l2, l3),
            (w4_ref, s4_ref, pad4_ref, l3, l4)):
        cout = w_ref.shape[2]
        lfull = lin + 2 * _PAD - _K + 1
        pad_ref[...] = jnp.zeros(pad_ref.shape, f32)
        pad_ref[_PAD:_PAD + lin, :] = a
        zf = jnp.zeros((lfull, cout), f32)
        for k in range(_K):
            zf = zf + jnp.dot(pad_ref[k:k + lfull, :], w_ref[k],
                              preferred_element_type=f32)
        z = jnp.dot(_decim(lout, lfull, _S2), zf, preferred_element_type=f32)
        a = jnp.maximum(z + s_ref[...], 0.0)                       # (lout, cout)

    # ---- global average pool over length + FC head ---------------------------
    h = jnp.dot(a, fcw_ref[...], preferred_element_type=f32)       # (l4, ncls)
    o_ref[0] = jnp.mean(h, axis=0, keepdims=True) + fcb_ref[...]


# ----------------------------------------------------------------------------
# Host-side wrapper (weight folding + one pallas_call)
# ----------------------------------------------------------------------------
def _fold_bn(layer):
    """Fold eval-mode BatchNorm + conv bias: scaled (K, Cin, Cout) weights and a
    (1, Cout) shift."""
    scale = layer["gamma"] * jax.lax.rsqrt(layer["var"] + _EPS)
    shift = layer["beta"] + scale * (layer["b"] - layer["mean"])
    w_t = jnp.transpose(layer["w"], (2, 1, 0)) * scale[None, None, :]
    return w_t.astype(jnp.float32), shift[None, :].astype(jnp.float32)


def raw_audio_cnn_forward(x, params):
    """x: (B, L) float32 raw audio -> (B, num_classes) logits (eval-mode BN)."""
    B, L = x.shape
    l1 = _conv_len(L, _S1)
    lp = l1 // _POOL
    l2 = _conv_len(lp, _S2)
    l3 = _conv_len(l2, _S2)
    l4 = _conv_len(l3, _S2)

    # Phase-split, zero-padded input: xph[b, t, r] = x_padded[b, 4*t + r].
    # Host glue is just a pad + reshape (no im2col expansion).
    nq = -(-_K // _S1)
    T = max(-(-(L + 2 * _PAD) // _S1), l1 + nq - 1)
    xph = jnp.pad(x, ((0, 0), (_PAD, _S1 * T - L - _PAD))).reshape(B, T, _S1)

    # conv1 weights regrouped by input phase: w1q[q, r, co] = w1_scaled[co, 0, 4q+r]
    w1t, s1 = _fold_bn(params["c1"])                  # (K, 1, C1), (1, C1)
    c1 = w1t.shape[2]
    w1k = w1t[:, 0, :]                                # (K, C1)
    w1q = jnp.concatenate(
        [w1k, jnp.zeros((nq * _S1 - _K, c1), jnp.float32)], axis=0
    ).reshape(nq, _S1, c1)

    w2, s2 = _fold_bn(params["c2"])                   # (K, 16, 32),  (1, 32)
    w3, s3 = _fold_bn(params["c3"])                   # (K, 32, 64),  (1, 64)
    w4, s4 = _fold_bn(params["c4"])                   # (K, 64, 128), (1, 128)
    fcw = params["fc_w"].T.astype(jnp.float32)        # (128, num_classes)
    fcb = params["fc_b"][None, :].astype(jnp.float32)
    ncls = fcw.shape[1]

    def full(arr):  # whole-array block, constant index map
        return pl.BlockSpec(arr.shape, lambda b: (0,) * arr.ndim)

    kernel = functools.partial(_fused_kernel, (l1, lp, l2, l3, l4))
    out = pl.pallas_call(
        kernel,
        out_shape=jax.ShapeDtypeStruct((B, 1, ncls), jnp.float32),
        grid=(B,),
        in_specs=[pl.BlockSpec((1, T, _S1), lambda b: (b, 0, 0)),
                  full(w1q), full(s1), full(w2), full(s2), full(w3), full(s3),
                  full(w4), full(s4), full(fcw), full(fcb)],
        out_specs=pl.BlockSpec((1, 1, ncls), lambda b: (b, 0, 0)),
        scratch_shapes=[
            pltpu.VMEM((lp + 2 * _PAD, w2.shape[1]), jnp.float32),
            pltpu.VMEM((l2 + 2 * _PAD, w3.shape[1]), jnp.float32),
            pltpu.VMEM((l3 + 2 * _PAD, w4.shape[1]), jnp.float32),
        ],
        compiler_params=pltpu.CompilerParams(
            dimension_semantics=("parallel",)),
    )(xph, w1q, s1, w2, s2, w3, s3, w4, s4, fcw, fcb)
    return out[:, 0, :]


# ----------------------------------------------------------------------------
# Pure-JAX reference (numerical sanity check of the fused kernel)
# ----------------------------------------------------------------------------
def _ref_conv_bn_relu(x, w, b, gamma, beta, mean, var, *, stride, padding,
                      eps=_EPS):
    z = jax.lax.conv_general_dilated(
        x, w, window_strides=(stride,), padding=[(padding, padding)],
        dimension_numbers=("NCH", "OIH", "NCH"),
        precision=jax.lax.Precision.HIGHEST) + b[None, :, None]
    scale = gamma / jnp.sqrt(var + eps)
    y = scale[None, :, None] * (z - mean[None, :, None]) + beta[None, :, None]
    return jnp.maximum(y, 0.0)


def _ref_forward(x, p):
    h = x[:, None, :]
    h = _ref_conv_bn_relu(h, p["c1"]["w"], p["c1"]["b"], p["c1"]["gamma"],
                          p["c1"]["beta"], p["c1"]["mean"], p["c1"]["var"],
                          stride=4, padding=7)
    B, C, L = h.shape
    h = h[:, :, :(L // 4) * 4].reshape(B, C, L // 4, 4).max(axis=-1)
    for name in ("c2", "c3", "c4"):
        h = _ref_conv_bn_relu(h, p[name]["w"], p[name]["b"], p[name]["gamma"],
                              p[name]["beta"], p[name]["mean"], p[name]["var"],
                              stride=2, padding=7)
    pooled = h.mean(axis=-1)
    return pooled @ p["fc_w"].T + p["fc_b"]


# ----------------------------------------------------------------------------
# Deterministic parameter construction (synthetic, no checkpoint load)
# ----------------------------------------------------------------------------
def _make_conv_bn_params(key, cin, cout, k):
    k1, k2, k3, k4, k5, k6 = jax.random.split(key, 6)
    return dict(
        w=0.05 * jax.random.normal(k1, (cout, cin, k), jnp.float32),
        b=0.05 * jax.random.normal(k2, (cout,), jnp.float32),
        gamma=1.0 + 0.1 * jax.random.normal(k3, (cout,), jnp.float32),
        beta=0.1 * jax.random.normal(k4, (cout,), jnp.float32),
        mean=0.1 * jax.random.normal(k5, (cout,), jnp.float32),
        var=0.5 + jax.random.uniform(k6, (cout,), jnp.float32),
    )


if __name__ == "__main__":
    B, L, num_classes = 2, 512, 10
    key = jax.random.PRNGKey(0)
    kx, k1, k2, k3, k4, kw, kb = jax.random.split(key, 7)

    params = dict(
        c1=_make_conv_bn_params(k1, 1, 16, _K),
        c2=_make_conv_bn_params(k2, 16, 32, _K),
        c3=_make_conv_bn_params(k3, 32, 64, _K),
        c4=_make_conv_bn_params(k4, 64, 128, _K),
        fc_w=0.05 * jax.random.normal(kw, (num_classes, 128), jnp.float32),
        fc_b=0.05 * jax.random.normal(kb, (num_classes,), jnp.float32),
    )

    x = jax.random.normal(kx, (B, L), jnp.float32)  # raw audio: (batch, samples)

    fwd = jax.jit(raw_audio_cnn_forward)
    out = jax.block_until_ready(fwd(x, params))
    assert out.shape == (B, num_classes), out.shape

    ref = jax.block_until_ready(_ref_forward(x, params))
    max_err = float(jnp.max(jnp.abs(out - ref)))
    # Default (non-HIGHEST) MXU precision => allow bf16-pass-level rounding.
    assert max_err < 2e-2, f"max abs error {max_err}"

    print("KERNEL_OK")
</pallas_src>

<mosaic_0001>
module attributes {stable_mosaic.version = 11 : i64} {
  func.func @_fused_kernel(%arg0: i32, %arg1: memref<1x132x4xf32, #tpu.memory_space<vmem>>, %arg2: memref<4x4x16xf32, #tpu.memory_space<vmem>>, %arg3: memref<1x16xf32, #tpu.memory_space<vmem>>, %arg4: memref<15x16x32xf32, #tpu.memory_space<vmem>>, %arg5: memref<1x32xf32, #tpu.memory_space<vmem>>, %arg6: memref<15x32x64xf32, #tpu.memory_space<vmem>>, %arg7: memref<1x64xf32, #tpu.memory_space<vmem>>, %arg8: memref<15x64x128xf32, #tpu.memory_space<vmem>>, %arg9: memref<1x128xf32, #tpu.memory_space<vmem>>, %arg10: memref<128x10xf32, #tpu.memory_space<vmem>>, %arg11: memref<1x10xf32, #tpu.memory_space<vmem>>, %arg12: memref<1x1x10xf32, #tpu.memory_space<vmem>>, %arg13: memref<46x16xf32, #tpu.memory_space<vmem>>, %arg14: memref<30x32xf32, #tpu.memory_space<vmem>>, %arg15: memref<22x64xf32, #tpu.memory_space<vmem>>) attributes {dimension_semantics = [#tpu.dimension_semantics<parallel>], iteration_bounds = array<i64: 2>, scalar_prefetch = 0 : i64, scratch_operands = 3 : i64, tpu.core_type = #tpu.core_type<tc>, window_params = [{transform_indices = @transform_0, window_bounds = array<i64: 1, 132, 4>}, {pipeline_mode = #tpu.pipeline_mode<synchronous>, transform_indices = @transform_1, window_bounds = array<i64: 4, 4, 16>}, {pipeline_mode = #tpu.pipeline_mode<synchronous>, transform_indices = @transform_2, window_bounds = array<i64: 1, 16>}, {pipeline_mode = #tpu.pipeline_mode<synchronous>, transform_indices = @transform_3, window_bounds = array<i64: 15, 16, 32>}, {pipeline_mode = #tpu.pipeline_mode<synchronous>, transform_indices = @transform_4, window_bounds = array<i64: 1, 32>}, {pipeline_mode = #tpu.pipeline_mode<synchronous>, transform_indices = @transform_5, window_bounds = array<i64: 15, 32, 64>}, {pipeline_mode = #tpu.pipeline_mode<synchronous>, transform_indices = @transform_6, window_bounds = array<i64: 1, 64>}, {pipeline_mode = #tpu.pipeline_mode<synchronous>, transform_indices = @transform_7, window_bounds = array<i64: 15, 64, 128>}, {pipeline_mode = #tpu.pipeline_mode<synchronous>, transform_indices = @transform_8, window_bounds = array<i64: 1, 128>}, {pipeline_mode = #tpu.pipeline_mode<synchronous>, transform_indices = @transform_9, window_bounds = array<i64: 128, 10>}, {pipeline_mode = #tpu.pipeline_mode<synchronous>, transform_indices = @transform_10, window_bounds = array<i64: 1, 10>}, {transform_indices = @transform_11, window_bounds = array<i64: 1, 1, 10>}]} {
    %cst = arith.constant 0.000000e+00 : f32
    %0 = vector.broadcast %cst : f32 to vector<128x16xf32>
    %c0 = arith.constant 0 : index
    %c0_0 = arith.constant 0 : index
    %c0_1 = arith.constant 0 : index
    %1 = vector.load %arg1[%c0, %c0_0, %c0_1] : memref<1x132x4xf32, #tpu.memory_space<vmem>>, vector<1x128x4xf32>
    %2 = vector.shape_cast %1 : vector<1x128x4xf32> to vector<128x4xf32>
    %c0_2 = arith.constant 0 : index
    %c0_3 = arith.constant 0 : index
    %c0_4 = arith.constant 0 : index
    %3 = vector.load %arg2[%c0_2, %c0_3, %c0_4] : memref<4x4x16xf32, #tpu.memory_space<vmem>>, vector<1x4x16xf32>
    %4 = vector.shape_cast %3 : vector<1x4x16xf32> to vector<4x16xf32>
    %cst_5 = arith.constant dense<0.000000e+00> : vector<128x16xf32>
    %5 = tpu.matmul %2, %4, %cst_5 {dimension_numbers = #tpu.dot_dimension_numbers<[1], [0], [0], [1], [0, 0, 1, 1], [], []>} : vector<128x4xf32>, vector<4x16xf32>, vector<128x16xf32> -> vector<128x16xf32>
    %6 = arith.addf %0, %5 : vector<128x16xf32>
    %c0_6 = arith.constant 0 : index
    %c1 = arith.constant 1 : index
    %c0_7 = arith.constant 0 : index
    %7 = vector.load %arg1[%c0_6, %c1, %c0_7] : memref<1x132x4xf32, #tpu.memory_space<vmem>>, vector<1x128x4xf32>
    %8 = vector.shape_cast %7 : vector<1x128x4xf32> to vector<128x4xf32>
    %c1_8 = arith.constant 1 : index
    %c0_9 = arith.constant 0 : index
    %c0_10 = arith.constant 0 : index
    %9 = vector.load %arg2[%c1_8, %c0_9, %c0_10] : memref<4x4x16xf32, #tpu.memory_space<vmem>>, vector<1x4x16xf32>
    %10 = vector.shape_cast %9 : vector<1x4x16xf32> to vector<4x16xf32>
    %cst_11 = arith.constant dense<0.000000e+00> : vector<128x16xf32>
    %11 = tpu.matmul %8, %10, %cst_11 {dimension_numbers = #tpu.dot_dimension_numbers<[1], [0], [0], [1], [0, 0, 1, 1], [], []>} : vector<128x4xf32>, vector<4x16xf32>, vector<128x16xf32> -> vector<128x16xf32>
    %12 = arith.addf %6, %11 : vector<128x16xf32>
    %c0_12 = arith.constant 0 : index
    %c2 = arith.constant 2 : index
    %c0_13 = arith.constant 0 : index
    %13 = vector.load %arg1[%c0_12, %c2, %c0_13] : memref<1x132x4xf32, #tpu.memory_space<vmem>>, vector<1x128x4xf32>
    %14 = vector.shape_cast %13 : vector<1x128x4xf32> to vector<128x4xf32>
    %c2_14 = arith.constant 2 : index
    %c0_15 = arith.constant 0 : index
    %c0_16 = arith.constant 0 : index
    %15 = vector.load %arg2[%c2_14, %c0_15, %c0_16] : memref<4x4x16xf32, #tpu.memory_space<vmem>>, vector<1x4x16xf32>
    %16 = vector.shape_cast %15 : vector<1x4x16xf32> to vector<4x16xf32>
    %cst_17 = arith.constant dense<0.000000e+00> : vector<128x16xf32>
    %17 = tpu.matmul %14, %16, %cst_17 {dimension_numbers = #tpu.dot_dimension_numbers<[1], [0], [0], [1], [0, 0, 1, 1], [], []>} : vector<128x4xf32>, vector<4x16xf32>, vector<128x16xf32> -> vector<128x16xf32>
    %18 = arith.addf %12, %17 : vector<128x16xf32>
    %c0_18 = arith.constant 0 : index
    %c3 = arith.constant 3 : index
    %c0_19 = arith.constant 0 : index
    %19 = vector.load %arg1[%c0_18, %c3, %c0_19] : memref<1x132x4xf32, #tpu.memory_space<vmem>>, vector<1x128x4xf32>
    %20 = vector.shape_cast %19 : vector<1x128x4xf32> to vector<128x4xf32>
    %c3_20 = arith.constant 3 : index
    %c0_21 = arith.constant 0 : index
    %c0_22 = arith.constant 0 : index
    %21 = vector.load %arg2[%c3_20, %c0_21, %c0_22] : memref<4x4x16xf32, #tpu.memory_space<vmem>>, vector<1x4x16xf32>
    %22 = vector.shape_cast %21 : vector<1x4x16xf32> to vector<4x16xf32>
    %cst_23 = arith.constant dense<0.000000e+00> : vector<128x16xf32>
    %23 = tpu.matmul %20, %22, %cst_23 {dimension_numbers = #tpu.dot_dimension_numbers<[1], [0], [0], [1], [0, 0, 1, 1], [], []>} : vector<128x4xf32>, vector<4x16xf32>, vector<128x16xf32> -> vector<128x16xf32>
    %24 = arith.addf %18, %23 : vector<128x16xf32>
    %25 = vector.extract_strided_slice %24 {offsets = [0, 0], sizes = [125, 16], strides = [1, 1]} : vector<128x16xf32> to vector<125x16xf32>
    %26 = vector.extract_strided_slice %24 {offsets = [1, 0], sizes = [125, 16], strides = [1, 1]} : vector<128x16xf32> to vector<125x16xf32>
    %27 = arith.maximumf %25, %26 : vector<125x16xf32>
    %28 = vector.extract_strided_slice %24 {offsets = [2, 0], sizes = [125, 16], strides = [1, 1]} : vector<128x16xf32> to vector<125x16xf32>
    %29 = vector.extract_strided_slice %24 {offsets = [3, 0], sizes = [125, 16], strides = [1, 1]} : vector<128x16xf32> to vector<125x16xf32>
    %30 = arith.maximumf %28, %29 : vector<125x16xf32>
    %31 = arith.maximumf %27, %30 : vector<125x16xf32>
    %32 = tpu.iota {dimensions = array<i32: 0>} : vector<32x125xi32>
    %33 = tpu.iota {dimensions = array<i32: 1>} : vector<32x125xi32>
    %c4_i32 = arith.constant 4 : i32
    %34 = vector.broadcast %c4_i32 : i32 to vector<32x125xi32>
    %35 = arith.muli %34, %32 : vector<32x125xi32>
    %36 = arith.cmpi eq, %33, %35 : vector<32x125xi32>
    %37 = arith.extui %36 : vector<32x125xi1> to vector<32x125xi32>
    %38 = arith.sitofp %37 : vector<32x125xi32> to vector<32x125xf32>
    %cst_24 = arith.constant dense<0.000000e+00> : vector<32x16xf32>
    %39 = tpu.matmul %38, %31, %cst_24 {dimension_numbers = #tpu.dot_dimension_numbers<[1], [0], [0], [1], [0, 0, 1, 1], [], []>} : vector<32x125xf32>, vector<125x16xf32>, vector<32x16xf32> -> vector<32x16xf32>
    %c0_25 = arith.constant 0 : index
    %c0_26 = arith.constant 0 : index
    %40 = vector.load %arg3[%c0_25, %c0_26] : memref<1x16xf32, #tpu.memory_space<vmem>>, vector<1x16xf32>
    %41 = vector.broadcast %40 : vector<1x16xf32> to vector<32x16xf32>
    %42 = arith.addf %39, %41 : vector<32x16xf32>
    %cst_27 = arith.constant 0.000000e+00 : f32
    %43 = vector.broadcast %cst_27 : f32 to vector<32x16xf32>
    %44 = arith.maximumf %42, %43 : vector<32x16xf32>
    %cst_28 = arith.constant 0.000000e+00 : f32
    %45 = vector.broadcast %cst_28 : f32 to vector<46x16xf32>
    %c0_29 = arith.constant 0 : index
    %c0_30 = arith.constant 0 : index
    %46 = vector.load %arg13[%c0_29, %c0_30] : memref<46x16xf32, #tpu.memory_space<vmem>>, vector<46x16xf32>
    tpu.vector_store %arg13[%c0_29, %c0_30], %45 {strides = array<i32>} : memref<46x16xf32, #tpu.memory_space<vmem>>, vector<46x16xf32>,
    %c7 = arith.constant 7 : index
    %c0_31 = arith.constant 0 : index
    %47 = vector.load %arg13[%c7, %c0_31] : memref<46x16xf32, #tpu.memory_space<vmem>>, vector<32x16xf32>
    tpu.vector_store %arg13[%c7, %c0_31], %44 {strides = array<i32>} : memref<46x16xf32, #tpu.memory_space<vmem>>, vector<32x16xf32>,
    %cst_32 = arith.constant 0.000000e+00 : f32
    %48 = vector.broadcast %cst_32 : f32 to vector<32x32xf32>
    %c0_33 = arith.constant 0 : index
    %c0_34 = arith.constant 0 : index
    %49 = vector.load %arg13[%c0_33, %c0_34] : memref<46x16xf32, #tpu.memory_space<vmem>>, vector<32x16xf32>
    %c0_35 = arith.constant 0 : index
    %c0_36 = arith.constant 0 : index
    %c0_37 = arith.constant 0 : index
    %50 = vector.load %arg4[%c0_35, %c0_36, %c0_37] : memref<15x16x32xf32, #tpu.memory_space<vmem>>, vector<1x16x32xf32>
    %51 = vector.shape_cast %50 : vector<1x16x32xf32> to vector<16x32xf32>
    %cst_38 = arith.constant dense<0.000000e+00> : vector<32x32xf32>
    %52 = tpu.matmul %49, %51, %cst_38 {dimension_numbers = #tpu.dot_dimension_numbers<[1], [0], [0], [1], [0, 0, 1, 1], [], []>} : vector<32x16xf32>, vector<16x32xf32>, vector<32x32xf32> -> vector<32x32xf32>
    %53 = arith.addf %48, %52 : vector<32x32xf32>
    %c1_39 = arith.constant 1 : index
    %c0_40 = arith.constant 0 : index
    %54 = vector.load %arg13[%c1_39, %c0_40] : memref<46x16xf32, #tpu.memory_space<vmem>>, vector<32x16xf32>
    %c1_41 = arith.constant 1 : index
    %c0_42 = arith.constant 0 : index
    %c0_43 = arith.constant 0 : index
    %55 = vector.load %arg4[%c1_41, %c0_42, %c0_43] : memref<15x16x32xf32, #tpu.memory_space<vmem>>, vector<1x16x32xf32>
    %56 = vector.shape_cast %55 : vector<1x16x32xf32> to vector<16x32xf32>
    %cst_44 = arith.constant dense<0.000000e+00> : vector<32x32xf32>
    %57 = tpu.matmul %54, %56, %cst_44 {dimension_numbers = #tpu.dot_dimension_numbers<[1], [0], [0], [1], [0, 0, 1, 1], [], []>} : vector<32x16xf32>, vector<16x32xf32>, vector<32x32xf32> -> vector<32x32xf32>
    %58 = arith.addf %53, %57 : vector<32x32xf32>
    %c2_45 = arith.constant 2 : index
    %c0_46 = arith.constant 0 : index
    %59 = vector.load %arg13[%c2_45, %c0_46] : memref<46x16xf32, #tpu.memory_space<vmem>>, vector<32x16xf32>
    %c2_47 = arith.constant 2 : index
    %c0_48 = arith.constant 0 : index
    %c0_49 = arith.constant 0 : index
    %60 = vector.load %arg4[%c2_47, %c0_48, %c0_49] : memref<15x16x32xf32, #tpu.memory_space<vmem>>, vector<1x16x32xf32>
    %61 = vector.shape_cast %60 : vector<1x16x32xf32> to vector<16x32xf32>
    %cst_50 = arith.constant dense<0.000000e+00> : vector<32x32xf32>
    %62 = tpu.matmul %59, %61, %cst_50 {dimension_numbers = #tpu.dot_dimension_numbers<[1], [0], [0], [1], [0, 0, 1, 1], [], []>} : vector<32x16xf32>, vector<16x32xf32>, vector<32x32xf32> -> vector<32x32xf32>
    %63 = arith.addf %58, %62 : vector<32x32xf32>
    %c3_51 = arith.constant 3 : index
    %c0_52 = arith.constant 0 : index
    %64 = vector.load %arg13[%c3_51, %c0_52] : memref<46x16xf32, #tpu.memory_space<vmem>>, vector<32x16xf32>
    %c3_53 = arith.constant 3 : index
    %c0_54 = arith.constant 0 : index
    %c0_55 = arith.constant 0 : index
    %65 = vector.load %arg4[%c3_53, %c0_54, %c0_55] : memref<15x16x32xf32, #tpu.memory_space<vmem>>, vector<1x16x32xf32>
    %66 = vector.shape_cast %65 : vector<1x16x32xf32> to vector<16x32xf32>
    %cst_56 = arith.constant dense<0.000000e+00> : vector<32x32xf32>
    %67 = tpu.matmul %64, %66, %cst_56 {dimension_numbers = #tpu.dot_dimension_numbers<[1], [0], [0], [1], [0, 0, 1, 1], [], []>} : vector<32x16xf32>, vector<16x32xf32>, vector<32x32xf32> -> vector<32x32xf32>
    %68 = arith.addf %63, %67 : vector<32x32xf32>
    %c4 = arith.constant 4 : index
    %c0_57 = arith.constant 0 : index
    %69 = vector.load %arg13[%c4, %c0_57] : memref<46x16xf32, #tpu.memory_space<vmem>>, vector<32x16xf32>
    %c4_58 = arith.constant 4 : index
    %c0_59 = arith.constant 0 : index
    %c0_60 = arith.constant 0 : index
    %70 = vector.load %arg4[%c4_58, %c0_59, %c0_60] : memref<15x16x32xf32, #tpu.memory_space<vmem>>, vector<1x16x32xf32>
    %71 = vector.shape_cast %70 : vector<1x16x32xf32> to vector<16x32xf32>
    %cst_61 = arith.constant dense<0.000000e+00> : vector<32x32xf32>
    %72 = tpu.matmul %69, %71, %cst_61 {dimension_numbers = #tpu.dot_dimension_numbers<[1], [0], [0], [1], [0, 0, 1, 1], [], []>} : vector<32x16xf32>, vector<16x32xf32>, vector<32x32xf32> -> vector<32x32xf32>
    %73 = arith.addf %68, %72 : vector<32x32xf32>
    %c5 = arith.constant 5 : index
    %c0_62 = arith.constant 0 : index
    %74 = vector.load %arg13[%c5, %c0_62] : memref<46x16xf32, #tpu.memory_space<vmem>>, vector<32x16xf32>
    %c5_63 = arith.constant 5 : index
    %c0_64 = arith.constant 0 : index
    %c0_65 = arith.constant 0 : index
    %75 = vector.load %arg4[%c5_63, %c0_64, %c0_65] : memref<15x16x32xf32, #tpu.memory_space<vmem>>, vector<1x16x32xf32>
    %76 = vector.shape_cast %75 : vector<1x16x32xf32> to vector<16x32xf32>
    %cst_66 = arith.constant dense<0.000000e+00> : vector<32x32xf32>
    %77 = tpu.matmul %74, %76, %cst_66 {dimension_numbers = #tpu.dot_dimension_numbers<[1], [0], [0], [1], [0, 0, 1, 1], [], []>} : vector<32x16xf32>, vector<16x32xf32>, vector<32x32xf32> -> vector<32x32xf32>
    %78 = arith.addf %73, %77 : vector<32x32xf32>
    %c6 = arith.constant 6 : index
    %c0_67 = arith.constant 0 : index
    %79 = vector.load %arg13[%c6, %c0_67] : memref<46x16xf32, #tpu.memory_space<vmem>>, vector<32x16xf32>
    %c6_68 = arith.constant 6 : index
    %c0_69 = arith.constant 0 : index
    %c0_70 = arith.constant 0 : index
    %80 = vector.load %arg4[%c6_68, %c0_69, %c0_70] : memref<15x16x32xf32, #tpu.memory_space<vmem>>, vector<1x16x32xf32>
    %81 = vector.shape_cast %80 : vector<1x16x32xf32> to vector<16x32xf32>
    %cst_71 = arith.constant dense<0.000000e+00> : vector<32x32xf32>
    %82 = tpu.matmul %79, %81, %cst_71 {dimension_numbers = #tpu.dot_dimension_numbers<[1], [0], [0], [1], [0, 0, 1, 1], [], []>} : vector<32x16xf32>, vector<16x32xf32>, vector<32x32xf32> -> vector<32x32xf32>
    %83 = arith.addf %78, %82 : vector<32x32xf32>
    %c7_72 = arith.constant 7 : index
    %c0_73 = arith.constant 0 : index
    %84 = vector.load %arg13[%c7_72, %c0_73] : memref<46x16xf32, #tpu.memory_space<vmem>>, vector<32x16xf32>
    %c7_74 = arith.constant 7 : index
    %c0_75 = arith.constant 0 : index
    %c0_76 = arith.constant 0 : index
    %85 = vector.load %arg4[%c7_74, %c0_75, %c0_76] : memref<15x16x32xf32, #tpu.memory_space<vmem>>, vector<1x16x32xf32>
    %86 = vector.shape_cast %85 : vector<1x16x32xf32> to vector<16x32xf32>
    %cst_77 = arith.constant dense<0.000000e+00> : vector<32x32xf32>
    %87 = tpu.matmul %84, %86, %cst_77 {dimension_numbers = #tpu.dot_dimension_numbers<[1], [0], [0], [1], [0, 0, 1, 1], [], []>} : vector<32x16xf32>, vector<16x32xf32>, vector<32x32xf32> -> vector<32x32xf32>
    %88 = arith.addf %83, %87 : vector<32x32xf32>
    %c8 = arith.constant 8 : index
    %c0_78 = arith.constant 0 : index
    %89 = vector.load %arg13[%c8, %c0_78] : memref<46x16xf32, #tpu.memory_space<vmem>>, vector<32x16xf32>
    %c8_79 = arith.constant 8 : index
    %c0_80 = arith.constant 0 : index
    %c0_81 = arith.constant 0 : index
    %90 = vector.load %arg4[%c8_79, %c0_80, %c0_81] : memref<15x16x32xf32, #tpu.memory_space<vmem>>, vector<1x16x32xf32>
    %91 = vector.shape_cast %90 : vector<1x16x32xf32> to vector<16x32xf32>
    %cst_82 = arith.constant dense<0.000000e+00> : vector<32x32xf32>
    %92 = tpu.matmul %89, %91, %cst_82 {dimension_numbers = #tpu.dot_dimension_numbers<[1], [0], [0], [1], [0, 0, 1, 1], [], []>} : vector<32x16xf32>, vector<16x32xf32>, vector<32x32xf32> -> vector<32x32xf32>
    %93 = arith.addf %88, %92 : vector<32x32xf32>
    %c9 = arith.constant 9 : index
    %c0_83 = arith.constant 0 : index
    %94 = vector.load %arg13[%c9, %c0_83] : memref<46x16xf32, #tpu.memory_space<vmem>>, vector<32x16xf32>
    %c9_84 = arith.constant 9 : index
    %c0_85 = arith.constant 0 : index
    %c0_86 = arith.constant 0 : index
    %95 = vector.load %arg4[%c9_84, %c0_85, %c0_86] : memref<15x16x32xf32, #tpu.memory_space<vmem>>, vector<1x16x32xf32>
    %96 = vector.shape_cast %95 : vector<1x16x32xf32> to vector<16x32xf32>
    %cst_87 = arith.constant dense<0.000000e+00> : vector<32x32xf32>
    %97 = tpu.matmul %94, %96, %cst_87 {dimension_numbers = #tpu.dot_dimension_numbers<[1], [0], [0], [1], [0, 0, 1, 1], [], []>} : vector<32x16xf32>, vector<16x32xf32>, vector<32x32xf32> -> vector<32x32xf32>
    %98 = arith.addf %93, %97 : vector<32x32xf32>
    %c10 = arith.constant 10 : index
    %c0_88 = arith.constant 0 : index
    %99 = vector.load %arg13[%c10, %c0_88] : memref<46x16xf32, #tpu.memory_space<vmem>>, vector<32x16xf32>
    %c10_89 = arith.constant 10 : index
    %c0_90 = arith.constant 0 : index
    %c0_91 = arith.constant 0 : index
    %100 = vector.load %arg4[%c10_89, %c0_90, %c0_91] : memref<15x16x32xf32, #tpu.memory_space<vmem>>, vector<1x16x32xf32>
    %101 = vector.shape_cast %100 : vector<1x16x32xf32> to vector<16x32xf32>
    %cst_92 = arith.constant dense<0.000000e+00> : vector<32x32xf32>
    %102 = tpu.matmul %99, %101, %cst_92 {dimension_numbers = #tpu.dot_dimension_numbers<[1], [0], [0], [1], [0, 0, 1, 1], [], []>} : vector<32x16xf32>, vector<16x32xf32>, vector<32x32xf32> -> vector<32x32xf32>
    %103 = arith.addf %98, %102 : vector<32x32xf32>
    %c11 = arith.constant 11 : index
    %c0_93 = arith.constant 0 : index
    %104 = vector.load %arg13[%c11, %c0_93] : memref<46x16xf32, #tpu.memory_space<vmem>>, vector<32x16xf32>
    %c11_94 = arith.constant 11 : index
    %c0_95 = arith.constant 0 : index
    %c0_96 = arith.constant 0 : index
    %105 = vector.load %arg4[%c11_94, %c0_95, %c0_96] : memref<15x16x32xf32, #tpu.memory_space<vmem>>, vector<1x16x32xf32>
    %106 = vector.shape_cast %105 : vector<1x16x32xf32> to vector<16x32xf32>
    %cst_97 = arith.constant dense<0.000000e+00> : vector<32x32xf32>
    %107 = tpu.matmul %104, %106, %cst_97 {dimension_numbers = #tpu.dot_dimension_numbers<[1], [0], [0], [1], [0, 0, 1, 1], [], []>} : vector<32x16xf32>, vector<16x32xf32>, vector<32x32xf32> -> vector<32x32xf32>
    %108 = arith.addf %103, %107 : vector<32x32xf32>
    %c12 = arith.constant 12 : index
    %c0_98 = arith.constant 0 : index
    %109 = vector.load %arg13[%c12, %c0_98] : memref<46x16xf32, #tpu.memory_space<vmem>>, vector<32x16xf32>
    %c12_99 = arith.constant 12 : index
    %c0_100 = arith.constant 0 : index
    %c0_101 = arith.constant 0 : index
    %110 = vector.load %arg4[%c12_99, %c0_100, %c0_101] : memref<15x16x32xf32, #tpu.memory_space<vmem>>, vector<1x16x32xf32>
    %111 = vector.shape_cast %110 : vector<1x16x32xf32> to vector<16x32xf32>
    %cst_102 = arith.constant dense<0.000000e+00> : vector<32x32xf32>
    %112 = tpu.matmul %109, %111, %cst_102 {dimension_numbers = #tpu.dot_dimension_numbers<[1], [0], [0], [1], [0, 0, 1, 1], [], []>} : vector<32x16xf32>, vector<16x32xf32>, vector<32x32xf32> -> vector<32x32xf32>
    %113 = arith.addf %108, %112 : vector<32x32xf32>
    %c13 = arith.constant 13 : index
    %c0_103 = arith.constant 0 : index
    %114 = vector.load %arg13[%c13, %c0_103] : memref<46x16xf32, #tpu.memory_space<vmem>>, vector<32x16xf32>
    %c13_104 = arith.constant 13 : index
    %c0_105 = arith.constant 0 : index
    %c0_106 = arith.constant 0 : index
    %115 = vector.load %arg4[%c13_104, %c0_105, %c0_106] : memref<15x16x32xf32, #tpu.memory_space<vmem>>, vector<1x16x32xf32>
    %116 = vector.shape_cast %115 : vector<1x16x32xf32> to vector<16x32xf32>
    %cst_107 = arith.constant dense<0.000000e+00> : vector<32x32xf32>
    %117 = tpu.matmul %114, %116, %cst_107 {dimension_numbers = #tpu.dot_dimension_numbers<[1], [0], [0], [1], [0, 0, 1, 1], [], []>} : vector<32x16xf32>, vector<16x32xf32>, vector<32x32xf32> -> vector<32x32xf32>
    %118 = arith.addf %113, %117 : vector<32x32xf32>
    %c14 = arith.constant 14 : index
    %c0_108 = arith.constant 0 : index
    %119 = vector.load %arg13[%c14, %c0_108] : memref<46x16xf32, #tpu.memory_space<vmem>>, vector<32x16xf32>
    %c14_109 = arith.constant 14 : index
    %c0_110 = arith.constant 0 : index
    %c0_111 = arith.constant 0 : index
    %120 = vector.load %arg4[%c14_109, %c0_110, %c0_111] : memref<15x16x32xf32, #tpu.memory_space<vmem>>, vector<1x16x32xf32>
    %121 = vector.shape_cast %120 : vector<1x16x32xf32> to vector<16x32xf32>
    %cst_112 = arith.constant dense<0.000000e+00> : vector<32x32xf32>
    %122 = tpu.matmul %119, %121, %cst_112 {dimension_numbers = #tpu.dot_dimension_numbers<[1], [0], [0], [1], [0, 0, 1, 1], [], []>} : vector<32x16xf32>, vector<16x32xf32>, vector<32x32xf32> -> vector<32x32xf32>
    %123 = arith.addf %118, %122 : vector<32x32xf32>
    %124 = tpu.iota {dimensions = array<i32: 0>} : vector<16x32xi32>
    %125 = tpu.iota {dimensions = array<i32: 1>} : vector<16x32xi32>
    %c2_i32 = arith.constant 2 : i32
    %126 = vector.broadcast %c2_i32 : i32 to vector<16x32xi32>
    %127 = arith.muli %126, %124 : vector<16x32xi32>
    %128 = arith.cmpi eq, %125, %127 : vector<16x32xi32>
    %129 = arith.extui %128 : vector<16x32xi1> to vector<16x32xi32>
    %130 = arith.sitofp %129 : vector<16x32xi32> to vector<16x32xf32>
    %cst_113 = arith.constant dense<0.000000e+00> : vector<16x32xf32>
    %131 = tpu.matmul %130, %123, %cst_113 {dimension_numbers = #tpu.dot_dimension_numbers<[1], [0], [0], [1], [0, 0, 1, 1], [], []>} : vector<16x32xf32>, vector<32x32xf32>, vector<16x32xf32> -> vector<16x32xf32>
    %c0_114 = arith.constant 0 : index
    %c0_115 = arith.constant 0 : index
    %132 = vector.load %arg5[%c0_114, %c0_115] : memref<1x32xf32, #tpu.memory_space<vmem>>, vector<1x32xf32>
    %133 = vector.broadcast %132 : vector<1x32xf32> to vector<16x32xf32>
    %134 = arith.addf %131, %133 : vector<16x32xf32>
    %cst_116 = arith.constant 0.000000e+00 : f32
    %135 = vector.broadcast %cst_116 : f32 to vector<16x32xf32>
    %136 = arith.maximumf %134, %135 : vector<16x32xf32>
    %cst_117 = arith.constant 0.000000e+00 : f32
    %137 = vector.broadcast %cst_117 : f32 to vector<30x32xf32>
    %c0_118 = arith.constant 0 : index
    %c0_119 = arith.constant 0 : index
    %138 = vector.load %arg14[%c0_118, %c0_119] : memref<30x32xf32, #tpu.memory_space<vmem>>, vector<30x32xf32>
    tpu.vector_store %arg14[%c0_118, %c0_119], %137 {strides = array<i32>} : memref<30x32xf32, #tpu.memory_space<vmem>>, vector<30x32xf32>,
    %c7_120 = arith.constant 7 : index
    %c0_121 = arith.constant 0 : index
    %139 = vector.load %arg14[%c7_120, %c0_121] : memref<30x32xf32, #tpu.memory_space<vmem>>, vector<16x32xf32>
    tpu.vector_store %arg14[%c7_120, %c0_121], %136 {strides = array<i32>} : memref<30x32xf32, #tpu.memory_space<vmem>>, vector<16x32xf32>,
    %cst_122 = arith.constant 0.000000e+00 : f32
    %140 = vector.broadcast %cst_122 : f32 to vector<16x64xf32>
    %c0_123 = arith.constant 0 : index
    %c0_124 = arith.constant 0 : index
    %141 = vector.load %arg14[%c0_123, %c0_124] : memref<30x32xf32, #tpu.memory_space<vmem>>, vector<16x32xf32>
    %c0_125 = arith.constant 0 : index
    %c0_126 = arith.constant 0 : index
    %c0_127 = arith.constant 0 : index
    %142 = vector.load %arg6[%c0_125, %c0_126, %c0_127] : memref<15x32x64xf32, #tpu.memory_space<vmem>>, vector<1x32x64xf32>
    %143 = vector.shape_cast %142 : vector<1x32x64xf32> to vector<32x64xf32>
    %cst_128 = arith.constant dense<0.000000e+00> : vector<16x64xf32>
    %144 = tpu.matmul %141, %143, %cst_128 {dimension_numbers = #tpu.dot_dimension_numbers<[1], [0], [0], [1], [0, 0, 1, 1], [], []>} : vector<16x32xf32>, vector<32x64xf32>, vector<16x64xf32> -> vector<16x64xf32>
    %145 = arith.addf %140, %144 : vector<16x64xf32>
    %c1_129 = arith.constant 1 : index
    %c0_130 = arith.constant 0 : index
    %146 = vector.load %arg14[%c1_129, %c0_130] : memref<30x32xf32, #tpu.memory_space<vmem>>, vector<16x32xf32>
    %c1_131 = arith.constant 1 : index
    %c0_132 = arith.constant 0 : index
    %c0_133 = arith.constant 0 : index
    %147 = vector.load %arg6[%c1_131, %c0_132, %c0_133] : memref<15x32x64xf32, #tpu.memory_space<vmem>>, vector<1x32x64xf32>
    %148 = vector.shape_cast %147 : vector<1x32x64xf32> to vector<32x64xf32>
    %cst_134 = arith.constant dense<0.000000e+00> : vector<16x64xf32>
    %149 = tpu.matmul %146, %148, %cst_134 {dimension_numbers = #tpu.dot_dimension_numbers<[1], [0], [0], [1], [0, 0, 1, 1], [], []>} : vector<16x32xf32>, vector<32x64xf32>, vector<16x64xf32> -> vector<16x64xf32>
    %150 = arith.addf %145, %149 : vector<16x64xf32>
    %c2_135 = arith.constant 2 : index
    %c0_136 = arith.constant 0 : index
    %151 = vector.load %arg14[%c2_135, %c0_136] : memref<30x32xf32, #tpu.memory_space<vmem>>, vector<16x32xf32>
    %c2_137 = arith.constant 2 : index
    %c0_138 = arith.constant 0 : index
    %c0_139 = arith.constant 0 : index
    %152 = vector.load %arg6[%c2_137, %c0_138, %c0_139] : memref<15x32x64xf32, #tpu.memory_space<vmem>>, vector<1x32x64xf32>
    %153 = vector.shape_cast %152 : vector<1x32x64xf32> to vector<32x64xf32>
    %cst_140 = arith.constant dense<0.000000e+00> : vector<16x64xf32>
    %154 = tpu.matmul %151, %153, %cst_140 {dimension_numbers = #tpu.dot_dimension_numbers<[1], [0], [0], [1], [0, 0, 1, 1], [], []>} : vector<16x32xf32>, vector<32x64xf32>, vector<16x64xf32> -> vector<16x64xf32>
    %155 = arith.addf %150, %154 : vector<16x64xf32>
    %c3_141 = arith.constant 3 : index
    %c0_142 = arith.constant 0 : index
    %156 = vector.load %arg14[%c3_141, %c0_142] : memref<30x32xf32, #tpu.memory_space<vmem>>, vector<16x32xf32>
    %c3_143 = arith.constant 3 : index
    %c0_144 = arith.constant 0 : index
    %c0_145 = arith.constant 0 : index
    %157 = vector.load %arg6[%c3_143, %c0_144, %c0_145] : memref<15x32x64xf32, #tpu.memory_space<vmem>>, vector<1x32x64xf32>
    %158 = vector.shape_cast %157 : vector<1x32x64xf32> to vector<32x64xf32>
    %cst_146 = arith.constant dense<0.000000e+00> : vector<16x64xf32>
    %159 = tpu.matmul %156, %158, %cst_146 {dimension_numbers = #tpu.dot_dimension_numbers<[1], [0], [0], [1], [0, 0, 1, 1], [], []>} : vector<16x32xf32>, vector<32x64xf32>, vector<16x64xf32> -> vector<16x64xf32>
    %160 = arith.addf %155, %159 : vector<16x64xf32>
    %c4_147 = arith.constant 4 : index
    %c0_148 = arith.constant 0 : index
    %161 = vector.load %arg14[%c4_147, %c0_148] : memref<30x32xf32, #tpu.memory_space<vmem>>, vector<16x32xf32>
    %c4_149 = arith.constant 4 : index
    %c0_150 = arith.constant 0 : index
    %c0_151 = arith.constant 0 : index
    %162 = vector.load %arg6[%c4_149, %c0_150, %c0_151] : memref<15x32x64xf32, #tpu.memory_space<vmem>>, vector<1x32x64xf32>
    %163 = vector.shape_cast %162 : vector<1x32x64xf32> to vector<32x64xf32>
    %cst_152 = arith.constant dense<0.000000e+00> : vector<16x64xf32>
    %164 = tpu.matmul %161, %163, %cst_152 {dimension_numbers = #tpu.dot_dimension_numbers<[1], [0], [0], [1], [0, 0, 1, 1], [], []>} : vector<16x32xf32>, vector<32x64xf32>, vector<16x64xf32> -> vector<16x64xf32>
    %165 = arith.addf %160, %164 : vector<16x64xf32>
    %c5_153 = arith.constant 5 : index
    %c0_154 = arith.constant 0 : index
    %166 = vector.load %arg14[%c5_153, %c0_154] : memref<30x32xf32, #tpu.memory_space<vmem>>, vector<16x32xf32>
    %c5_155 = arith.constant 5 : index
    %c0_156 = arith.constant 0 : index
    %c0_157 = arith.constant 0 : index
    %167 = vector.load %arg6[%c5_155, %c0_156, %c0_157] : memref<15x32x64xf32, #tpu.memory_space<vmem>>, vector<1x32x64xf32>
    %168 = vector.shape_cast %167 : vector<1x32x64xf32> to vector<32x64xf32>
    %cst_158 = arith.constant dense<0.000000e+00> : vector<16x64xf32>
    %169 = tpu.matmul %166, %168, %cst_158 {dimension_numbers = #tpu.dot_dimension_numbers<[1], [0], [0], [1], [0, 0, 1, 1], [], []>} : vector<16x32xf32>, vector<32x64xf32>, vector<16x64xf32> -> vector<16x64xf32>
    %170 = arith.addf %165, %169 : vector<16x64xf32>
    %c6_159 = arith.constant 6 : index
    %c0_160 = arith.constant 0 : index
    %171 = vector.load %arg14[%c6_159, %c0_160] : memref<30x32xf32, #tpu.memory_space<vmem>>, vector<16x32xf32>
    %c6_161 = arith.constant 6 : index
    %c0_162 = arith.constant 0 : index
    %c0_163 = arith.constant 0 : index
    %172 = vector.load %arg6[%c6_161, %c0_162, %c0_163] : memref<15x32x64xf32, #tpu.memory_space<vmem>>, vector<1x32x64xf32>
    %173 = vector.shape_cast %172 : vector<1x32x64xf32> to vector<32x64xf32>
    %cst_164 = arith.constant dense<0.000000e+00> : vector<16x64xf32>
    %174 = tpu.matmul %171, %173, %cst_164 {dimension_numbers = #tpu.dot_dimension_numbers<[1], [0], [0], [1], [0, 0, 1, 1], [], []>} : vector<16x32xf32>, vector<32x64xf32>, vector<16x64xf32> -> vector<16x64xf32>
    %175 = arith.addf %170, %174 : vector<16x64xf32>
    %c7_165 = arith.constant 7 : index
    %c0_166 = arith.constant 0 : index
    %176 = vector.load %arg14[%c7_165, %c0_166] : memref<30x32xf32, #tpu.memory_space<vmem>>, vector<16x32xf32>
    %c7_167 = arith.constant 7 : index
    %c0_168 = arith.constant 0 : index
    %c0_169 = arith.constant 0 : index
    %177 = vector.load %arg6[%c7_167, %c0_168, %c0_169] : memref<15x32x64xf32, #tpu.memory_space<vmem>>, vector<1x32x64xf32>
    %178 = vector.shape_cast %177 : vector<1x32x64xf32> to vector<32x64xf32>
    %cst_170 = arith.constant dense<0.000000e+00> : vector<16x64xf32>
    %179 = tpu.matmul %176, %178, %cst_170 {dimension_numbers = #tpu.dot_dimension_numbers<[1], [0], [0], [1], [0, 0, 1, 1], [], []>} : vector<16x32xf32>, vector<32x64xf32>, vector<16x64xf32> -> vector<16x64xf32>
    %180 = arith.addf %175, %179 : vector<16x64xf32>
    %c8_171 = arith.constant 8 : index
    %c0_172 = arith.constant 0 : index
    %181 = vector.load %arg14[%c8_171, %c0_172] : memref<30x32xf32, #tpu.memory_space<vmem>>, vector<16x32xf32>
    %c8_173 = arith.constant 8 : index
    %c0_174 = arith.constant 0 : index
    %c0_175 = arith.constant 0 : index
    %182 = vector.load %arg6[%c8_173, %c0_174, %c0_175] : memref<15x32x64xf32, #tpu.memory_space<vmem>>, vector<1x32x64xf32>
    %183 = vector.shape_cast %182 : vector<1x32x64xf32> to vector<32x64xf32>
    %cst_176 = arith.constant dense<0.000000e+00> : vector<16x64xf32>
    %184 = tpu.matmul %181, %183, %cst_176 {dimension_numbers = #tpu.dot_dimension_numbers<[1], [0], [0], [1], [0, 0, 1, 1], [], []>} : vector<16x32xf32>, vector<32x64xf32>, vector<16x64xf32> -> vector<16x64xf32>
    %185 = arith.addf %180, %184 : vector<16x64xf32>
    %c9_177 = arith.constant 9 : index
    %c0_178 = arith.constant 0 : index
    %186 = vector.load %arg14[%c9_177, %c0_178] : memref<30x32xf32, #tpu.memory_space<vmem>>, vector<16x32xf32>
    %c9_179 = arith.constant 9 : index
    %c0_180 = arith.constant 0 : index
    %c0_181 = arith.constant 0 : index
    %187 = vector.load %arg6[%c9_179, %c0_180, %c0_181] : memref<15x32x64xf32, #tpu.memory_space<vmem>>, vector<1x32x64xf32>
    %188 = vector.shape_cast %187 : vector<1x32x64xf32> to vector<32x64xf32>
    %cst_182 = arith.constant dense<0.000000e+00> : vector<16x64xf32>
    %189 = tpu.matmul %186, %188, %cst_182 {dimension_numbers = #tpu.dot_dimension_numbers<[1], [0], [0], [1], [0, 0, 1, 1], [], []>} : vector<16x32xf32>, vector<32x64xf32>, vector<16x64xf32> -> vector<16x64xf32>
    %190 = arith.addf %185, %189 : vector<16x64xf32>
    %c10_183 = arith.constant 10 : index
    %c0_184 = arith.constant 0 : index
    %191 = vector.load %arg14[%c10_183, %c0_184] : memref<30x32xf32, #tpu.memory_space<vmem>>, vector<16x32xf32>
    %c10_185 = arith.constant 10 : index
    %c0_186 = arith.constant 0 : index
    %c0_187 = arith.constant 0 : index
    %192 = vector.load %arg6[%c10_185, %c0_186, %c0_187] : memref<15x32x64xf32, #tpu.memory_space<vmem>>, vector<1x32x64xf32>
    %193 = vector.shape_cast %192 : vector<1x32x64xf32> to vector<32x64xf32>
    %cst_188 = arith.constant dense<0.000000e+00> : vector<16x64xf32>
    %194 = tpu.matmul %191, %193, %cst_188 {dimension_numbers = #tpu.dot_dimension_numbers<[1], [0], [0], [1], [0, 0, 1, 1], [], []>} : vector<16x32xf32>, vector<32x64xf32>, vector<16x64xf32> -> vector<16x64xf32>
    %195 = arith.addf %190, %194 : vector<16x64xf32>
    %c11_189 = arith.constant 11 : index
    %c0_190 = arith.constant 0 : index
    %196 = vector.load %arg14[%c11_189, %c0_190] : memref<30x32xf32, #tpu.memory_space<vmem>>, vector<16x32xf32>
    %c11_191 = arith.constant 11 : index
    %c0_192 = arith.constant 0 : index
    %c0_193 = arith.constant 0 : index
    %197 = vector.load %arg6[%c11_191, %c0_192, %c0_193] : memref<15x32x64xf32, #tpu.memory_space<vmem>>, vector<1x32x64xf32>
    %198 = vector.shape_cast %197 : vector<1x32x64xf32> to vector<32x64xf32>
    %cst_194 = arith.constant dense<0.000000e+00> : vector<16x64xf32>
    %199 = tpu.matmul %196, %198, %cst_194 {dimension_numbers = #tpu.dot_dimension_numbers<[1], [0], [0], [1], [0, 0, 1, 1], [], []>} : vector<16x32xf32>, vector<32x64xf32>, vector<16x64xf32> -> vector<16x64xf32>
    %200 = arith.addf %195, %199 : vector<16x64xf32>
    %c12_195 = arith.constant 12 : index
    %c0_196 = arith.constant 0 : index
    %201 = vector.load %arg14[%c12_195, %c0_196] : memref<30x32xf32, #tpu.memory_space<vmem>>, vector<16x32xf32>
    %c12_197 = arith.constant 12 : index
    %c0_198 = arith.constant 0 : index
    %c0_199 = arith.constant 0 : index
    %202 = vector.load %arg6[%c12_197, %c0_198, %c0_199] : memref<15x32x64xf32, #tpu.memory_space<vmem>>, vector<1x32x64xf32>
    %203 = vector.shape_cast %202 : vector<1x32x64xf32> to vector<32x64xf32>
    %cst_200 = arith.constant dense<0.000000e+00> : vector<16x64xf32>
    %204 = tpu.matmul %201, %203, %cst_200 {dimension_numbers = #tpu.dot_dimension_numbers<[1], [0], [0], [1], [0, 0, 1, 1], [], []>} : vector<16x32xf32>, vector<32x64xf32>, vector<16x64xf32> -> vector<16x64xf32>
    %205 = arith.addf %200, %204 : vector<16x64xf32>
    %c13_201 = arith.constant 13 : index
    %c0_202 = arith.constant 0 : index
    %206 = vector.load %arg14[%c13_201, %c0_202] : memref<30x32xf32, #tpu.memory_space<vmem>>, vector<16x32xf32>
    %c13_203 = arith.constant 13 : index
    %c0_204 = arith.constant 0 : index
    %c0_205 = arith.constant 0 : index
    %207 = vector.load %arg6[%c13_203, %c0_204, %c0_205] : memref<15x32x64xf32, #tpu.memory_space<vmem>>, vector<1x32x64xf32>
    %208 = vector.shape_cast %207 : vector<1x32x64xf32> to vector<32x64xf32>
    %cst_206 = arith.constant dense<0.000000e+00> : vector<16x64xf32>
    %209 = tpu.matmul %206, %208, %cst_206 {dimension_numbers = #tpu.dot_dimension_numbers<[1], [0], [0], [1], [0, 0, 1, 1], [], []>} : vector<16x32xf32>, vector<32x64xf32>, vector<16x64xf32> -> vector<16x64xf32>
    %210 = arith.addf %205, %209 : vector<16x64xf32>
    %c14_207 = arith.constant 14 : index
    %c0_208 = arith.constant 0 : index
    %211 = vector.load %arg14[%c14_207, %c0_208] : memref<30x32xf32, #tpu.memory_space<vmem>>, vector<16x32xf32>
    %c14_209 = arith.constant 14 : index
    %c0_210 = arith.constant 0 : index
    %c0_211 = arith.constant 0 : index
    %212 = vector.load %arg6[%c14_209, %c0_210, %c0_211] : memref<15x32x64xf32, #tpu.memory_space<vmem>>, vector<1x32x64xf32>
    %213 = vector.shape_cast %212 : vector<1x32x64xf32> to vector<32x64xf32>
    %cst_212 = arith.constant dense<0.000000e+00> : vector<16x64xf32>
    %214 = tpu.matmul %211, %213, %cst_212 {dimension_numbers = #tpu.dot_dimension_numbers<[1], [0], [0], [1], [0, 0, 1, 1], [], []>} : vector<16x32xf32>, vector<32x64xf32>, vector<16x64xf32> -> vector<16x64xf32>
    %215 = arith.addf %210, %214 : vector<16x64xf32>
    %216 = tpu.iota {dimensions = array<i32: 0>} : vector<8x16xi32>
    %217 = tpu.iota {dimensions = array<i32: 1>} : vector<8x16xi32>
    %c2_i32_213 = arith.constant 2 : i32
    %218 = vector.broadcast %c2_i32_213 : i32 to vector<8x16xi32>
    %219 = arith.muli %218, %216 : vector<8x16xi32>
    %220 = arith.cmpi eq, %217, %219 : vector<8x16xi32>
    %221 = arith.extui %220 : vector<8x16xi1> to vector<8x16xi32>
    %222 = arith.sitofp %221 : vector<8x16xi32> to vector<8x16xf32>
    %cst_214 = arith.constant dense<0.000000e+00> : vector<8x64xf32>
    %223 = tpu.matmul %222, %215, %cst_214 {dimension_numbers = #tpu.dot_dimension_numbers<[1], [0], [0], [1], [0, 0, 1, 1], [], []>} : vector<8x16xf32>, vector<16x64xf32>, vector<8x64xf32> -> vector<8x64xf32>
    %c0_215 = arith.constant 0 : index
    %c0_216 = arith.constant 0 : index
    %224 = vector.load %arg7[%c0_215, %c0_216] : memref<1x64xf32, #tpu.memory_space<vmem>>, vector<1x64xf32>
    %225 = vector.broadcast %224 : vector<1x64xf32> to vector<8x64xf32>
    %226 = arith.addf %223, %225 : vector<8x64xf32>
    %cst_217 = arith.constant 0.000000e+00 : f32
    %227 = vector.broadcast %cst_217 : f32 to vector<8x64xf32>
    %228 = arith.maximumf %226, %227 : vector<8x64xf32>
    %cst_218 = arith.constant 0.000000e+00 : f32
    %229 = vector.broadcast %cst_218 : f32 to vector<22x64xf32>
    %c0_219 = arith.constant 0 : index
    %c0_220 = arith.constant 0 : index
    %230 = vector.load %arg15[%c0_219, %c0_220] : memref<22x64xf32, #tpu.memory_space<vmem>>, vector<22x64xf32>
    tpu.vector_store %arg15[%c0_219, %c0_220], %229 {strides = array<i32>} : memref<22x64xf32, #tpu.memory_space<vmem>>, vector<22x64xf32>,
    %c7_221 = arith.constant 7 : index
    %c0_222 = arith.constant 0 : index
    %231 = vector.load %arg15[%c7_221, %c0_222] : memref<22x64xf32, #tpu.memory_space<vmem>>, vector<8x64xf32>
    tpu.vector_store %arg15[%c7_221, %c0_222], %228 {strides = array<i32>} : memref<22x64xf32, #tpu.memory_space<vmem>>, vector<8x64xf32>,
    %cst_223 = arith.constant 0.000000e+00 : f32
    %232 = vector.broadcast %cst_223 : f32 to vector<8x128xf32>
    %c0_224 = arith.constant 0 : index
    %c0_225 = arith.constant 0 : index
    %233 = vector.load %arg15[%c0_224, %c0_225] : memref<22x64xf32, #tpu.memory_space<vmem>>, vector<8x64xf32>
    %c0_226 = arith.constant 0 : index
    %c0_227 = arith.constant 0 : index
    %c0_228 = arith.constant 0 : index
    %234 = vector.load %arg8[%c0_226, %c0_227, %c0_228] : memref<15x64x128xf32, #tpu.memory_space<vmem>>, vector<1x64x128xf32>
    %235 = vector.shape_cast %234 : vector<1x64x128xf32> to vector<64x128xf32>
    %cst_229 = arith.constant dense<0.000000e+00> : vector<8x128xf32>
    %236 = tpu.matmul %233, %235, %cst_229 {dimension_numbers = #tpu.dot_dimension_numbers<[1], [0], [0], [1], [0, 0, 1, 1], [], []>} : vector<8x64xf32>, vector<64x128xf32>, vector<8x128xf32> -> vector<8x128xf32>
    %237 = arith.addf %232, %236 : vector<8x128xf32>
    %c1_230 = arith.constant 1 : index
    %c0_231 = arith.constant 0 : index
    %238 = vector.load %arg15[%c1_230, %c0_231] : memref<22x64xf32, #tpu.memory_space<vmem>>, vector<8x64xf32>
    %c1_232 = arith.constant 1 : index
    %c0_233 = arith.constant 0 : index
    %c0_234 = arith.constant 0 : index
    %239 = vector.load %arg8[%c1_232, %c0_233, %c0_234] : memref<15x64x128xf32, #tpu.memory_space<vmem>>, vector<1x64x128xf32>
    %240 = vector.shape_cast %239 : vector<1x64x128xf32> to vector<64x128xf32>
    %cst_235 = arith.constant dense<0.000000e+00> : vector<8x128xf32>
    %241 = tpu.matmul %238, %240, %cst_235 {dimension_numbers = #tpu.dot_dimension_numbers<[1], [0], [0], [1], [0, 0, 1, 1], [], []>} : vector<8x64xf32>, vector<64x128xf32>, vector<8x128xf32> -> vector<8x128xf32>
    %242 = arith.addf %237, %241 : vector<8x128xf32>
    %c2_236 = arith.constant 2 : index
    %c0_237 = arith.constant 0 : index
    %243 = vector.load %arg15[%c2_236, %c0_237] : memref<22x64xf32, #tpu.memory_space<vmem>>, vector<8x64xf32>
    %c2_238 = arith.constant 2 : index
    %c0_239 = arith.constant 0 : index
    %c0_240 = arith.constant 0 : index
    %244 = vector.load %arg8[%c2_238, %c0_239, %c0_240] : memref<15x64x128xf32, #tpu.memory_space<vmem>>, vector<1x64x128xf32>
    %245 = vector.shape_cast %244 : vector<1x64x128xf32> to vector<64x128xf32>
    %cst_241 = arith.constant dense<0.000000e+00> : vector<8x128xf32>
    %246 = tpu.matmul %243, %245, %cst_241 {dimension_numbers = #tpu.dot_dimension_numbers<[1], [0], [0], [1], [0, 0, 1, 1], [], []>} : vector<8x64xf32>, vector<64x128xf32>, vector<8x128xf32> -> vector<8x128xf32>
    %247 = arith.addf %242, %246 : vector<8x128xf32>
    %c3_242 = arith.constant 3 : index
    %c0_243 = arith.constant 0 : index
    %248 = vector.load %arg15[%c3_242, %c0_243] : memref<22x64xf32, #tpu.memory_space<vmem>>, vector<8x64xf32>
    %c3_244 = arith.constant 3 : index
    %c0_245 = arith.constant 0 : index
    %c0_246 = arith.constant 0 : index
    %249 = vector.load %arg8[%c3_244, %c0_245, %c0_246] : memref<15x64x128xf32, #tpu.memory_space<vmem>>, vector<1x64x128xf32>
    %250 = vector.shape_cast %249 : vector<1x64x128xf32> to vector<64x128xf32>
    %cst_247 = arith.constant dense<0.000000e+00> : vector<8x128xf32>
    %251 = tpu.matmul %248, %250, %cst_247 {dimension_numbers = #tpu.dot_dimension_numbers<[1], [0], [0], [1], [0, 0, 1, 1], [], []>} : vector<8x64xf32>, vector<64x128xf32>, vector<8x128xf32> -> vector<8x128xf32>
    %252 = arith.addf %247, %251 : vector<8x128xf32>
    %c4_248 = arith.constant 4 : index
    %c0_249 = arith.constant 0 : index
    %253 = vector.load %arg15[%c4_248, %c0_249] : memref<22x64xf32, #tpu.memory_space<vmem>>, vector<8x64xf32>
    %c4_250 = arith.constant 4 : index
    %c0_251 = arith.constant 0 : index
    %c0_252 = arith.constant 0 : index
    %254 = vector.load %arg8[%c4_250, %c0_251, %c0_252] : memref<15x64x128xf32, #tpu.memory_space<vmem>>, vector<1x64x128xf32>
    %255 = vector.shape_cast %254 : vector<1x64x128xf32> to vector<64x128xf32>
    %cst_253 = arith.constant dense<0.000000e+00> : vector<8x128xf32>
    %256 = tpu.matmul %253, %255, %cst_253 {dimension_numbers = #tpu.dot_dimension_numbers<[1], [0], [0], [1], [0, 0, 1, 1], [], []>} : vector<8x64xf32>, vector<64x128xf32>, vector<8x128xf32> -> vector<8x128xf32>
    %257 = arith.addf %252, %256 : vector<8x128xf32>
    %c5_254 = arith.constant 5 : index
    %c0_255 = arith.constant 0 : index
    %258 = vector.load %arg15[%c5_254, %c0_255] : memref<22x64xf32, #tpu.memory_space<vmem>>, vector<8x64xf32>
    %c5_256 = arith.constant 5 : index
    %c0_257 = arith.constant 0 : index
    %c0_258 = arith.constant 0 : index
    %259 = vector.load %arg8[%c5_256, %c0_257, %c0_258] : memref<15x64x128xf32, #tpu.memory_space<vmem>>, vector<1x64x128xf32>
    %260 = vector.shape_cast %259 : vector<1x64x128xf32> to vector<64x128xf32>
    %cst_259 = arith.constant dense<0.000000e+00> : vector<8x128xf32>
    %261 = tpu.matmul %258, %260, %cst_259 {dimension_numbers = #tpu.dot_dimension_numbers<[1], [0], [0], [1], [0, 0, 1, 1], [], []>} : vector<8x64xf32>, vector<64x128xf32>, vector<8x128xf32> -> vector<8x128xf32>
    %262 = arith.addf %257, %261 : vector<8x128xf32>
    %c6_260 = arith.constant 6 : index
    %c0_261 = arith.constant 0 : index
    %263 = vector.load %arg15[%c6_260, %c0_261] : memref<22x64xf32, #tpu.memory_space<vmem>>, vector<8x64xf32>
    %c6_262 = arith.constant 6 : index
    %c0_263 = arith.constant 0 : index
    %c0_264 = arith.constant 0 : index
    %264 = vector.load %arg8[%c6_262, %c0_263, %c0_264] : memref<15x64x128xf32, #tpu.memory_space<vmem>>, vector<1x64x128xf32>
    %265 = vector.shape_cast %264 : vector<1x64x128xf32> to vector<64x128xf32>
    %cst_265 = arith.constant dense<0.000000e+00> : vector<8x128xf32>
    %266 = tpu.matmul %263, %265, %cst_265 {dimension_numbers = #tpu.dot_dimension_numbers<[1], [0], [0], [1], [0, 0, 1, 1], [], []>} : vector<8x64xf32>, vector<64x128xf32>, vector<8x128xf32> -> vector<8x128xf32>
    %267 = arith.addf %262, %266 : vector<8x128xf32>
    %c7_266 = arith.constant 7 : index
    %c0_267 = arith.constant 0 : index
    %268 = vector.load %arg15[%c7_266, %c0_267] : memref<22x64xf32, #tpu.memory_space<vmem>>, vector<8x64xf32>
    %c7_268 = arith.constant 7 : index
    %c0_269 = arith.constant 0 : index
    %c0_270 = arith.constant 0 : index
    %269 = vector.load %arg8[%c7_268, %c0_269, %c0_270] : memref<15x64x128xf32, #tpu.memory_space<vmem>>, vector<1x64x128xf32>
    %270 = vector.shape_cast %269 : vector<1x64x128xf32> to vector<64x128xf32>
    %cst_271 = arith.constant dense<0.000000e+00> : vector<8x128xf32>
    %271 = tpu.matmul %268, %270, %cst_271 {dimension_numbers = #tpu.dot_dimension_numbers<[1], [0], [0], [1], [0, 0, 1, 1], [], []>} : vector<8x64xf32>, vector<64x128xf32>, vector<8x128xf32> -> vector<8x128xf32>
    %272 = arith.addf %267, %271 : vector<8x128xf32>
    %c8_272 = arith.constant 8 : index
    %c0_273 = arith.constant 0 : index
    %273 = vector.load %arg15[%c8_272, %c0_273] : memref<22x64xf32, #tpu.memory_space<vmem>>, vector<8x64xf32>
    %c8_274 = arith.constant 8 : index
    %c0_275 = arith.constant 0 : index
    %c0_276 = arith.constant 0 : index
    %274 = vector.load %arg8[%c8_274, %c0_275, %c0_276] : memref<15x64x128xf32, #tpu.memory_space<vmem>>, vector<1x64x128xf32>
    %275 = vector.shape_cast %274 : vector<1x64x128xf32> to vector<64x128xf32>
    %cst_277 = arith.constant dense<0.000000e+00> : vector<8x128xf32>
    %276 = tpu.matmul %273, %275, %cst_277 {dimension_numbers = #tpu.dot_dimension_numbers<[1], [0], [0], [1], [0, 0, 1, 1], [], []>} : vector<8x64xf32>, vector<64x128xf32>, vector<8x128xf32> -> vector<8x128xf32>
    %277 = arith.addf %272, %276 : vector<8x128xf32>
    %c9_278 = arith.constant 9 : index
    %c0_279 = arith.constant 0 : index
    %278 = vector.load %arg15[%c9_278, %c0_279] : memref<22x64xf32, #tpu.memory_space<vmem>>, vector<8x64xf32>
    %c9_280 = arith.constant 9 : index
    %c0_281 = arith.constant 0 : index
    %c0_282 = arith.constant 0 : index
    %279 = vector.load %arg8[%c9_280, %c0_281, %c0_282] : memref<15x64x128xf32, #tpu.memory_space<vmem>>, vector<1x64x128xf32>
    %280 = vector.shape_cast %279 : vector<1x64x128xf32> to vector<64x128xf32>
    %cst_283 = arith.constant dense<0.000000e+00> : vector<8x128xf32>
    %281 = tpu.matmul %278, %280, %cst_283 {dimension_numbers = #tpu.dot_dimension_numbers<[1], [0], [0], [1], [0, 0, 1, 1], [], []>} : vector<8x64xf32>, vector<64x128xf32>, vector<8x128xf32> -> vector<8x128xf32>
    %282 = arith.addf %277, %281 : vector<8x128xf32>
    %c10_284 = arith.constant 10 : index
    %c0_285 = arith.constant 0 : index
    %283 = vector.load %arg15[%c10_284, %c0_285] : memref<22x64xf32, #tpu.memory_space<vmem>>, vector<8x64xf32>
    %c10_286 = arith.constant 10 : index
    %c0_287 = arith.constant 0 : index
    %c0_288 = arith.constant 0 : index
    %284 = vector.load %arg8[%c10_286, %c0_287, %c0_288] : memref<15x64x128xf32, #tpu.memory_space<vmem>>, vector<1x64x128xf32>
    %285 = vector.shape_cast %284 : vector<1x64x128xf32> to vector<64x128xf32>
    %cst_289 = arith.constant dense<0.000000e+00> : vector<8x128xf32>
    %286 = tpu.matmul %283, %285, %cst_289 {dimension_numbers = #tpu.dot_dimension_numbers<[1], [0], [0], [1], [0, 0, 1, 1], [], []>} : vector<8x64xf32>, vector<64x128xf32>, vector<8x128xf32> -> vector<8x128xf32>
    %287 = arith.addf %282, %286 : vector<8x128xf32>
    %c11_290 = arith.constant 11 : index
    %c0_291 = arith.constant 0 : index
    %288 = vector.load %arg15[%c11_290, %c0_291] : memref<22x64xf32, #tpu.memory_space<vmem>>, vector<8x64xf32>
    %c11_292 = arith.constant 11 : index
    %c0_293 = arith.constant 0 : index
    %c0_294 = arith.constant 0 : index
    %289 = vector.load %arg8[%c11_292, %c0_293, %c0_294] : memref<15x64x128xf32, #tpu.memory_space<vmem>>, vector<1x64x128xf32>
    %290 = vector.shape_cast %289 : vector<1x64x128xf32> to vector<64x128xf32>
    %cst_295 = arith.constant dense<0.000000e+00> : vector<8x128xf32>
    %291 = tpu.matmul %288, %290, %cst_295 {dimension_numbers = #tpu.dot_dimension_numbers<[1], [0], [0], [1], [0, 0, 1, 1], [], []>} : vector<8x64xf32>, vector<64x128xf32>, vector<8x128xf32> -> vector<8x128xf32>
    %292 = arith.addf %287, %291 : vector<8x128xf32>
    %c12_296 = arith.constant 12 : index
    %c0_297 = arith.constant 0 : index
    %293 = vector.load %arg15[%c12_296, %c0_297] : memref<22x64xf32, #tpu.memory_space<vmem>>, vector<8x64xf32>
    %c12_298 = arith.constant 12 : index
    %c0_299 = arith.constant 0 : index
    %c0_300 = arith.constant 0 : index
    %294 = vector.load %arg8[%c12_298, %c0_299, %c0_300] : memref<15x64x128xf32, #tpu.memory_space<vmem>>, vector<1x64x128xf32>
    %295 = vector.shape_cast %294 : vector<1x64x128xf32> to vector<64x128xf32>
    %cst_301 = arith.constant dense<0.000000e+00> : vector<8x128xf32>
    %296 = tpu.matmul %293, %295, %cst_301 {dimension_numbers = #tpu.dot_dimension_numbers<[1], [0], [0], [1], [0, 0, 1, 1], [], []>} : vector<8x64xf32>, vector<64x128xf32>, vector<8x128xf32> -> vector<8x128xf32>
    %297 = arith.addf %292, %296 : vector<8x128xf32>
    %c13_302 = arith.constant 13 : index
    %c0_303 = arith.constant 0 : index
    %298 = vector.load %arg15[%c13_302, %c0_303] : memref<22x64xf32, #tpu.memory_space<vmem>>, vector<8x64xf32>
    %c13_304 = arith.constant 13 : index
    %c0_305 = arith.constant 0 : index
    %c0_306 = arith.constant 0 : index
    %299 = vector.load %arg8[%c13_304, %c0_305, %c0_306] : memref<15x64x128xf32, #tpu.memory_space<vmem>>, vector<1x64x128xf32>
    %300 = vector.shape_cast %299 : vector<1x64x128xf32> to vector<64x128xf32>
    %cst_307 = arith.constant dense<0.000000e+00> : vector<8x128xf32>
    %301 = tpu.matmul %298, %300, %cst_307 {dimension_numbers = #tpu.dot_dimension_numbers<[1], [0], [0], [1], [0, 0, 1, 1], [], []>} : vector<8x64xf32>, vector<64x128xf32>, vector<8x128xf32> -> vector<8x128xf32>
    %302 = arith.addf %297, %301 : vector<8x128xf32>
    %c14_308 = arith.constant 14 : index
    %c0_309 = arith.constant 0 : index
    %303 = vector.load %arg15[%c14_308, %c0_309] : memref<22x64xf32, #tpu.memory_space<vmem>>, vector<8x64xf32>
    %c14_310 = arith.constant 14 : index
    %c0_311 = arith.constant 0 : index
    %c0_312 = arith.constant 0 : index
    %304 = vector.load %arg8[%c14_310, %c0_311, %c0_312] : memref<15x64x128xf32, #tpu.memory_space<vmem>>, vector<1x64x128xf32>
    %305 = vector.shape_cast %304 : vector<1x64x128xf32> to vector<64x128xf32>
    %cst_313 = arith.constant dense<0.000000e+00> : vector<8x128xf32>
    %306 = tpu.matmul %303, %305, %cst_313 {dimension_numbers = #tpu.dot_dimension_numbers<[1], [0], [0], [1], [0, 0, 1, 1], [], []>} : vector<8x64xf32>, vector<64x128xf32>, vector<8x128xf32> -> vector<8x128xf32>
    %307 = arith.addf %302, %306 : vector<8x128xf32>
    %308 = tpu.iota {dimensions = array<i32: 0>} : vector<4x8xi32>
    %309 = tpu.iota {dimensions = array<i32: 1>} : vector<4x8xi32>
    %c2_i32_314 = arith.constant 2 : i32
    %310 = vector.broadcast %c2_i32_314 : i32 to vector<4x8xi32>
    %311 = arith.muli %310, %308 : vector<4x8xi32>
    %312 = arith.cmpi eq, %309, %311 : vector<4x8xi32>
    %313 = arith.extui %312 : vector<4x8xi1> to vector<4x8xi32>
    %314 = arith.sitofp %313 : vector<4x8xi32> to vector<4x8xf32>
    %cst_315 = arith.constant dense<0.000000e+00> : vector<4x128xf32>
    %315 = tpu.matmul %314, %307, %cst_315 {dimension_numbers = #tpu.dot_dimension_numbers<[1], [0], [0], [1], [0, 0, 1, 1], [], []>} : vector<4x8xf32>, vector<8x128xf32>, vector<4x128xf32> -> vector<4x128xf32>
    %c0_316 = arith.constant 0 : index
    %c0_317 = arith.constant 0 : index
    %316 = vector.load %arg9[%c0_316, %c0_317] : memref<1x128xf32, #tpu.memory_space<vmem>>, vector<1x128xf32>
    %317 = vector.broadcast %316 : vector<1x128xf32> to vector<4x128xf32>
    %318 = arith.addf %315, %317 : vector<4x128xf32>
    %cst_318 = arith.constant 0.000000e+00 : f32
    %319 = vector.broadcast %cst_318 : f32 to vector<4x128xf32>
    %320 = arith.maximumf %318, %319 : vector<4x128xf32>
    %c0_319 = arith.constant 0 : index
    %c0_320 = arith.constant 0 : index
    %321 = vector.load %arg10[%c0_319, %c0_320] : memref<128x10xf32, #tpu.memory_space<vmem>>, vector<128x10xf32>
    %cst_321 = arith.constant dense<0.000000e+00> : vector<4x10xf32>
    %322 = tpu.matmul %320, %321, %cst_321 {dimension_numbers = #tpu.dot_dimension_numbers<[1], [0], [0], [1], [0, 0, 1, 1], [], []>} : vector<4x128xf32>, vector<128x10xf32>, vector<4x10xf32> -> vector<4x10xf32>
    %cst_322 = arith.constant dense<0.000000e+00> : vector<10xf32>
    %323 = vector.multi_reduction <add>, %322, %cst_322 [0] : vector<4x10xf32> to vector<10xf32>
    %324 = vector.shape_cast %323 : vector<10xf32> to vector<1x10xf32>
    %cst_323 = arith.constant 4.000000e+00 : f32
    %325 = vector.broadcast %cst_323 : f32 to vector<1x10xf32>
    %326 = arith.divf %324, %325 : vector<1x10xf32>
    %c0_324 = arith.constant 0 : index
    %c0_325 = arith.constant 0 : index
    %327 = vector.load %arg11[%c0_324, %c0_325] : memref<1x10xf32, #tpu.memory_space<vmem>>, vector<1x10xf32>
    %328 = arith.addf %326, %327 : vector<1x10xf32>
    %c0_326 = arith.constant 0 : index
    %c0_327 = arith.constant 0 : index
    %c0_328 = arith.constant 0 : index
    %329 = vector.load %arg12[%c0_326, %c0_327, %c0_328] : memref<1x1x10xf32, #tpu.memory_space<vmem>>, vector<1x1x10xf32>
    %330 = vector.shape_cast %329 : vector<1x1x10xf32> to vector<1x10xf32>
    %331 = vector.shape_cast %328 : vector<1x10xf32> to vector<1x1x10xf32>
    tpu.vector_store %arg12[%c0_326, %c0_327, %c0_328], %331 {strides = array<i32>} : memref<1x1x10xf32, #tpu.memory_space<vmem>>, vector<1x1x10xf32>,
    return
  }
  func.func @transform_0(%arg0: i32) -> (i32, i32, i32) {
    %c0_i32 = arith.constant 0 : i32
    %c0_i32_0 = arith.constant 0 : i32
    %c0_i32_1 = arith.constant 0 : i32
    return %arg0, %c0_i32, %c0_i32_0 : i32, i32, i32
  }
  func.func @transform_1(%arg0: i32) -> (i32, i32, i32) {
    %c0_i32 = arith.constant 0 : i32
    %c0_i32_0 = arith.constant 0 : i32
    %c0_i32_1 = arith.constant 0 : i32
    %c0_i32_2 = arith.constant 0 : i32
    return %c0_i32, %c0_i32_0, %c0_i32_1 : i32, i32, i32
  }
  func.func @transform_2(%arg0: i32) -> (i32, i32) {
    %c0_i32 = arith.constant 0 : i32
    %c0_i32_0 = arith.constant 0 : i32
    %c0_i32_1 = arith.constant 0 : i32
    return %c0_i32, %c0_i32_0 : i32, i32
  }
  func.func @transform_3(%arg0: i32) -> (i32, i32, i32) {
    %c0_i32 = arith.constant 0 : i32
    %c0_i32_0 = arith.constant 0 : i32
    %c0_i32_1 = arith.constant 0 : i32
    %c0_i32_2 = arith.constant 0 : i32
    return %c0_i32, %c0_i32_0, %c0_i32_1 : i32, i32, i32
  }
  func.func @transform_4(%arg0: i32) -> (i32, i32) {
    %c0_i32 = arith.constant 0 : i32
    %c0_i32_0 = arith.constant 0 : i32
    %c0_i32_1 = arith.constant 0 : i32
    return %c0_i32, %c0_i32_0 : i32, i32
  }
  func.func @transform_5(%arg0: i32) -> (i32, i32, i32) {
    %c0_i32 = arith.constant 0 : i32
    %c0_i32_0 = arith.constant 0 : i32
    %c0_i32_1 = arith.constant 0 : i32
    %c0_i32_2 = arith.constant 0 : i32
    return %c0_i32, %c0_i32_0, %c0_i32_1 : i32, i32, i32
  }
  func.func @transform_6(%arg0: i32) -> (i32, i32) {
    %c0_i32 = arith.constant 0 : i32
    %c0_i32_0 = arith.constant 0 : i32
    %c0_i32_1 = arith.constant 0 : i32
    return %c0_i32, %c0_i32_0 : i32, i32
  }
  func.func @transform_7(%arg0: i32) -> (i32, i32, i32) {
    %c0_i32 = arith.constant 0 : i32
    %c0_i32_0 = arith.constant 0 : i32
    %c0_i32_1 = arith.constant 0 : i32
    %c0_i32_2 = arith.constant 0 : i32
    return %c0_i32, %c0_i32_0, %c0_i32_1 : i32, i32, i32
  }
  func.func @transform_8(%arg0: i32) -> (i32, i32) {
    %c0_i32 = arith.constant 0 : i32
    %c0_i32_0 = arith.constant 0 : i32
    %c0_i32_1 = arith.constant 0 : i32
    return %c0_i32, %c0_i32_0 : i32, i32
  }
  func.func @transform_9(%arg0: i32) -> (i32, i32) {
    %c0_i32 = arith.constant 0 : i32
    %c0_i32_0 = arith.constant 0 : i32
    %c0_i32_1 = arith.constant 0 : i32
    return %c0_i32, %c0_i32_0 : i32, i32
  }
  func.func @transform_10(%arg0: i32) -> (i32, i32) {
    %c0_i32 = arith.constant 0 : i32
    %c0_i32_0 = arith.constant 0 : i32
    %c0_i32_1 = arith.constant 0 : i32
    return %c0_i32, %c0_i32_0 : i32, i32
  }
  func.func @transform_11(%arg0: i32) -> (i32, i32, i32) {
    %c0_i32 = arith.constant 0 : i32
    %c0_i32_0 = arith.constant 0 : i32
    %c0_i32_1 = arith.constant 0 : i32
    return %arg0, %c0_i32, %c0_i32_0 : i32, i32, i32
  }
}

</mosaic_0001>

<bundles_post_ra>
// kernel: raw_audio_cnn_forward.1
= control target key start
LH: loop header
LB: loop body
LE: loop exit
PB: predicated region body
PF: predicated region fallthrough
CT: control target
= control target key end

     0   :  { %s5126_s0 = inlined_call_operand.vmem [shape: f32[2,132,4], index: 0, kind: input, shape index: {}]   ;;  %s5127_s1 = inlined_call_operand.vmem [shape: f32[4,4,16], index: 1, kind: input, shape index: {}]   ;;  %s5128_s2 = inlined_call_operand.vmem [shape: f32[1,16], index: 2, kind: input, shape index: {}]   ;;  %s5129_s3 = inlined_call_operand.vmem [shape: f32[15,16,32], index: 3, kind: input, shape index: {}]   ;;  %s5130_s4 = inlined_call_operand.vmem [shape: f32[1,32], index: 4, kind: input, shape index: {}]   ;;  %s5131_s5 = inlined_call_operand.vmem [shape: f32[15,32,64], index: 5, kind: input, shape index: {}]   ;;  %s5132_s6 = inlined_call_operand.vmem [shape: f32[1,64], index: 6, kind: input, shape index: {}]   ;;  %s5133_s7 = inlined_call_operand.vmem [shape: f32[15,64,128], index: 7, kind: input, shape index: {}]   ;;  %s5134_s8 = inlined_call_operand.vmem [shape: f32[1,128], index: 8, kind: input, shape index: {}]   ;;  %s5135_s9 = inlined_call_operand.vmem [shape: f32[128,10], index: 9, kind: input, shape index: {}]   ;;  %s5136_s10 = inlined_call_operand.vmem [shape: f32[1,10], index: 10, kind: input, shape index: {}]   ;;  %s5137_s11 = inlined_call_operand.hbm [shape: f32[2,1,10], index: 11, kind: output, shape index: {}]  }
   0x1   :  { %5138 = sst [smem:[#allocation22_spill]] %s5126_s0 }
   0x2   :  { %16 = vsyncpa [#allocation6], 0 }
   0x3   :  { %18 = vsyncpa [#allocation6 + $0x1], 0  ;;  %s3854_s17 = smov 0   ;;  %s3856_s18 = smov 0  }
   0x4   :  { %s3858_s19 = smov 0   ;;  %s3860_s20 = smov 0  }
   0x5 LB: > { %s3875_s21 = sadd.s32 4294967295, %s3790_s20   ;;  %s3281_s22 = sadd.s32 4294967294, %s3790_s20   ;;  %s3790_s20 = sphi %s3860_s20, %s5173_s20   ;;  %s3786_s19 = sphi %s3858_s19, %s5172_s19   ;;  %s3782_s18 = sphi %s3856_s18, %s5171_s18   ;;  %s3778_s17 = sphi %s3854_s17, %s5170_s17  }
   0x6   : > { %s3879_s23 = sadd.s32 1, %s3790_s20   ;;  %s267_s24 = sadd.s32 1, %s3786_s19 }
   0x7   : > { %s264_s25 = ssub.s32 %s3790_s20, %s3879_s23  ;;  %p277_p0 = scmp.ne.s32.totalorder %s3786_s19, %s3782_s18 }
   0x8   : > { %p265_p1 = scmp.eq.s32.totalorder %s264_s25, 0  ;;  %p278_p2 = scmp.eq.s32.totalorder %s3875_s21, 1 }
   0x9   : > { %p283_p3 = scmp.ne.s32.totalorder %s3782_s18, %s3778_s17  ;;  %p284_p4 = scmp.eq.s32.totalorder %s3281_s22, 1 }
   0xa   : > { %s3890_s26 = scalar_select %p265_p1, %s3786_s19, %s267_s24  }
   0xb   : > { %p3892_p5 = por %p278_p2, %p277_p0  ;;  %p3896_p6 = por %p284_p4, %p283_p3 }
   0xc   : > { %p3284_p7 = scmp.ge.s32.totalorder %s3790_s20, 1  ;;  %p340_p8 = scmp.lt.s32.totalorder %s3790_s20, 3 }
   0xe   : > { %p341_p9 = pnand %p3284_p7, %p340_p8 }
  0x10   : > { %344 = sbr.rel (%p341_p9) target bundleno = 1675 (0x68b), region = 64 }
  0x15   : > { %v3286_v0 = vld [vmem:[%s5127_s1 + $0x4] sm:$0xf]  ;;  %vm468_vm0 = vcmask 1043456   ;;  %v400_v1 = vld [vmem:[%s5127_s1] sm:$0xf]  ;;  %p379_p10 = scmp.lt.s32.totalorder %s3875_s21, 1  ;;  %s3222_s16 = scalar_lea.hbm %s5137_s11, %s3875_s21 }
  0x16   : > { %3287 = vmatpush.msk.msra.mxu0 %vm468_vm0, %v3286_v0  ;;  %3675 = vmatpush.msk.msra.mxu2 %vm468_vm0, %v400_v1  ;;  %v3321_v2 = vld [vmem:[%s5127_s1 + $0x8] sm:$0xf]  ;;  %v3339_v3 = vld [vmem:[%s5127_s1 + $0xc] sm:$0xf]  ;;  %vm419_vm1 = vcmask 31744   ;;  %s5141_s0 = sld [smem:[#allocation22_spill]] }
  0x17   : > { %s380_s24 = scalar_select %p379_p10, %s3875_s21, 1  ;;  %3340 = vmatpush.msk.msra.mxu3 %vm468_vm0, %v3339_v3  ;;  %3304 = vmatpush.msk.msra.mxu1 %vm468_vm0, %v400_v1  ;;  %vm969_vm2 = vcmask 1046528   ;;  %vm1049_vm3 = vcmask 1045504   ;;  %vm1153_vm4 = vcmask 1044480   ;;  %vm1140_vm6 = vcmask 1022976  }
  0x18   : > { %3322 = vmatpush.msk.msrb.mxu2 %vm468_vm0, %v3321_v2  ;;  %vm1190_vm10 = vcmask 130048   ;;  %vm1196_vm11 = vcmask 128000   ;;  %vm1985_vm12 = vcmask 261120   ;;  %vm2020_vm15 = vcmask 259072   ;;  %s377_s13 = sand.u32 1, %s3782_s18   ;;  %s3226_s30 = sshll.u32 %s3222_s16, 4  ;;  %s3227_s30 = int_to_ptr.hbm [resolvable:$true] %s3226_s30 }
  0x19   : > { %s3680_s25 = smul.u32 136, %s380_s24  ;;  %vm2616_vm0 = vcmask 523264   ;;  %s3748_s22 = scalar_lea.hbm %s5137_s11, 2 }
  0x1c   : > { %s3919_s12 = scalar_lea.vmem %s5141_s0, %s3680_s25  ;;  %s378_s25 = scalar_lea.vmem [#allocation5], %s377_s13 }
  0x1d   : > { %v401_v4 = vld [vmem:[%s3919_s12 + $0x1] sm:$0xff]  ;;  %v398_v5 = vld [vmem:[%s3919_s12 + $0x70] sm:$0xff]  ;;  %v399_v9 = vld [vmem:[%s3919_s12 + $0x78] sm:$0xff]  ;;  %s3224_s29 = sshll.u32 %s378_s25, 4  ;;  %s3742_s0 = sshra.s32 %s3227_s30, 4  ;;  %s3225_s29 = int_to_ptr.vmem [resolvable:$true] %s3224_s29  ;;  %s3743_s0 = int_to_ptr.hbm [resolvable:$true] %s3742_s0 }
  0x1e   : > { %3288 = vmatmul.msk.f32.vlgmr.msra.gmra.mxu0 %vm419_vm1, %v401_v4  ;;  %3319 = vmatmul.msk.f32.vlgmr.msra.gmra.mxu2 %vm419_vm1, %v398_v5  ;;  %v803_v6 = vld [vmem:[%s3919_s12 + $0x3] sm:$0xff]  ;;  %v804_v10 = vld [vmem:[%s3919_s12 + $0xb] sm:$0xff]  ;;  %v805_v14 = vld [vmem:[%s3919_s12 + $0x13] sm:$0xff]  ;;  %s3744_s21 = scalar_lea.hbm %s3743_s0, 1  ;;  %p3749_p0 = scmp.lt.s32.totalorder %s3743_s0, %s5137_s11 }
  0x1f   : > { %v384_v7 = vld [vmem:[%s3919_s12] sm:$0xff]  ;;  %3341 = vmatmul.msk.f32.vlgmr.msra.gmra.mxu3 %vm419_vm1, %v803_v6  ;;  %v402_v8 = vld [vmem:[%s3919_s12 + $0x9] sm:$0xff]  ;;  %v403_v12 = vld [vmem:[%s3919_s12 + $0x11] sm:$0xff]  ;;  %p3745_p11 = scmp.ne.s32.totalorder %s3743_s0, %s3744_s21  ;;  %p3750_p1 = scmp.lt.s32.totalorder %s3748_s22, %s3744_s21 }
  0x20   : > { %3305 = vmatmul.msk.f32.vlgmr.msra.gmra.mxu1 %vm419_vm1, %v384_v7  ;;  %v385_v11 = vld [vmem:[%s3919_s12 + $0x8] sm:$0xff]  ;;  %v386_v15 = vld [vmem:[%s3919_s12 + $0x10] sm:$0xff]  ;;  %v404_v16 = vld [vmem:[%s3919_s12 + $0x19] sm:$0xff] }
  0x21   : > { %v653_v13 = vld [vmem:[%s3919_s12 + $0x2] sm:$0xff]  ;;  %v654_v17 = vld [vmem:[%s3919_s12 + $0xa] sm:$0xff]  ;;  %v387_v19 = vld [vmem:[%s3919_s12 + $0x18] sm:$0xff]  ;;  %p3746_p12 = pnand %p3745_p11, %p3892_p5  ;;  %p3751_p2 = por %p3750_p1, %p3749_p0 }
  0x22   : > { %v806_v18 = vld [vmem:[%s3919_s12 + $0x1b] sm:$0xff]  ;;  %v655_v21 = vld [vmem:[%s3919_s12 + $0x12] sm:$0xff]  ;;  %v807_v22 = vld [vmem:[%s3919_s12 + $0x23] sm:$0xff] }
  0x23   : > { %v405_v20 = vld [vmem:[%s3919_s12 + $0x21] sm:$0xff]  ;;  %v406_v24 = vld [vmem:[%s3919_s12 + $0x29] sm:$0xff]  ;;  %v407_v28 = vld [vmem:[%s3919_s12 + $0x31] sm:$0xff]  ;;  %p3747_p13 = pneg %p3746_p12 }
  0x24   : > { %v388_v23 = vld [vmem:[%s3919_s12 + $0x20] sm:$0xff]  ;;  %v808_v26 = vld [vmem:[%s3919_s12 + $0x2b] sm:$0xff]  ;;  %v809_v30 = vld [vmem:[%s3919_s12 + $0x33] sm:$0xff] }
  0x25   : > { %v656_v25 = vld [vmem:[%s3919_s12 + $0x1a] sm:$0xff]  ;;  %v389_v27 = vld [vmem:[%s3919_s12 + $0x28] sm:$0xff]  ;;  %v390_v31 = vld [vmem:[%s3919_s12 + $0x30] sm:$0xff]  ;;  %p3752_p3 = pnand %p3751_p2, %p3747_p13 }
  0x26   : > { %3289 = vmatmul.msk.f32.gmra.mxu0 %vm419_vm1, %v402_v8  ;;  %3320 = vmatmul.msk.f32.gmra.mxu2 %vm419_vm1, %v399_v9  ;;  %v657_v29 = vld [vmem:[%s3919_s12 + $0x22] sm:$0xff]  ;;  %v408_v32 = vld [vmem:[%s3919_s12 + $0x39] sm:$0xff]  ;;  %v658_v33 = vld [vmem:[%s3919_s12 + $0x2a] sm:$0xff] }
  0x27   : > { %3342 = vmatmul.msk.f32.gmra.mxu3 %vm419_vm1, %v804_v10  ;;  %v810_v34 = vld [vmem:[%s3919_s12 + $0x3b] sm:$0xff]  ;;  %v659_v37 = vld [vmem:[%s3919_s12 + $0x32] sm:$0xff]  ;;  %v811_v38 = vld [vmem:[%s3919_s12 + $0x43] sm:$0xff] }
  0x28   : > { %3306 = vmatmul.msk.f32.gmra.mxu1 %vm419_vm1, %v385_v11  ;;  %v391_v35 = vld [vmem:[%s3919_s12 + $0x38] sm:$0xff]  ;;  %v409_v36 = vld [vmem:[%s3919_s12 + $0x41] sm:$0xff]  ;;  %v410_v40 = vld [vmem:[%s3919_s12 + $0x49] sm:$0xff] }
  0x29   : > { %v392_v39 = vld [vmem:[%s3919_s12 + $0x40] sm:$0xff]  ;;  %v812_v42 = vld [vmem:[%s3919_s12 + $0x4b] sm:$0xff]  ;;  %v813_v46 = vld [vmem:[%s3919_s12 + $0x53] sm:$0xff] }
  0x2a   : > { %v660_v41 = vld [vmem:[%s3919_s12 + $0x3a] sm:$0xff]  ;;  %v393_v43 = vld [vmem:[%s3919_s12 + $0x48] sm:$0xff]  ;;  %v411_v44 = vld [vmem:[%s3919_s12 + $0x51] sm:$0xff] }
  0x2b   : > { %v661_v45 = vld [vmem:[%s3919_s12 + $0x42] sm:$0xff]  ;;  %v394_v47 = vld [vmem:[%s3919_s12 + $0x50] sm:$0xff]  ;;  %v412_v48 = vld [vmem:[%s3919_s12 + $0x59] sm:$0xff] }
  0x2c   : > { %v662_v49 = vld [vmem:[%s3919_s12 + $0x4a] sm:$0xff]  ;;  %v814_v50 = vld [vmem:[%s3919_s12 + $0x5b] sm:$0xff]  ;;  %v663_v53 = vld [vmem:[%s3919_s12 + $0x52] sm:$0xff] }
  0x2d   : > { %v395_v51 = vld [vmem:[%s3919_s12 + $0x58] sm:$0xff]  ;;  %v413_v52 = vld [vmem:[%s3919_s12 + $0x61] sm:$0xff]  ;;  %v414_v56 = vld [vmem:[%s3919_s12 + $0x69] sm:$0xff] }
  0x2e   : > { %3290 = vmatmul.msk.f32.gmra.mxu0 %vm419_vm1, %v403_v12  ;;  %3323 = vmatmul.msk.f32.vlgmr.msrb.gmra.mxu2 %vm419_vm1, %v653_v13  ;;  %v815_v54 = vld [vmem:[%s3919_s12 + $0x63] sm:$0xff]  ;;  %v664_v57 = vld [vmem:[%s3919_s12 + $0x5a] sm:$0xff]  ;;  %v816_v58 = vld [vmem:[%s3919_s12 + $0x6b] sm:$0xff] }
  0x2f   : > { %3343 = vmatmul.msk.f32.gmra.mxu3 %vm419_vm1, %v805_v14  ;;  %v396_v55 = vld [vmem:[%s3919_s12 + $0x60] sm:$0xff]  ;;  %v397_v59 = vld [vmem:[%s3919_s12 + $0x68] sm:$0xff]  ;;  %v415_v60 = vld [vmem:[%s3919_s12 + $0x71] sm:$0xff] }
  0x30   : > { %3307 = vmatmul.msk.f32.gmra.mxu1 %vm419_vm1, %v386_v15  ;;  %v665_v61 = vld [vmem:[%s3919_s12 + $0x62] sm:$0xff]  ;;  %v817_v62 = vld [vmem:[%s3919_s12 + $0x73] sm:$0xff]  ;;  %v666_v0 = vld [vmem:[%s3919_s12 + $0x6a] sm:$0xff] }
  0x31   : > { %v416_v63 = vld [vmem:[%s3919_s12 + $0x79] sm:$0xff] }
  0x32   : > { %v818_v1 = vld [vmem:[%s3919_s12 + $0x7b] sm:$0xff]  ;;  %v667_v3 = vld [vmem:[%s3919_s12 + $0x72] sm:$0xff] }
  0x33   : > { %v668_v7 = vld [vmem:[%s3919_s12 + $0x7a] sm:$0xff]  ;;  %s3214_s12 = scalar_lea.sflag [#allocation6], %s377_s13 }
  0x36   : > { %3291 = vmatmul.msk.f32.gmra.mxu0 %vm419_vm1, %v404_v16  ;;  %3324 = vmatmul.msk.f32.gmra.mxu2 %vm419_vm1, %v654_v17 }
  0x37   : > { %3344 = vmatmul.msk.f32.gmra.mxu3 %vm419_vm1, %v806_v18 }
  0x38   : > { %3308 = vmatmul.msk.f32.gmra.mxu1 %vm419_vm1, %v387_v19 }
  0x3e   : > { %3292 = vmatmul.msk.f32.gmra.mxu0 %vm419_vm1, %v405_v20  ;;  %3325 = vmatmul.msk.f32.gmra.mxu2 %vm419_vm1, %v655_v21 }
  0x3f   : > { %3345 = vmatmul.msk.f32.gmra.mxu3 %vm419_vm1, %v807_v22 }
  0x40   : > { %3309 = vmatmul.msk.f32.gmra.mxu1 %vm419_vm1, %v388_v23 }
  0x46   : > { %3293 = vmatmul.msk.f32.gmra.mxu0 %vm419_vm1, %v406_v24  ;;  %3326 = vmatmul.msk.f32.gmra.mxu2 %vm419_vm1, %v656_v25 }
  0x47   : > { %3346 = vmatmul.msk.f32.gmra.mxu3 %vm419_vm1, %v808_v26 }
  0x48   : > { %3310 = vmatmul.msk.f32.gmra.mxu1 %vm419_vm1, %v389_v27 }
  0x4e   : > { %3294 = vmatmul.msk.f32.gmra.mxu0 %vm419_vm1, %v407_v28  ;;  %3327 = vmatmul.msk.f32.gmra.mxu2 %vm419_vm1, %v657_v29 }
  0x4f   : > { %3347 = vmatmul.msk.f32.gmra.mxu3 %vm419_vm1, %v809_v30 }
  0x50   : > { %3311 = vmatmul.msk.f32.gmra.mxu1 %vm419_vm1, %v390_v31 }
  0x56   : > { %3295 = vmatmul.msk.f32.gmra.mxu0 %vm419_vm1, %v408_v32  ;;  %3328 = vmatmul.msk.f32.gmra.mxu2 %vm419_vm1, %v658_v33 }
  0x57   : > { %3348 = vmatmul.msk.f32.gmra.mxu3 %vm419_vm1, %v810_v34 }
  0x58   : > { %3312 = vmatmul.msk.f32.gmra.mxu1 %vm419_vm1, %v391_v35 }
  0x5e   : > { %3296 = vmatmul.msk.f32.gmra.mxu0 %vm419_vm1, %v409_v36  ;;  %3329 = vmatmul.msk.f32.gmra.mxu2 %vm419_vm1, %v659_v37 }
  0x5f   : > { %3349 = vmatmul.msk.f32.gmra.mxu3 %vm419_vm1, %v811_v38 }
  0x60   : > { %3313 = vmatmul.msk.f32.gmra.mxu1 %vm419_vm1, %v392_v39 }
  0x66   : > { %3297 = vmatmul.msk.f32.gmra.mxu0 %vm419_vm1, %v410_v40  ;;  %3330 = vmatmul.msk.f32.gmra.mxu2 %vm419_vm1, %v660_v41 }
  0x67   : > { %3350 = vmatmul.msk.f32.gmra.mxu3 %vm419_vm1, %v812_v42 }
  0x68   : > { %3314 = vmatmul.msk.f32.gmra.mxu1 %vm419_vm1, %v393_v43 }
  0x6e   : > { %3298 = vmatmul.msk.f32.gmra.mxu0 %vm419_vm1, %v411_v44  ;;  %3331 = vmatmul.msk.f32.gmra.mxu2 %vm419_vm1, %v661_v45 }
  0x6f   : > { %3351 = vmatmul.msk.f32.gmra.mxu3 %vm419_vm1, %v813_v46 }
  0x70   : > { %3315 = vmatmul.msk.f32.gmra.mxu1 %vm419_vm1, %v394_v47 }
  0x76   : > { %3299 = vmatmul.msk.f32.gmra.mxu0 %vm419_vm1, %v412_v48  ;;  %3332 = vmatmul.msk.f32.gmra.mxu2 %vm419_vm1, %v662_v49 }
  0x77   : > { %3352 = vmatmul.msk.f32.gmra.mxu3 %vm419_vm1, %v814_v50 }
  0x78   : > { %3316 = vmatmul.msk.f32.gmra.mxu1 %vm419_vm1, %v395_v51 }
  0x7e   : > { %3300 = vmatmul.msk.f32.gmra.mxu0 %vm419_vm1, %v413_v52  ;;  %3333 = vmatmul.msk.f32.gmra.mxu2 %vm419_vm1, %v663_v53 }
  0x7f   : > { %3353 = vmatmul.msk.f32.gmra.mxu3 %vm419_vm1, %v815_v54 }
  0x80   : > { %3317 = vmatmul.msk.f32.gmra.mxu1 %vm419_vm1, %v396_v55 }
  0x86   : > { %3301 = vmatmul.msk.f32.gmra.mxu0 %vm419_vm1, %v414_v56  ;;  %3334 = vmatmul.msk.f32.gmra.mxu2 %vm419_vm1, %v664_v57 }
  0x87   : > { %3354 = vmatmul.msk.f32.gmra.mxu3 %vm419_vm1, %v816_v58 }
  0x88   : > { %3318 = vmatmul.msk.f32.gmra.mxu1 %vm419_vm1, %v397_v59 }
  0x8e   : > { %3302 = vmatmul.msk.f32.gmra.mxu0 %vm419_vm1, %v415_v60  ;;  %3335 = vmatmul.msk.f32.gmra.mxu2 %vm419_vm1, %v665_v61 }
  0x8f   : > { %3355 = vmatmul.msk.f32.gmra.mxu3 %vm419_vm1, %v817_v62 }
  0x96   : > { %3303 = vmatmul.msk.f32.gmra.mxu0 %vm419_vm1, %v416_v63  ;;  %3336 = vmatmul.msk.f32.gmra.mxu2 %vm419_vm1, %v666_v0 }
  0x97   : > { %3356 = vmatmul.msk.f32.gmra.mxu3 %vm419_vm1, %v818_v1 }
  0x9b   : > { %v4045_v2 = vpop.f32.mrf.mxu0 }
  0x9d   : > { %v4048_v4 = vpop.f32.mrf.mxu1 }
  0x9e   : > { %3337 = vmatmul.msk.f32.gmra.mxu2 %vm419_vm1, %v667_v3 }
  0xa1   : > { %v647_v5 = vpop.f32.mrf.mxu2 }
  0xa2   : > { %v4054_v8 = vpop.f32.mrf.mxu3 }
  0xa3   : > { %v4051_v6 = vpop.f32.mrf.mxu0  ;;  %5142 = vst [vmem:[#allocation8_spill] sm:$0xff] %v4054_v8 }
  0xa5   : > { %v4056_v9 = vpop.f32.mrf.mxu1 }
  0xa6   : > { %3338 = vmatmul.msk.f32.gmra.mxu2 %vm419_vm1, %v668_v7  ;;  %vm2619_vm1 = vcmask 521216  }
  0xa9   : > { %v4059_v10 = vpop.f32.mrf.mxu2 }
  0xaa   : > { %v4063_v12 = vpop.f32.mrf.mxu3 }
  0xab   : > { %v4061_v11 = vpop.f32.mrf.mxu0  ;;  %5143 = vst [vmem:[#allocation9_spill] sm:$0xff] %v4063_v12 }
  0xad   : > { %v4065_v13 = vpop.f32.mrf.mxu1 }
  0xb1   : > { %v4067_v14 = vpop.f32.mrf.mxu2 }
  0xb2   : > { %5144 = vst [vmem:[#allocation10_spill] sm:$0xff] %v4067_v14  ;;  %v4071_v16 = vpop.f32.mrf.mxu3 }
  0xb3   : > { %v4069_v15 = vpop.f32.mrf.mxu0  ;;  %5145 = vst [vmem:[#allocation11_spill] sm:$0xff] %v4071_v16 }
  0xb5   : > { %v4073_v17 = vpop.f32.mrf.mxu1 }
  0xb9   : > { %v4075_v18 = vpop.f32.mrf.mxu2 }
  0xba   : > { %5146 = vst [vmem:[#allocation12_spill] sm:$0xff] %v4075_v18  ;;  %v4079_v20 = vpop.f32.mrf.mxu3 }
  0xbb   : > { %v4077_v19 = vpop.f32.mrf.mxu0  ;;  %5147 = vst [vmem:[#allocation13_spill] sm:$0xff] %v4079_v20 }
  0xbd   : > { %v4081_v21 = vpop.f32.mrf.mxu1 }
  0xc1   : > { %v4083_v22 = vpop.f32.mrf.mxu2 }
  0xc2   : > { %5148 = vst [vmem:[#allocation14_spill] sm:$0xff] %v4083_v22  ;;  %v4087_v24 = vpop.f32.mrf.mxu3 }
  0xc3   : > { %v4085_v23 = vpop.f32.mrf.mxu0  ;;  %5149 = vst [vmem:[#allocation15_spill] sm:$0xff] %v4087_v24 }
  0xc5   : > { %v4091_v26 = vpop.f32.mrf.mxu1 }
  0xc9   : > { %v4089_v25 = vpop.f32.mrf.mxu2 }
  0xca   : > { %v4095_v28 = vpop.f32.mrf.mxu3 }
  0xcb   : > { %v4093_v27 = vpop.f32.mrf.mxu0  ;;  %5150 = vst [vmem:[#allocation16_spill] sm:$0xff] %v4095_v28 }
  0xcd   : > { %v4101_v31 = vpop.f32.mrf.mxu1 }
  0xd1   : > { %v4097_v29 = vpop.f32.mrf.mxu2 }
  0xd2   : > { %5151 = vst [vmem:[#allocation17_spill] sm:$0xff] %v4097_v29  ;;  %v4099_v30 = vpop.f32.mrf.mxu3 }
  0xd3   : > { %5152 = vst [vmem:[#allocation18_spill] sm:$0xff] %v4099_v30  ;;  %v510_v32 = vpop.f32.mrf.mxu0 }
  0xd5   : > { %v626_v35 = vpop.f32.mrf.mxu1 }
  0xd9   : > { %v4103_v33 = vpop.f32.mrf.mxu2 }
  0xda   : > { %5153 = vst [vmem:[#allocation19_spill] sm:$0xff] %v4103_v33  ;;  %v4105_v34 = vpop.f32.mrf.mxu3 }
  0xdb   : > { %5154 = vst [vmem:[#allocation20_spill] sm:$0xff] %v4105_v34  ;;  %v513_v36 = vpop.f32.mrf.mxu0 }
  0xdd   : > { %v629_v39 = vpop.f32.mrf.mxu1 }
  0xde   : > { %v630_v34 = vadd.f32 %v629_v39, %v513_v36 }
  0xe1   : > { %v4107_v37 = vpop.f32.mrf.mxu2  ;;  %v5158_v36 = vld [vmem:[#allocation19_spill] sm:$0xff] }
  0xe2   : > { %v4109_v38 = vpop.f32.mrf.mxu3 }
  0xe3   : > { %5155 = vst [vmem:[#allocation21_spill] sm:$0xff] %v4109_v38  ;;  %v516_v40 = vpop.f32.mrf.mxu0 }
  0xe5   : > { %v632_v44 = vpop.f32.mrf.mxu1 }
  0xe6   : > { %v633_v22 = vadd.f32 %v632_v44, %v516_v40 }
  0xe9   : > { %v4111_v41 = vpop.f32.mrf.mxu2 }
  0xea   : > { %v4113_v42 = vpop.f32.mrf.mxu3 }
  0xeb   : > { %v519_v45 = vpop.f32.mrf.mxu0 }
  0xed   : > { %v635_v48 = vpop.f32.mrf.mxu1 }
  0xee   : > { %v636_v14 = vadd.f32 %v635_v48, %v519_v45 }
  0xf1   : > { %v763_v43 = vpop.f32.mrf.mxu2 }
  0xf2   : > { %v919_v46 = vpop.f32.mrf.mxu3 }
  0xf3   : > { %v522_v49 = vpop.f32.mrf.mxu0 }
  0xf5   : > { %v638_v52 = vpop.f32.mrf.mxu1 }
  0xf6   : > { %v639_v8 = vadd.f32 %v638_v52, %v522_v49  ;;  %v627_v49 = vadd.f32 %v626_v35, %v510_v32 }
  0xf9   : > { %v766_v47 = vpop.f32.mrf.mxu2 }
  0xfa   : > { %v922_v51 = vpop.f32.mrf.mxu3  ;;  %v796_v45 = vadd.f32 %v766_v47, %v633_v22  ;;  %v612_v22 = vadd.f32 %v4065_v13, %v4061_v11 }
  0xfb   : > { %v525_v53 = vpop.f32.mrf.mxu0 }
  0xfd   : > { %v641_v56 = vpop.f32.mrf.mxu1 }
  0xfe   : > { %v642_v3 = vadd.f32 %v641_v56, %v525_v53 }
 0x101   : > { %v769_v50 = vpop.f32.mrf.mxu2 }
 0x102   : > { %v925_v55 = vpop.f32.mrf.mxu3  ;;  %v797_v33 = vadd.f32 %v769_v50, %v636_v14  ;;  %v795_v14 = vadd.f32 %v763_v43, %v630_v34  ;;  %v5159_v43 = vld [vmem:[#allocation20_spill] sm:$0xff] }
 0x103   : > { %v528_v57 = vpop.f32.mrf.mxu0 }
 0x105   : > { %v644_v62 = vpop.f32.mrf.mxu1 }
 0x106   : > { %v645_v63 = vadd.f32 %v644_v62, %v528_v57 }
 0x109   : > { %v772_v54 = vpop.f32.mrf.mxu2 }
 0x10a   : > { %v928_v59 = vpop.f32.mrf.mxu3  ;;  %v798_v28 = vadd.f32 %v772_v54, %v639_v8  ;;  %v609_v8 = vadd.f32 %v4056_v9, %v4051_v6  ;;  %v621_v6 = vadd.f32 %v4091_v26, %v4085_v23  ;;  %v794_v9 = vadd.f32 %v4111_v41, %v627_v49  ;;  %v5157_v26 = vld [vmem:[#allocation17_spill] sm:$0xff] }
 0x10b   : > { %v531_v61 = vpop.f32.mrf.mxu0 }
 0x10c   : > { %v648_v1 = vadd.f32 %v647_v5, %v531_v61  ;;  %v4118_v5 = vadd.f32 %v4048_v4, %v4045_v2  ;;  %v947_v2 = vadd.f32 %v919_v46, %v797_v33  ;;  %v5156_v33 = vld [vmem:[#allocation21_spill] sm:$0xff]  ;;  %v792_v39 = vadd.f32 %v5158_v36, %v621_v6  ;;  %v5161_v61 = vld [vmem:[#allocation16_spill] sm:$0xff] }
 0x10d   : > { %v945_v11 = vadd.f32 %v5156_v33, %v795_v14  ;;  %v944_v44 = vadd.f32 %v5159_v43, %v794_v9  ;;  %v5166_v9 = vld [vmem:[#allocation10_spill] sm:$0xff] }
 0x10e   : > { %v989_v34 = vrot.slane %v947_v2, 1  ;;  %v942_v62 = vadd.f32 %v5161_v61, %v792_v39 }
 0x111   : > { %v775_v58 = vpop.f32.mrf.mxu2 }
 0x112   : > { %v931_v0 = vpop.f32.mrf.mxu3  ;;  %v799_v20 = vadd.f32 %v775_v58, %v642_v3  ;;  %v5162_v3 = vld [vmem:[#allocation14_spill] sm:$0xff] }
 0x113   : > { %v534_v24 = vpop.f32.mrf.mxu0 }
 0x114   : > { %v651_v29 = vadd.f32 %v4059_v10, %v534_v24  ;;  %v949_v38 = vadd.f32 %v925_v55, %v799_v20  ;;  %v615_v10 = vadd.f32 %v4073_v17, %v4069_v15  ;;  %v946_v15 = vadd.f32 %v4113_v42, %v796_v45 }
 0x115   : > { %v985_v55 = vrot.slane %v945_v11, 1 }
 0x116   : > { %v993_v4 = vrot.slane %v949_v38, 1 }
 0x119   : > { %v778_v60 = vpop.f32.mrf.mxu2 }
 0x11a   : > { %v800_v12 = vadd.f32 %v778_v60, %v645_v63  ;;  %v934_v53 = vpop.f32.mrf.mxu3  ;;  %v983_v63 = vrot.slane %v944_v44, 1 }
 0x11c   : > { %v950_v30 = vadd.f32 %v928_v59, %v800_v12  ;;  %v624_v12 = vadd.f32 %v4101_v31, %v4093_v27  ;;  %v790_v31 = vadd.f32 %v4089_v25, %v615_v10  ;;  %v987_v25 = vrot.slane %v946_v15, 1  ;;  %v5164_v10 = vld [vmem:[#allocation12_spill] sm:$0xff] }
 0x11e   : > { %v995_v48 = vrot.slane %v950_v30, 1  ;;  %v793_v32 = vadd.f32 %v4107_v37, %v624_v12  ;;  %v990_v58 = vsel %vm969_vm2, %v987_v25, %v989_v34  ;;  %v788_v12 = vadd.f32 %v5164_v10, %v609_v8 }
 0x121   : > { %v781_v7 = vpop.f32.mrf.mxu2 }
 0x122   : > { %v801_v16 = vadd.f32 %v781_v7, %v648_v1  ;;  %v988_v1 = vsel %vm969_vm2, %v985_v55, %v987_v25  ;;  %v789_v7 = vadd.f32 %v5162_v3, %v612_v22  ;;  %v979_v22 = vrot.slane %v942_v62, 1 }
 0x124   : > { %v951_v18 = vadd.f32 %v931_v0, %v801_v16  ;;  %v948_v16 = vadd.f32 %v922_v51, %v798_v28  ;;  %v618_v28 = vadd.f32 %v4081_v21, %v4077_v19  ;;  %v5160_v51 = vld [vmem:[#allocation18_spill] sm:$0xff] }
 0x125   : > { %v943_v54 = vadd.f32 %v5160_v51, %v793_v32  ;;  %v5167_v32 = vld [vmem:[#allocation11_spill] sm:$0xff] }
 0x126   : > { %v997_v57 = vrot.slane %v951_v18, 1  ;;  %v991_v17 = vrot.slane %v948_v16, 1  ;;  %v791_v35 = vadd.f32 %v5157_v26, %v618_v28  ;;  %v939_v8 = vadd.f32 %v5167_v32, %v789_v7 }
 0x128   : > { %v998_v24 = vsel %vm969_vm2, %v995_v48, %v997_v57  ;;  %v994_v23 = vsel %vm969_vm2, %v991_v17, %v993_v4  ;;  %v992_v37 = vsel %vm969_vm2, %v989_v34, %v991_v17 }
 0x129   : > { %v784_v52 = vpop.f32.mrf.mxu2  ;;  %v1030_v13 = vmax.f32 %v950_v30, %v998_v24  ;;  %v1028_v50 = vmax.f32 %v948_v16, %v994_v23  ;;  %v1027_v60 = vmax.f32 %v947_v2, %v992_v37  ;;  %v981_v16 = vrot.slane %v943_v54, 1 }
 0x12a   : > { %v802_v40 = vadd.f32 %v784_v52, %v651_v29  ;;  %v996_v29 = vsel %vm969_vm2, %v993_v4, %v995_v48  ;;  %v1026_v52 = vmax.f32 %v946_v15, %v990_v58  ;;  %v1025_v4 = vmax.f32 %v945_v11, %v988_v1 }
 0x12b   : > { %v1029_v42 = vmax.f32 %v949_v38, %v996_v29  ;;  %v1075_v47 = vrot.slane %v1030_v13, 2  ;;  %v1071_v49 = vrot.slane %v1028_v50, 2  ;;  %v1069_v2 = vrot.slane %v1027_v60, 2 }
 0x12c   : > { %v952_v20 = vadd.f32 %v934_v53, %v802_v40  ;;  %v5163_v53 = vld [vmem:[#allocation15_spill] sm:$0xff]  ;;  %v986_v40 = vsel %vm969_vm2, %v983_v63, %v985_v55  ;;  %v984_v6 = vsel %vm969_vm2, %v981_v16, %v983_v63  ;;  %v787_v15 = vadd.f32 %v5166_v9, %v4118_v5 }
 0x12d   : > { %v1073_v38 = vrot.slane %v1029_v42, 2  ;;  %v941_v45 = vadd.f32 %v5163_v53, %v791_v35  ;;  %v1072_v17 = vsel %vm1049_vm3, %v1069_v2, %v1071_v49  ;;  %v1024_v29 = vmax.f32 %v944_v44, %v986_v40 }
 0x12e   : > { %v999_v27 = vrot.slane %v952_v20, 1  ;;  %v982_v11 = vsel %vm969_vm2, %v979_v22, %v981_v16  ;;  %v1065_v34 = vrot.slane %v1025_v4, 2  ;;  %v1107_v5 = vmax.f32 %v1027_v60, %v1072_v17 }
 0x12f   : > { %v1074_v14 = vsel %vm1049_vm3, %v1071_v49, %v1073_v38  ;;  %v977_v33 = vrot.slane %v941_v45, 1  ;;  %v1063_v39 = vrot.slane %v1024_v29, 2  ;;  %v973_v44 = vrot.slane %v939_v8, 1 }
 0x130   : > { %v1032_v19 = vmax.f32 %v952_v20, %v999_v27  ;;  %v1000_v21 = vsel %vm969_vm2, %v997_v57, %v999_v27  ;;  %v1076_v57 = vsel %vm1049_vm3, %v1073_v38, %v1075_v47  ;;  %v5165_v20 = vld [vmem:[#allocation13_spill] sm:$0xff]  ;;  %v1067_v27 = vrot.slane %v1026_v52, 2 }
 0x131   : > { %v1031_v41 = vmax.f32 %v951_v18, %v1000_v21  ;;  %v940_v24 = vadd.f32 %v5165_v20, %v790_v31  ;;  %v1109_v28 = vmax.f32 %v1029_v42, %v1076_v57  ;;  %v5168_v21 = vld [vmem:[#allocation9_spill] sm:$0xff]  ;;  %v980_v35 = vsel %vm969_vm2, %v977_v33, %v979_v22  ;;  %v5169_v42 = vld [vmem:[#allocation8_spill] sm:$0xff] }
 0x132   : > { %v1079_v46 = vrot.slane %v1032_v19, 2  ;;  %v1070_v31 = vsel %vm1049_vm3, %v1067_v27, %v1069_v2  ;;  %v938_v23 = vadd.f32 %v5168_v21, %v788_v12  ;;  %v1068_v36 = vsel %vm1049_vm3, %v1065_v34, %v1067_v27  ;;  %v3377_v22 = vld [vmem:[%s5129_s3 + $0x28] sm:$0xff]  ;;  %v3367_v21 = vld [vmem:[%s5129_s3 + $0x18] sm:$0xff] }
 0x133   : > { %v1077_v30 = vrot.slane %v1031_v41, 2  ;;  %v975_v26 = vrot.slane %v940_v24, 1  ;;  %v937_v43 = vadd.f32 %v5169_v42, %v787_v15  ;;  %v1106_v25 = vmax.f32 %v1026_v52, %v1070_v31  ;;  %1330 = vmatpush.msrb.mxu3 %v3377_v22  ;;  %1241 = vmatpush.msrb.mxu1 %v3367_v21  ;;  %v3412_v22 = vld [vmem:[%s5129_s3 + $0x80] sm:$0xff] }
 0x134   : > { %v1112_v56 = vmax.f32 %v1032_v19, %v1079_v46  ;;  %v1023_v19 = vmax.f32 %v943_v54, %v984_v6  ;;  %v1066_v37 = vsel %vm1049_vm3, %v1063_v39, %v1065_v34  ;;  %v1105_v51 = vmax.f32 %v1025_v4, %v1068_v36  ;;  %v3382_v36 = vld [vmem:[%s5129_s3 + $0x30] sm:$0xff] }
 0x135   : > { %v1080_v59 = vsel %vm1049_vm3, %v1077_v30, %v1079_v46  ;;  %v1078_v18 = vsel %vm1049_vm3, %v1075_v47, %v1077_v30  ;;  %v978_v46 = vsel %vm969_vm2, %v975_v26, %v977_v33  ;;  %v1021_v47 = vmax.f32 %v941_v45, %v980_v35  ;;  %v3376_v35 = vld [vmem:[%s5129_s3 + $0x20] sm:$0xff] }
 0x136   : > { %3361 = vmatpush.msk.msrb.mxu0 %vm1153_vm4, %v1112_v56  ;;  %v1111_v0 = vmax.f32 %v1031_v41, %v1080_v59  ;;  %v1110_v48 = vmax.f32 %v1030_v13, %v1078_v18  ;;  %v1108_v13 = vmax.f32 %v1028_v50, %v1074_v14  ;;  %v1022_v41 = vmax.f32 %v942_v62, %v982_v11 }
 0x137   : > { %v1061_v30 = vrot.slane %v1023_v19, 2  ;;  %v971_v50 = vrot.slane %v938_v23, 1  ;;  %v976_v54 = vsel %vm969_vm2, %v973_v44, %v975_v26  ;;  %v1020_v58 = vmax.f32 %v940_v24, %v978_v46  ;;  %v1207_v24 = vld [vmem:[%s5129_s3 + $0x8] sm:$0xff]  ;;  %v3366_v26 = vld [vmem:[%s5129_s3 + $0x10] sm:$0xff]  ;;  %1331 = vmatpush.msrb.mxu3 %v3376_v35 }
 0x138   : > { %1158 = vmatpush.msrb.mxu0 %v1111_v0  ;;  %v1059_v56 = vrot.slane %v1022_v41, 2  ;;  %v1113_v59 = vlaneseq  ;;  %v970_v18 = vrot.slane %v937_v43, 1  ;;  %v1104_v38 = vmax.f32 %v1024_v29, %v1066_v37  ;;  %1282 = vmatpush.msra.mxu2 %v1207_v24  ;;  %v3401_v46 = vld [vmem:[%s5129_s3 + $0x68] sm:$0xff]  ;;  %v3388_v37 = vld [vmem:[%s5129_s3 + $0x40] sm:$0xff] }
 0x139   : > { %v1064_v55 = vsel %vm1049_vm3, %v1061_v30, %v1063_v39  ;;  %v974_v60 = vsel %vm969_vm2, %v971_v50, %v973_v44  ;;  %v1057_v62 = vrot.slane %v1021_v47, 2  ;;  %v1019_v63 = vmax.f32 %v939_v8, %v976_v54  ;;  %1242 = vmatpush.msrb.mxu1 %v3366_v26  ;;  %v3722_v39 = vld [vmem:[%s5128_s2] ss:$0 sm:$0xff]  ;;  %v3389_v44 = vld [vmem:[%s5129_s3 + $0x48] sm:$0xff]  ;;  %1538 = vmatpush.msra.mxu3 %v3401_v46 }
 0x13a   : > { %1159 = vmatpush.msrb.mxu0 %v1110_v48  ;;  %v1062_v61 = vsel %vm1049_vm3, %v1059_v56, %v1061_v30  ;;  %v1103_v0 = vmax.f32 %v1023_v19, %v1064_v55  ;;  %v972_v1 = vsel %vm969_vm2, %v970_v18, %v971_v50  ;;  %v1055_v7 = vrot.slane %v1020_v58, 2  ;;  %v3394_v30 = vld [vmem:[%s5129_s3 + $0x50] sm:$0xff]  ;;  %v3407_v55 = vld [vmem:[%s5129_s3 + $0x78] sm:$0xff]  ;;  %v3425_v24 = vld [vmem:[%s5129_s3 + $0xa8] sm:$0xff] }
 0x13b   : > { %v1060_v3 = vsel %vm1049_vm3, %v1057_v62, %v1059_v56  ;;  %v1018_v57 = vmax.f32 %v938_v23, %v974_v60  ;;  %v4177_v49 = vshrl.u32 %v1113_v59, 7  ;;  %v1102_v52 = vmax.f32 %v1022_v41, %v1062_v61  ;;  %v3383_v23 = vld [vmem:[%s5129_s3 + $0x38] sm:$0xff]  ;;  %1434 = vmatpush.msra.mxu1 %v3389_v44  ;;  %v3436_v44 = vld [vmem:[%s5129_s3 + $0xc0] sm:$0xff] }
 0x13c   : > { %1160 = vmatpush.msrb.mxu0 %v1109_v28  ;;  %v1058_v53 = vsel %vm1049_vm3, %v1055_v7, %v1057_v62  ;;  %v1053_v45 = vrot.slane %v1019_v63, 2  ;;  %v1017_v16 = vmax.f32 %v937_v43, %v972_v1  ;;  %v1101_v48 = vmax.f32 %v1021_v47, %v1060_v3  ;;  %v3400_v47 = vld [vmem:[%s5129_s3 + $0x60] sm:$0xff] }
 0x13d   : > { %v1051_v10 = vrot.slane %v1018_v57, 2  ;;  %v4181_v12 = vand.u32 127, %v1113_v59  ;;  %v1120_v14 = vmul.u32 4, %v4177_v49  ;;  %v1100_v2 = vmax.f32 %v1020_v58, %v1058_v53  ;;  %1435 = vmatpush.msra.mxu1 %v3388_v37  ;;  %1539 = vmatpush.msra.mxu3 %v3400_v47  ;;  %v3448_v46 = vld [vmem:[%s5129_s3 + $0xe0] sm:$0xff] }
 0x13e   : > { %1161 = vmatpush.msrb.mxu0 %v1108_v13  ;;  %v1056_v40 = vsel %vm1049_vm3, %v1053_v45, %v1055_v7  ;;  %v1050_v20 = vrot.slane %v1017_v16, 2  ;;  %v4194_v9 = vadd.s32 8, %v4177_v49  ;;  %v3792_v27 = vmov 0.0  }
 0x13f   : > { %v1054_v4 = vsel %vm1049_vm3, %v1051_v10, %v1053_v45  ;;  %v1099_v28 = vmax.f32 %v1019_v63, %v1056_v40  ;;  %vm1124_vm5 = vcmp.eq.s32.totalorder %v4181_v12, %v1120_v14  ;;  %v1116_v8 = vadd.s32 16, %v4177_v49  ;;  %1191 = vst.msk [vmem:[#allocation2] sm:$0xff] %vm1190_vm10, %v3792_v27 }
 0x140   : > { %1162 = vmatpush.msrb.mxu0 %v1107_v5  ;;  %v1052_v6 = vsel %vm1049_vm3, %v1050_v20, %v1051_v10  ;;  %v1098_v15 = vmax.f32 %v1018_v57, %v1054_v4  ;;  %v3357_v29 = vsel %vm1124_vm5, 1.0, %v3792_v27  ;;  %v1121_v32 = vmul.u32 4, %v4194_v9  ;;  %1192 = vst.msk [vmem:[#allocation2 + $0x8] sm:$0xff] %vm1190_vm10, %v3792_v27  ;;  %v1206_v5 = vld [vmem:[%s5129_s3] sm:$0xff]  ;;  %v3413_v4 = vld [vmem:[%s5129_s3 + $0x88] sm:$0xff]  ;;  %v3419_v20 = vld [vmem:[%s5129_s3 + $0x98] sm:$0xff] }
 0x141   : > { %v1097_v17 = vmax.f32 %v1017_v16, %v1052_v6  ;;  %v1122_v13 = vmul.u32 4, %v1116_v8  ;;  %v1117_v11 = vadd.s32 24, %v4177_v49  ;;  %1193 = vst.msk [vmem:[#allocation2 + $0x10] sm:$0xff] %vm1190_vm10, %v3792_v27  ;;  %1283 = vmatpush.msra.mxu2 %v1206_v5  ;;  %v3424_v6 = vld [vmem:[%s5129_s3 + $0xa0] sm:$0xff]  ;;  %v3431_v8 = vld [vmem:[%s5129_s3 + $0xb8] sm:$0xff]  ;;  %vm3133_vm2 = vcmask 64512  }
 0x142   : > { %1163 = vmatpush.msrb.mxu0 %v1106_v25  ;;  %vm1125_vm7 = vcmp.eq.s32.totalorder %v4181_v12, %v1121_v32  ;;  %1194 = vst.msk [vmem:[#allocation2 + $0x18] sm:$0xff] %vm1190_vm10, %v3792_v27  ;;  %v3395_v25 = vld [vmem:[%s5129_s3 + $0x58] sm:$0xff]  ;;  %vm3193_vm3 = vcmask 76800   ;;  %vm3211_vm5 = vcmask 73728  }
 0x143   : > { %v3358_v33 = vsel %vm1125_vm7, 1.0, %v3792_v27  ;;  %vm1126_vm8 = vcmp.eq.s32.totalorder %v4181_v12, %v1122_v13  ;;  %v1123_v34 = vmul.u32 4, %v1117_v11  ;;  %1195 = vst.msk [vmem:[#allocation2 + $0x20] sm:$0xff] %vm1190_vm10, %v3792_v27  ;;  %1486 = vmatpush.msrb.mxu2 %v3395_v25  ;;  %v3442_v25 = vld [vmem:[%s5129_s3 + $0xd0] sm:$0xff] }
 0x144   : > { %1164 = vmatpush.msrb.mxu0 %v1105_v51  ;;  %v3359_v31 = vsel %vm1126_vm8, 1.0, %v3792_v27  ;;  %1197 = vst.msk [vmem:[#allocation2 + $0x28] sm:$0x3f] %vm1196_vm11, %v3792_v27 }
 0x145   : > { %vm1127_vm9 = vcmp.eq.s32.totalorder %v4181_v12, %v1123_v34  ;;  %1487 = vmatpush.msrb.mxu2 %v3394_v30  ;;  %2017 = vst.msk [vmem:[#allocation3] sm:$0xff] %vm1985_vm12, %v3792_v27 }
 0x146   : > { %1165 = vmatpush.msrb.mxu0 %v1104_v38  ;;  %v3360_v19 = vsel %vm1127_vm9, 1.0, %v3792_v27  ;;  %v3406_v38 = vld [vmem:[%s5129_s3 + $0x70] sm:$0xff]  ;;  %2018 = vst.msk [vmem:[#allocation3 + $0x8] sm:$0xff] %vm1985_vm12, %v3792_v27 }
 0x147   : > { %2019 = vst.msk [vmem:[#allocation3 + $0x10] sm:$0xff] %vm1985_vm12, %v3792_v27 }
 0x148   : > { %1166 = vmatpush.msrb.mxu0 %v1103_v0  ;;  %2021 = vst.msk [vmem:[#allocation3 + $0x18] sm:$0x3f] %vm2020_vm15, %v3792_v27 }
 0x149   : > { %2617 = vst.msk [vmem:[#allocation4] sm:$0xff] %vm2616_vm0, %v3792_v27 }
 0x14a   : > { %1167 = vmatpush.msrb.mxu0 %v1102_v52  ;;  %2618 = vst.msk [vmem:[#allocation4 + $0x8] sm:$0xff] %vm2616_vm0, %v3792_v27 }
 0x14b   : > { %2620 = vst.msk [vmem:[#allocation4 + $0x10] sm:$0x3f] %vm2619_vm1, %v3792_v27 }
 0x14c   : > { %1168 = vmatpush.msrb.mxu0 %v1101_v48 }
 0x14e   : > { %1169 = vmatpush.msrb.mxu0 %v1100_v2 }
 0x150   : > { %1170 = vmatpush.msrb.mxu0 %v1099_v28  ;;  %v3418_v28 = vld [vmem:[%s5129_s3 + $0x90] sm:$0xff] }
 0x152   : > { %1171 = vmatpush.msrb.mxu0 %v1098_v15 }
 0x154   : > { %1172 = vmatpush.msrb.mxu0 %v1097_v17 }
 0x155   : > { %3362 = vmatmul.msk.f32.vlgmr.msrb.gmra.mxu0 %vm1140_vm6, %v3357_v29 }
 0x156   : > { %1382 = vmatpush.msra.mxu0 %v3383_v23 }
 0x158   : > { %1383 = vmatpush.msra.mxu0 %v3382_v36 }
 0x15a   : > { %1590 = vmatpush.msrb.mxu0 %v3407_v55 }
 0x15c   : > { %1591 = vmatpush.msrb.mxu0 %v3406_v38 }
 0x15d   : > { %3363 = vmatmul.msk.f32.gmra.mxu0 %vm1140_vm6, %v3358_v33  ;;  %v3430_v33 = vld [vmem:[%s5129_s3 + $0xb0] sm:$0xff] }
 0x165   : > { %3364 = vmatmul.msk.f32.gmra.mxu0 %vm1140_vm6, %v3359_v31 }
 0x16d   : > { %3365 = vmatmul.msk.f32.gmra.mxu0 %vm1140_vm6, %v3360_v19 }
 0x1d2   : > { %v1174_v41 = vpop.f32.mrf.mxu0 }
 0x1d3   : > { %v1175_v42 = vadd.f32 %v3722_v39, %v1174_v41  ;;  %v3437_v41 = vld [vmem:[%s5129_s3 + $0xc8] sm:$0xff] }
 0x1d5   : > { %v1186_v43 = vmax.f32 %v1175_v42, 0.0  ;;  %v3443_v42 = vld [vmem:[%s5129_s3 + $0xd8] sm:$0xff] }
 0x1d7   : > { %1198 = vst.msk [vmem:[#allocation2 + $0x7] sm:$0xff] %vm1190_vm10, %v1186_v43  ;;  %v3449_v43 = vld [vmem:[%s5129_s3 + $0xe8] sm:$0xff] }
 0x1da   : > { %v1177_v50 = vpop.f32.mrf.mxu0 }
 0x1db   : > { %v1178_v51 = vadd.f32 %v3722_v39, %v1177_v50 }
 0x1dd   : > { %v1187_v54 = vmax.f32 %v1178_v51, 0.0 }
 0x1de   : > { %v1208_v56 = vld [vmem:[#allocation2 + $0x1] sm:$0xff] }
 0x1df   : > { %v1202_v58 = vld [vmem:[#allocation2] sm:$0xff]  ;;  %1199 = vst.msk [vmem:[#allocation2 + $0xf] sm:$0xff] %vm1190_vm10, %v1187_v54  ;;  %3368 = vmatmul.msk.f32.vlgmr.msrb.gmra.mxu1 %vm1190_vm10, %v1208_v56 }
 0x1e0   : > { %v1297_v59 = vld [vmem:[#allocation2 + $0x2] sm:$0xff]  ;;  %3372 = vmatmul.msk.f32.vlgmr.msra.gmra.mxu2 %vm1190_vm10, %v1202_v58  ;;  %1642 = vmatpush.msrb.mxu1 %v3413_v4 }
 0x1e1   : > { %v1349_v18 = vld [vmem:[#allocation2 + $0x3] sm:$0xff]  ;;  %3378 = vmatmul.msk.f32.vlgmr.msrb.gmra.mxu3 %vm1190_vm10, %v1297_v59  ;;  %1694 = vmatpush.msra.mxu2 %v3419_v20 }
 0x1e2   : > { %3384 = vmatmul.msk.f32.vlgmr.msra.gmra.mxu0 %vm1190_vm10, %v1349_v18  ;;  %v1180_v60 = vpop.f32.mrf.mxu0  ;;  %1746 = vmatpush.msrb.mxu3 %v3425_v24  ;;  %v1401_v15 = vld [vmem:[#allocation2 + $0x4] sm:$0xff] }
 0x1e3   : > { %v1181_v61 = vadd.f32 %v3722_v39, %v1180_v60  ;;  %1643 = vmatpush.msrb.mxu1 %v3412_v22  ;;  %1695 = vmatpush.msra.mxu2 %v3418_v28  ;;  %v1453_v17 = vld [vmem:[#allocation2 + $0x5] sm:$0xff] }
 0x1e4   : > { %1747 = vmatpush.msrb.mxu3 %v3424_v6  ;;  %v1505_v29 = vld [vmem:[#allocation2 + $0x6] sm:$0xff]  ;;  %1798 = vmatpush.msra.mxu0 %v3431_v8 }
 0x1e5   : > { %v1188_v62 = vmax.f32 %v1181_v61, 0.0  ;;  %v1557_v32 = vld [vmem:[#allocation2 + $0x7] sm:$0xff] }
 0x1e6   : > { %v4272_v63 = vld [vmem:[#allocation2 + $0x9] sm:$0xff]  ;;  %1799 = vmatpush.msra.mxu0 %v3430_v33 }
 0x1e7   : > { %v4274_v0 = vld [vmem:[#allocation2 + $0x8] sm:$0xff]  ;;  %1200 = vst.msk [vmem:[#allocation2 + $0x17] sm:$0xff] %vm1190_vm10, %v1188_v62  ;;  %3369 = vmatmul.msk.f32.gmra.mxu1 %vm1190_vm10, %v4272_v63 }
 0x1e8   : > { %v4276_v1 = vld [vmem:[#allocation2 + $0xa] sm:$0xff]  ;;  %3373 = vmatmul.msk.f32.gmra.mxu2 %vm1190_vm10, %v4274_v0 }
 0x1e9   : > { %v4283_v3 = vld [vmem:[#allocation2 + $0xb] sm:$0xff]  ;;  %3379 = vmatmul.msk.f32.gmra.mxu3 %vm1190_vm10, %v4276_v1 }
 0x1ea   : > { %3385 = vmatmul.msk.f32.gmra.mxu0 %vm1190_vm10, %v4283_v3  ;;  %v1183_v7 = vpop.f32.mrf.mxu0  ;;  %v1402_v13 = vld [vmem:[#allocation2 + $0xc] sm:$0xff] }
 0x1eb   : > { %v1184_v57 = vadd.f32 %v3722_v39, %v1183_v7  ;;  %v1454_v11 = vld [vmem:[#allocation2 + $0xd] sm:$0xff] }
 0x1ec   : > { %v1506_v31 = vld [vmem:[#allocation2 + $0xe] sm:$0xff] }
 0x1ed   : > { %v1189_v52 = vmax.f32 %v1184_v57, 0.0  ;;  %v1558_v34 = vld [vmem:[#allocation2 + $0xf] sm:$0xff] }
 0x1ee   : > { %v4289_v53 = vld [vmem:[#allocation2 + $0x11] sm:$0xff] }
 0x1ef   : > { %v4291_v45 = vld [vmem:[#allocation2 + $0x10] sm:$0xff]  ;;  %1201 = vst.msk [vmem:[#allocation2 + $0x1f] sm:$0xff] %vm1190_vm10, %v1189_v52  ;;  %3370 = vmatmul.msk.f32.gmra.mxu1 %vm1190_vm10, %v4289_v53 }
 0x1f0   : > { %v4293_v16 = vld [vmem:[#allocation2 + $0x12] sm:$0xff]  ;;  %3374 = vmatmul.msk.f32.gmra.mxu2 %vm1190_vm10, %v4291_v45 }
 0x1f1   : > { %v4300_v48 = vld [vmem:[#allocation2 + $0x13] sm:$0xff]  ;;  %3380 = vmatmul.msk.f32.gmra.mxu3 %vm1190_vm10, %v4293_v16 }
 0x1f2   : > { %3386 = vmatmul.msk.f32.gmra.mxu0 %vm1190_vm10, %v4300_v48  ;;  %v1403_v19 = vld [vmem:[#allocation2 + $0x14] sm:$0xff] }
 0x1f3   : > { %v1455_v21 = vld [vmem:[#allocation2 + $0x15] sm:$0xff] }
 0x1f4   : > { %v1507_v23 = vld [vmem:[#allocation2 + $0x16] sm:$0xff] }
 0x1f5   : > { %v1559_v26 = vld [vmem:[#allocation2 + $0x17] sm:$0xff] }
 0x1f6   : > { %v4306_v40 = vld [vmem:[#allocation2 + $0x19] sm:$0xff]  ;;  %v1664_v30 = vld [vmem:[#allocation2 + $0x21] sm:$0xff] }
 0x1f7   : > { %v4308_v10 = vld [vmem:[#allocation2 + $0x18] sm:$0xff]  ;;  %3371 = vmatmul.msk.f32.gmra.mxu1 %vm1190_vm10, %v4306_v40  ;;  %v1612_v37 = vld [vmem:[#allocation2 + $0x20] sm:$0xff] }
 0x1f8   : > { %v4310_v14 = vld [vmem:[#allocation2 + $0x1a] sm:$0xff]  ;;  %3375 = vmatmul.msk.f32.gmra.mxu2 %vm1190_vm10, %v4308_v10  ;;  %v1716_v47 = vld [vmem:[#allocation2 + $0x22] sm:$0xff] }
 0x1f9   : > { %v4316_v2 = vld [vmem:[#allocation2 + $0x1b] sm:$0xff]  ;;  %3381 = vmatmul.msk.f32.gmra.mxu3 %vm1190_vm10, %v4310_v14  ;;  %v1768_v50 = vld [vmem:[#allocation2 + $0x23] sm:$0xff] }
 0x1fa   : > { %3387 = vmatmul.msk.f32.gmra.mxu0 %vm1190_vm10, %v4316_v2  ;;  %v1404_v5 = vld [vmem:[#allocation2 + $0x1c] sm:$0xff]  ;;  %v1820_v51 = vld [vmem:[#allocation2 + $0x24] sm:$0xff] }
 0x1fb   : > { %v1456_v35 = vld [vmem:[#allocation2 + $0x1d] sm:$0xff]  ;;  %v1872_v54 = vld [vmem:[#allocation2 + $0x25] sm:$0xff] }
 0x1fc   : > { %v1508_v36 = vld [vmem:[#allocation2 + $0x1e] sm:$0xff]  ;;  %v1924_v55 = vld [vmem:[#allocation2 + $0x26] sm:$0xff] }
 0x1fd   : > { %v1560_v39 = vld [vmem:[#allocation2 + $0x1f] sm:$0xff] }
 0x1ff   : > { %3390 = vmatmul.msk.f32.vlgmr.msra.gmra.mxu1 %vm1190_vm10, %v1401_v15 }
 0x200   : > { %3396 = vmatmul.msk.f32.vlgmr.msrb.gmra.mxu2 %vm1190_vm10, %v1453_v17  ;;  %1850 = vmatpush.msra.mxu1 %v3437_v41 }
 0x201   : > { %3402 = vmatmul.msk.f32.vlgmr.msra.gmra.mxu3 %vm1190_vm10, %v1505_v29  ;;  %1902 = vmatpush.msrb.mxu2 %v3443_v42 }
 0x202   : > { %3408 = vmatmul.msk.f32.vlgmr.msrb.gmra.mxu0 %vm1190_vm10, %v1557_v32  ;;  %1954 = vmatpush.msra.mxu3 %v3449_v43 }
 0x203   : > { %1851 = vmatpush.msra.mxu1 %v3436_v44  ;;  %1903 = vmatpush.msrb.mxu2 %v3442_v25 }
 0x204   : > { %1955 = vmatpush.msra.mxu3 %v3448_v46 }
 0x207   : > { %3391 = vmatmul.msk.f32.gmra.mxu1 %vm1190_vm10, %v1402_v13 }
 0x208   : > { %3397 = vmatmul.msk.f32.gmra.mxu2 %vm1190_vm10, %v1454_v11 }
 0x209   : > { %3403 = vmatmul.msk.f32.gmra.mxu3 %vm1190_vm10, %v1506_v31 }
 0x20a   : > { %3409 = vmatmul.msk.f32.gmra.mxu0 %vm1190_vm10, %v1558_v34 }
 0x20f   : > { %3392 = vmatmul.msk.f32.gmra.mxu1 %vm1190_vm10, %v1403_v19 }
 0x210   : > { %3398 = vmatmul.msk.f32.gmra.mxu2 %vm1190_vm10, %v1455_v21 }
 0x211   : > { %3404 = vmatmul.msk.f32.gmra.mxu3 %vm1190_vm10, %v1507_v23 }
 0x212   : > { %3410 = vmatmul.msk.f32.gmra.mxu0 %vm1190_vm10, %v1559_v26 }
 0x217   : > { %3393 = vmatmul.msk.f32.gmra.mxu1 %vm1190_vm10, %v1404_v5 }
 0x218   : > { %3399 = vmatmul.msk.f32.gmra.mxu2 %vm1190_vm10, %v1456_v35 }
 0x219   : > { %3405 = vmatmul.msk.f32.gmra.mxu3 %vm1190_vm10, %v1508_v36 }
 0x21a   : > { %3411 = vmatmul.msk.f32.gmra.mxu0 %vm1190_vm10, %v1560_v39 }
 0x21f   : > { %3414 = vmatmul.msk.f32.vlgmr.msrb.gmra.mxu1 %vm1190_vm10, %v4274_v0 }
 0x220   : > { %3420 = vmatmul.msk.f32.vlgmr.msra.gmra.mxu2 %vm1190_vm10, %v4272_v63 }
 0x221   : > { %3426 = vmatmul.msk.f32.vlgmr.msrb.gmra.mxu3 %vm1190_vm10, %v4276_v1 }
 0x222   : > { %3432 = vmatmul.msk.f32.vlgmr.msra.gmra.mxu0 %vm1190_vm10, %v4283_v3 }
 0x227   : > { %3415 = vmatmul.msk.f32.gmra.mxu1 %vm1190_vm10, %v4291_v45 }
 0x228   : > { %3421 = vmatmul.msk.f32.gmra.mxu2 %vm1190_vm10, %v4289_v53 }
 0x229   : > { %3427 = vmatmul.msk.f32.gmra.mxu3 %vm1190_vm10, %v4293_v16 }
 0x22a   : > { %3433 = vmatmul.msk.f32.gmra.mxu0 %vm1190_vm10, %v4300_v48 }
 0x22f   : > { %3416 = vmatmul.msk.f32.gmra.mxu1 %vm1190_vm10, %v4308_v10 }
 0x230   : > { %3422 = vmatmul.msk.f32.gmra.mxu2 %vm1190_vm10, %v4306_v40 }
 0x231   : > { %3428 = vmatmul.msk.f32.gmra.mxu3 %vm1190_vm10, %v4310_v14 }
 0x232   : > { %3434 = vmatmul.msk.f32.gmra.mxu0 %vm1190_vm10, %v4316_v2 }
 0x237   : > { %3417 = vmatmul.msk.f32.gmra.mxu1 %vm1190_vm10, %v1612_v37 }
 0x238   : > { %3423 = vmatmul.msk.f32.gmra.mxu2 %vm1190_vm10, %v1664_v30 }
 0x239   : > { %3429 = vmatmul.msk.f32.gmra.mxu3 %vm1190_vm10, %v1716_v47 }
 0x23a   : > { %3435 = vmatmul.msk.f32.gmra.mxu0 %vm1190_vm10, %v1768_v50 }
 0x23f   : > { %3438 = vmatmul.msk.f32.vlgmr.msra.gmra.mxu1 %vm1190_vm10, %v1402_v13 }
 0x240   : > { %3444 = vmatmul.msk.f32.vlgmr.msrb.gmra.mxu2 %vm1190_vm10, %v1454_v11 }
 0x241   : > { %3450 = vmatmul.msk.f32.vlgmr.msra.gmra.mxu3 %vm1190_vm10, %v1506_v31 }
 0x247   : > { %3439 = vmatmul.msk.f32.gmra.mxu1 %vm1190_vm10, %v1403_v19 }
 0x248   : > { %3445 = vmatmul.msk.f32.gmra.mxu2 %vm1190_vm10, %v1455_v21 }
 0x249   : > { %3451 = vmatmul.msk.f32.gmra.mxu3 %vm1190_vm10, %v1507_v23 }
 0x24f   : > { %3440 = vmatmul.msk.f32.gmra.mxu1 %vm1190_vm10, %v1404_v5 }
 0x250   : > { %3446 = vmatmul.msk.f32.gmra.mxu2 %vm1190_vm10, %v1456_v35 }
 0x251   : > { %3452 = vmatmul.msk.f32.gmra.mxu3 %vm1190_vm10, %v1508_v36 }
 0x257   : > { %3441 = vmatmul.msk.f32.gmra.mxu1 %vm1190_vm10, %v1820_v51 }
 0x258   : > { %3447 = vmatmul.msk.f32.gmra.mxu2 %vm1190_vm10, %v1872_v54 }
 0x259   : > { %3453 = vmatmul.msk.f32.gmra.mxu3 %vm1190_vm10, %v1924_v55 }
 0x25c   : > { %v1244_v56 = vpop.f32.mrf.mxu1 }
 0x25f   : > { %v1385_v38 = vpop.f32.mrf.mxu0 }
 0x263   : > { %v1285_v58 = vpop.f32.mrf.mxu2 }
 0x264   : > { %v1333_v59 = vpop.f32.mrf.mxu3  ;;  %v1247_v18 = vpop.f32.mrf.mxu1  ;;  %v1286_v7 = vadd.f32 %v1285_v58, %v1244_v56 }
 0x266   : > { %v1345_v52 = vadd.f32 %v1333_v59, %v1286_v7 }
 0x267   : > { %v1388_v63 = vpop.f32.mrf.mxu0 }
 0x268   : > { %v1397_v40 = vadd.f32 %v1385_v38, %v1345_v52 }
 0x26b   : > { %v1288_v60 = vpop.f32.mrf.mxu2 }
 0x26c   : > { %v1336_v61 = vpop.f32.mrf.mxu3  ;;  %v1250_v62 = vpop.f32.mrf.mxu1  ;;  %v1289_v53 = vadd.f32 %v1288_v60, %v1247_v18 }
 0x26e   : > { %v1346_v10 = vadd.f32 %v1336_v61, %v1289_v53 }
 0x26f   : > { %v1391_v16 = vpop.f32.mrf.mxu0 }
 0x270   : > { %v1398_v4 = vadd.f32 %v1388_v63, %v1346_v10 }
 0x273   : > { %v1291_v0 = vpop.f32.mrf.mxu2 }
 0x274   : > { %v1339_v1 = vpop.f32.mrf.mxu3  ;;  %v1253_v3 = vpop.f32.mrf.mxu1  ;;  %v1292_v37 = vadd.f32 %v1291_v0, %v1250_v62 }
 0x276   : > { %v1347_v51 = vadd.f32 %v1339_v1, %v1292_v37 }
 0x277   : > { %v1394_v6 = vpop.f32.mrf.mxu0 }
 0x278   : > { %v1399_v58 = vadd.f32 %v1391_v16, %v1347_v51 }
 0x27b   : > { %v1294_v57 = vpop.f32.mrf.mxu2 }
 0x27c   : > { %v1342_v45 = vpop.f32.mrf.mxu3  ;;  %v1437_v48 = vpop.f32.mrf.mxu1  ;;  %v1295_v30 = vadd.f32 %v1294_v57, %v1253_v3 }
 0x27d   : > { %v1449_v14 = vadd.f32 %v1437_v48, %v1397_v40 }
 0x27e   : > { %v1348_v54 = vadd.f32 %v1342_v45, %v1295_v30 }
 0x27f   : > { %v1593_v33 = vpop.f32.mrf.mxu0 }
 0x280   : > { %v1400_v59 = vadd.f32 %v1394_v6, %v1348_v54  ;;  %v1974_v54 = vmul.u32 2, %v4194_v9  ;;  %v3475_v9 = vld [vmem:[%s5131_s5 + $0x78] sm:$0xff] }
 0x282   : > { %vm1976_vm14 = vcmp.eq.s32.totalorder %v4181_v12, %v1974_v54  ;;  %v3527_v54 = vld [vmem:[%s5131_s5 + $0x188] sm:$0xff] }
 0x283   : > { %v1489_v2 = vpop.f32.mrf.mxu2 }
 0x284   : > { %v1501_v20 = vadd.f32 %v1489_v2, %v1449_v14  ;;  %v1541_v24 = vpop.f32.mrf.mxu3  ;;  %v1440_v22 = vpop.f32.mrf.mxu1 }
 0x285   : > { %v1450_v28 = vadd.f32 %v1440_v22, %v1398_v4 }
 0x286   : > { %v1553_v3 = vadd.f32 %v1541_v24, %v1501_v20 }
 0x287   : > { %v1596_v34 = vpop.f32.mrf.mxu0 }
 0x288   : > { %v1605_v4 = vadd.f32 %v1593_v33, %v1553_v3  ;;  %v3479_v3 = vld [vmem:[%s5131_s5 + $0x88] sm:$0xff] }
 0x28b   : > { %v1492_v15 = vpop.f32.mrf.mxu2 }
 0x28c   : > { %v1502_v17 = vadd.f32 %v1492_v15, %v1450_v28  ;;  %v1544_v29 = vpop.f32.mrf.mxu3  ;;  %v1443_v32 = vpop.f32.mrf.mxu1 }
 0x28d   : > { %v1451_v18 = vadd.f32 %v1443_v32, %v1399_v58  ;;  %v3459_v58 = vld [vmem:[%s5131_s5 + $0x28] sm:$0xff] }
 0x28e   : > { %v1554_v8 = vadd.f32 %v1544_v29, %v1502_v17 }
 0x28f   : > { %v1599_v35 = vpop.f32.mrf.mxu0 }
 0x290   : > { %v1606_v10 = vadd.f32 %v1596_v34, %v1554_v8 }
 0x293   : > { %v1495_v13 = vpop.f32.mrf.mxu2 }
 0x294   : > { %v1547_v11 = vpop.f32.mrf.mxu3  ;;  %v1446_v31 = vpop.f32.mrf.mxu1  ;;  %v1503_v63 = vadd.f32 %v1495_v13, %v1451_v18  ;;  %v3474_v18 = vld [vmem:[%s5131_s5 + $0x70] sm:$0xff] }
 0x295   : > { %v1452_v38 = vadd.f32 %v1446_v31, %v1400_v59  ;;  %v2028_v59 = vld [vmem:[%s5131_s5 + $0x10] sm:$0xff] }
 0x296   : > { %v1555_v62 = vadd.f32 %v1547_v11, %v1503_v63  ;;  %v2026_v63 = vld [vmem:[%s5131_s5] sm:$0xff] }
 0x297   : > { %v1602_v43 = vpop.f32.mrf.mxu0 }
 0x298   : > { %v1607_v57 = vadd.f32 %v1599_v35, %v1555_v62  ;;  %v3468_v62 = vld [vmem:[%s5131_s5 + $0x50] sm:$0xff] }
 0x29b   : > { %v1498_v19 = vpop.f32.mrf.mxu2 }
 0x29c   : > { %v1550_v21 = vpop.f32.mrf.mxu3  ;;  %v1645_v23 = vpop.f32.mrf.mxu1  ;;  %v1504_v7 = vadd.f32 %v1498_v19, %v1452_v38  ;;  %v2027_v38 = vld [vmem:[%s5131_s5 + $0x8] sm:$0xff] }
 0x29d   : > { %v1657_v15 = vadd.f32 %v1645_v23, %v1605_v4  ;;  %v3497_v4 = vld [vmem:[%s5131_s5 + $0xe8] sm:$0xff] }
 0x29e   : > { %v1556_v0 = vadd.f32 %v1550_v21, %v1504_v7  ;;  %v3472_v7 = vld [vmem:[%s5131_s5 + $0x60] sm:$0xff] }
 0x29f   : > { %v1801_v47 = vpop.f32.mrf.mxu0 }
 0x2a0   : > { %v1608_v45 = vadd.f32 %v1602_v43, %v1556_v0  ;;  %v3480_v0 = vld [vmem:[%s5131_s5 + $0x90] sm:$0xff] }
 0x2a3   : > { %v1697_v26 = vpop.f32.mrf.mxu2 }
 0x2a4   : > { %v1749_v5 = vpop.f32.mrf.mxu3  ;;  %v1648_v36 = vpop.f32.mrf.mxu1  ;;  %v1709_v32 = vadd.f32 %v1697_v26, %v1657_v15  ;;  %v1973_v26 = vmul.u32 2, %v4177_v49  ;;  %v3455_v49 = vsel %vm1976_vm14, 1.0, %v3792_v27  ;;  %v3496_v15 = vld [vmem:[%s5131_s5 + $0xe0] sm:$0xff] }
 0x2a5   : > { %v1658_v22 = vadd.f32 %v1648_v36, %v1606_v10  ;;  %v3486_v10 = vld [vmem:[%s5131_s5 + $0xb0] sm:$0xff] }
 0x2a6   : > { %v1761_v21 = vadd.f32 %v1749_v5, %v1709_v32  ;;  %vm1975_vm13 = vcmp.eq.s32.totalorder %v4181_v12, %v1973_v26  ;;  %v3460_v12 = vld [vmem:[%s5131_s5 + $0x30] sm:$0xff]  ;;  %v3502_v26 = vld [vmem:[%s5131_s5 + $0x100] sm:$0xff] }
 0x2a7   : > { %v1804_v60 = vpop.f32.mrf.mxu0 }
 0x2a8   : > { %v1813_v36 = vadd.f32 %v1801_v47, %v1761_v21  ;;  %v4429_v47 = vsel %vm1975_vm13, 1.0, %v3792_v27  ;;  %v3582_v27 = vld [vmem:[%s5133_s7 + $0x140] sm:$0xff] }
 0x2ab   : > { %v1700_v39 = vpop.f32.mrf.mxu2 }
 0x2ac   : > { %v1752_v41 = vpop.f32.mrf.mxu3  ;;  %v1651_v42 = vpop.f32.mrf.mxu1  ;;  %v1710_v17 = vadd.f32 %v1700_v39, %v1658_v22 }
 0x2ad   : > { %v1659_v14 = vadd.f32 %v1651_v42, %v1607_v57  ;;  %v3466_v57 = vld [vmem:[%s5131_s5 + $0x40] sm:$0xff] }
 0x2ae   : > { %v1762_v20 = vadd.f32 %v1752_v41, %v1710_v17 }
 0x2af   : > { %v1807_v48 = vpop.f32.mrf.mxu0 }
 0x2b0   : > { %v1814_v8 = vadd.f32 %v1804_v60, %v1762_v20  ;;  %v3473_v60 = vld [vmem:[%s5131_s5 + $0x68] sm:$0xff] }
 0x2b3   : > { %v1703_v44 = vpop.f32.mrf.mxu2 }
 0x2b4   : > { %v1755_v25 = vpop.f32.mrf.mxu3  ;;  %v1654_v46 = vpop.f32.mrf.mxu1  ;;  %v1711_v28 = vadd.f32 %v1703_v44, %v1659_v14  ;;  %v3498_v14 = vld [vmem:[%s5131_s5 + $0xf0] sm:$0xff] }
 0x2b5   : > { %v1660_v2 = vadd.f32 %v1654_v46, %v1608_v45  ;;  %v3478_v45 = vld [vmem:[%s5131_s5 + $0x80] sm:$0xff] }
 0x2b6   : > { %v1763_v13 = vadd.f32 %v1755_v25, %v1711_v28 }
 0x2b7   : > { %v1810_v24 = vpop.f32.mrf.mxu0 }
 0x2b8   : > { %v1815_v35 = vadd.f32 %v1807_v48, %v1763_v13  ;;  %v3499_v48 = vld [vmem:[%s5131_s5 + $0xf8] sm:$0xff] }
 0x2bb   : > { %v1706_v50 = vpop.f32.mrf.mxu2 }
 0x2bc   : > { %v1758_v55 = vpop.f32.mrf.mxu3  ;;  %v1853_v56 = vpop.f32.mrf.mxu1  ;;  %v1712_v6 = vadd.f32 %v1706_v50, %v1660_v2  ;;  %v3485_v2 = vld [vmem:[%s5131_s5 + $0xa8] sm:$0xff] }
 0x2bd   : > { %v1865_v25 = vadd.f32 %v1853_v56, %v1813_v36  ;;  %v2029_v56 = vld [vmem:[%s5131_s5 + $0x18] sm:$0xff]  ;;  %v3508_v36 = vld [vmem:[%s5131_s5 + $0x120] sm:$0xff] }
 0x2be   : > { %v1764_v11 = vadd.f32 %v1758_v55, %v1712_v6  ;;  %v3461_v55 = vld [vmem:[%s5131_s5 + $0x38] sm:$0xff]  ;;  %2084 = vmatpush.msra.mxu2 %v2029_v56  ;;  %v3484_v6 = vld [vmem:[%s5131_s5 + $0xa0] sm:$0xff] }
 0x2bf   : > { %3676 = vmatpush.msrb.mxu3 %v3461_v55  ;;  %2055 = vmatpush.msrb.mxu1 %v3461_v55 }
 0x2c0   : > { %v1816_v43 = vadd.f32 %v1810_v24, %v1764_v11  ;;  %2085 = vmatpush.msra.mxu2 %v2028_v59  ;;  %v3511_v11 = vld [vmem:[%s5131_s5 + $0x138] sm:$0xff]  ;;  %v3526_v59 = vld [vmem:[%s5131_s5 + $0x180] sm:$0xff] }
 0x2c1   : > { %3677 = vmatpush.msrb.mxu3 %v3460_v12  ;;  %2056 = vmatpush.msrb.mxu1 %v3460_v12 }
 0x2c2   : > { %2086 = vmatpush.msra.mxu2 %v2027_v38  ;;  %v3534_v38 = vld [vmem:[%s5131_s5 + $0x1b0] sm:$0xff] }
 0x2c3   : > { %v1905_v61 = vpop.f32.mrf.mxu2  ;;  %3678 = vmatpush.msrb.mxu3 %v3459_v58  ;;  %2057 = vmatpush.msrb.mxu1 %v3459_v58  ;;  %v3516_v58 = vld [vmem:[%s5131_s5 + $0x150] sm:$0xff] }
 0x2c4   : > { %v1957_v52 = vpop.f32.mrf.mxu3  ;;  %v1856_v53 = vpop.f32.mrf.mxu1  ;;  %v1917_v41 = vadd.f32 %v1905_v61, %v1865_v25  ;;  %v3458_v61 = vld [vmem:[%s5131_s5 + $0x20] sm:$0xff]  ;;  %2087 = vmatpush.msra.mxu2 %v2026_v63 }
 0x2c5   : > { %v1866_v44 = vadd.f32 %v1856_v53, %v1814_v8  ;;  %3679 = vmatpush.msrb.mxu3 %v3458_v61  ;;  %2058 = vmatpush.msrb.mxu1 %v3458_v61  ;;  %v3469_v53 = vld [vmem:[%s5131_s5 + $0x58] sm:$0xff]  ;;  %v3509_v8 = vld [vmem:[%s5131_s5 + $0x128] sm:$0xff]  ;;  %v3514_v63 = vld [vmem:[%s5131_s5 + $0x140] sm:$0xff] }
 0x2c6   : > { %v1969_v51 = vadd.f32 %v1957_v52, %v1917_v41  ;;  %v3481_v52 = vld [vmem:[%s5131_s5 + $0x98] sm:$0xff]  ;;  %v3520_v41 = vld [vmem:[%s5131_s5 + $0x160] sm:$0xff]  ;;  %v3533_v61 = vld [vmem:[%s5131_s5 + $0x1a8] sm:$0xff] }
 0x2c7   : > { %2196 = vmatpush.msra.mxu1 %v3481_v52  ;;  %2120 = vmatpush.msra.mxu3 %v3469_v53 }
 0x2c9   : > { %2197 = vmatpush.msra.mxu1 %v3480_v0  ;;  %2121 = vmatpush.msra.mxu3 %v3468_v62  ;;  %v3541_v0 = vld [vmem:[%s5131_s5 + $0x1d8] sm:$0xff] }
 0x2cb   : > { %v1908_v1 = vpop.f32.mrf.mxu2  ;;  %2198 = vmatpush.msra.mxu1 %v3479_v3 }
 0x2cc   : > { %v1960_v16 = vpop.f32.mrf.mxu3  ;;  %v1859_v40 = vpop.f32.mrf.mxu1  ;;  %v1918_v37 = vadd.f32 %v1908_v1, %v1866_v44  ;;  %v3467_v1 = vld [vmem:[%s5131_s5 + $0x48] sm:$0xff]  ;;  %v3493_v44 = vld [vmem:[%s5131_s5 + $0xd8] sm:$0xff] }
 0x2cd   : > { %v1867_v34 = vadd.f32 %v1859_v40, %v1815_v35  ;;  %2122 = vmatpush.msra.mxu3 %v3467_v1  ;;  %2199 = vmatpush.msra.mxu1 %v3478_v45  ;;  %v3723_v40 = vld [vmem:[%s5130_s4] ss:$0 sm:$0xff]  ;;  %v3510_v35 = vld [vmem:[%s5131_s5 + $0x130] sm:$0xff]  ;;  %v3539_v45 = vld [vmem:[%s5131_s5 + $0x1c8] sm:$0xff] }
 0x2ce   : > { %v1970_v5 = vadd.f32 %v1960_v16, %v1918_v37  ;;  %v3487_v16 = vld [vmem:[%s5131_s5 + $0xb8] sm:$0xff] }
 0x2cf   : > { %2123 = vmatpush.msra.mxu3 %v3466_v57  ;;  %2234 = vmatpush.msrb.mxu2 %v3487_v16  ;;  %v3540_v57 = vld [vmem:[%s5131_s5 + $0x1d0] sm:$0xff]  ;;  %v3538_v16 = vld [vmem:[%s5131_s5 + $0x1c0] sm:$0xff] }
 0x2d1   : > { %2235 = vmatpush.msrb.mxu2 %v3486_v10 }
 0x2d3   : > { %v1911_v29 = vpop.f32.mrf.mxu2  ;;  %2236 = vmatpush.msrb.mxu2 %v3485_v2 }
 0x2d4   : > { %v1963_v31 = vpop.f32.mrf.mxu3  ;;  %v1862_v19 = vpop.f32.mrf.mxu1  ;;  %v1919_v46 = vadd.f32 %v1911_v29, %v1867_v34  ;;  %v3522_v34 = vld [vmem:[%s5131_s5 + $0x170] sm:$0xff] }
 0x2d5   : > { %v1868_v42 = vadd.f32 %v1862_v19, %v1816_v43  ;;  %2237 = vmatpush.msrb.mxu2 %v3484_v6  ;;  %v3523_v19 = vld [vmem:[%s5131_s5 + $0x178] sm:$0xff]  ;;  %v3504_v43 = vld [vmem:[%s5131_s5 + $0x110] sm:$0xff] }
 0x2d6   : > { %v1971_v50 = vadd.f32 %v1963_v31, %v1919_v46  ;;  %v3505_v31 = vld [vmem:[%s5131_s5 + $0x118] sm:$0xff]  ;;  %v3492_v46 = vld [vmem:[%s5131_s5 + $0xd0] sm:$0xff] }
 0x2db   : > { %v1914_v33 = vpop.f32.mrf.mxu2 }
 0x2dc   : > { %v1920_v23 = vadd.f32 %v1914_v33, %v1868_v42  ;;  %v1966_v39 = vpop.f32.mrf.mxu3  ;;  %v3503_v42 = vld [vmem:[%s5131_s5 + $0x108] sm:$0xff] }
 0x2dd   : > { %v3521_v33 = vld [vmem:[%s5131_s5 + $0x168] sm:$0xff] }
 0x2de   : > { %v1972_v30 = vadd.f32 %v1966_v39, %v1920_v23 }
 0x2e0   : > { %2004 = vmatpush.msrb.mxu0 %v1972_v30  ;;  %v3529_v30 = vld [vmem:[%s5131_s5 + $0x198] sm:$0xff] }
 0x2e2   : > { %2005 = vmatpush.msrb.mxu0 %v1971_v50  ;;  %v3491_v50 = vld [vmem:[%s5131_s5 + $0xc8] sm:$0xff] }
 0x2e4   : > { %2006 = vmatpush.msrb.mxu0 %v1970_v5  ;;  %v3490_v5 = vld [vmem:[%s5131_s5 + $0xc0] sm:$0xff] }
 0x2e6   : > { %2007 = vmatpush.msrb.mxu0 %v1969_v51  ;;  %v3528_v51 = vld [vmem:[%s5131_s5 + $0x190] sm:$0xff] }
 0x2e7   : > { %3456 = vmatmul.msk.f32.vlgmr.msrb.gmra.mxu0 %vm1985_vm12, %v4429_v47 }
 0x2e8   : > { %2158 = vmatpush.msra.mxu0 %v3475_v9  ;;  %v3535_v9 = vld [vmem:[%s5131_s5 + $0x1b8] sm:$0xff] }
 0x2ea   : > { %2159 = vmatpush.msra.mxu0 %v3474_v18 }
 0x2ec   : > { %2160 = vmatpush.msra.mxu0 %v3473_v60  ;;  %v3515_v60 = vld [vmem:[%s5131_s5 + $0x148] sm:$0xff] }
 0x2ee   : > { %2161 = vmatpush.msra.mxu0 %v3472_v7  ;;  %v3532_v7 = vld [vmem:[%s5131_s5 + $0x1a0] sm:$0xff] }
 0x2ef   : > { %3457 = vmatmul.msk.f32.gmra.mxu0 %vm1985_vm12, %v3455_v49  ;;  %v3517_v49 = vld [vmem:[%s5131_s5 + $0x158] sm:$0xff] }
 0x2f0   : > { %2310 = vmatpush.msrb.mxu0 %v3499_v48 }
 0x2f2   : > { %2311 = vmatpush.msrb.mxu0 %v3498_v14 }
 0x2f4   : > { %2312 = vmatpush.msrb.mxu0 %v3497_v4 }
 0x2f6   : > { %2313 = vmatpush.msrb.mxu0 %v3496_v15 }
 0x364   : > { %v2009_v22 = vpop.f32.mrf.mxu0 }
 0x365   : > { %v2010_v28 = vadd.f32 %v3723_v40, %v2009_v22 }
 0x367   : > { %v2015_v17 = vmax.f32 %v2010_v28, 0.0 }
 0x369   : > { %2022 = vst.msk [vmem:[#allocation3 + $0x7] sm:$0xff] %vm1985_vm12, %v2015_v17 }
 0x36c   : > { %v2012_v29 = vpop.f32.mrf.mxu0 }
 0x36d   : > { %v2013_v32 = vadd.f32 %v3723_v40, %v2012_v29 }
 0x36f   : > { %v2016_v13 = vmax.f32 %v2013_v32, 0.0 }
 0x370   : > { %v2024_v20 = vld [vmem:[#allocation3] sm:$0xff] }
 0x371   : > { %v2030_v24 = vld [vmem:[#allocation3 + $0x1] sm:$0xff]  ;;  %2023 = vst.msk [vmem:[#allocation3 + $0xf] sm:$0xff] %vm1985_vm12, %v2016_v13  ;;  %3464 = vmatmul.msk.f32.vlgmr.msra.gmra.mxu2 %vm1985_vm12, %v2024_v20 }
 0x372   : > { %3462 = vmatmul.msk.f32.vlgmr.msrb.gmra.mxu1 %vm1985_vm12, %v2030_v24  ;;  %v2133_v21 = vld [vmem:[#allocation3 + $0x3] sm:$0xff]  ;;  %2386 = vmatpush.msra.mxu2 %v3511_v11 }
 0x373   : > { %3476 = vmatmul.msk.f32.vlgmr.msra.gmra.mxu0 %vm1985_vm12, %v2133_v21  ;;  %2348 = vmatpush.msrb.mxu1 %v3505_v31  ;;  %v2171_v25 = vld [vmem:[#allocation3 + $0x4] sm:$0xff] }
 0x374   : > { %2462 = vmatpush.msra.mxu0 %v3523_v19  ;;  %2387 = vmatpush.msra.mxu2 %v3510_v35  ;;  %v2095_v55 = vld [vmem:[#allocation3 + $0x2] sm:$0xff] }
 0x375   : > { %2349 = vmatpush.msrb.mxu1 %v3504_v43  ;;  %v2209_v56 = vld [vmem:[#allocation3 + $0x5] sm:$0xff] }
 0x376   : > { %2463 = vmatpush.msra.mxu0 %v3522_v34  ;;  %2388 = vmatpush.msra.mxu2 %v3509_v8  ;;  %v2285_v18 = vld [vmem:[#allocation3 + $0x7] sm:$0xff] }
 0x377   : > { %2350 = vmatpush.msrb.mxu1 %v3503_v42  ;;  %v2247_v1 = vld [vmem:[#allocation3 + $0x6] sm:$0xff] }
 0x378   : > { %2464 = vmatpush.msra.mxu0 %v3521_v33  ;;  %v2031_v23 = vld [vmem:[#allocation3 + $0x9] sm:$0xff]  ;;  %2389 = vmatpush.msra.mxu2 %v3508_v36  ;;  %v2362_v40 = vld [vmem:[#allocation3 + $0x11] sm:$0xff] }
 0x379   : > { %v2025_v39 = vld [vmem:[#allocation3 + $0x8] sm:$0xff]  ;;  %3463 = vmatmul.msk.f32.vlgmr.msrb.gmra.mxu3 %vm1985_vm12, %v2031_v23  ;;  %2351 = vmatpush.msrb.mxu1 %v3502_v26  ;;  %v2324_v3 = vld [vmem:[#allocation3 + $0x10] sm:$0xff] }
 0x37a   : > { %3465 = vmatmul.msk.f32.gmra.mxu2 %vm1985_vm12, %v2025_v39  ;;  %v2134_v37 = vld [vmem:[#allocation3 + $0xb] sm:$0xff]  ;;  %2272 = vmatpush.msrb.mxu3 %v3493_v44  ;;  %v2438_v10 = vld [vmem:[#allocation3 + $0x13] sm:$0xff] }
 0x37b   : > { %3482 = vmatmul.msk.f32.vlgmr.msra.gmra.mxu1 %vm1985_vm12, %v2171_v25  ;;  %3477 = vmatmul.msk.f32.gmra.mxu0 %vm1985_vm12, %v2134_v37  ;;  %v2172_v12 = vld [vmem:[#allocation3 + $0xc] sm:$0xff]  ;;  %v2476_v14 = vld [vmem:[#allocation3 + $0x14] sm:$0xff] }
 0x37c   : > { %2273 = vmatpush.msrb.mxu3 %v3492_v46  ;;  %2500 = vmatpush.msra.mxu1 %v3529_v30  ;;  %v2096_v52 = vld [vmem:[#allocation3 + $0xa] sm:$0xff]  ;;  %v2400_v2 = vld [vmem:[#allocation3 + $0x12] sm:$0xff] }
 0x37d   : > { %2465 = vmatpush.msra.mxu0 %v3520_v41  ;;  %v2210_v53 = vld [vmem:[#allocation3 + $0xd] sm:$0xff]  ;;  %v2514_v4 = vld [vmem:[#allocation3 + $0x15] sm:$0xff] }
 0x37e   : > { %2274 = vmatpush.msrb.mxu3 %v3491_v50  ;;  %2501 = vmatpush.msra.mxu1 %v3528_v51  ;;  %v2286_v62 = vld [vmem:[#allocation3 + $0xf] sm:$0xff]  ;;  %v2629_v51 = vld [vmem:[%s5133_s7 + $0x30] sm:$0xff] }
 0x37f   : > { %v2248_v48 = vld [vmem:[#allocation3 + $0xe] sm:$0xff]  ;;  %v2552_v22 = vld [vmem:[#allocation3 + $0x16] sm:$0xff] }
 0x380   : > { %2275 = vmatpush.msrb.mxu3 %v3490_v5  ;;  %2502 = vmatpush.msra.mxu1 %v3527_v54  ;;  %v2630_v5 = vld [vmem:[%s5133_s7 + $0x38] sm:$0xff] }
 0x381   : > { %3470 = vmatmul.msk.f32.vlgmr.msra.gmra.mxu3 %vm1985_vm12, %v2095_v55  ;;  %v3562_v54 = vld [vmem:[%s5133_s7 + $0xb8] sm:$0xff] }
 0x382   : > { %3488 = vmatmul.msk.f32.vlgmr.msrb.gmra.mxu2 %vm1985_vm12, %v2209_v56  ;;  %2424 = vmatpush.msra.mxu3 %v3517_v49  ;;  %v3552_v55 = vld [vmem:[%s5133_s7 + $0x78] sm:$0xff]  ;;  %v3561_v56 = vld [vmem:[%s5133_s7 + $0xb0] sm:$0xff] }
 0x383   : > { %3483 = vmatmul.msk.f32.gmra.mxu1 %vm1985_vm12, %v2172_v12  ;;  %3500 = vmatmul.msk.f32.vlgmr.msrb.gmra.mxu0 %vm1985_vm12, %v2285_v18 }
 0x384   : > { %2538 = vmatpush.msrb.mxu2 %v3535_v9  ;;  %2425 = vmatpush.msra.mxu3 %v3516_v58  ;;  %v3551_v58 = vld [vmem:[%s5133_s7 + $0x70] sm:$0xff] }
 0x385   : > { %2503 = vmatpush.msra.mxu1 %v3526_v59  ;;  %v3560_v59 = vld [vmem:[%s5133_s7 + $0xa8] sm:$0xff] }
 0x386   : > { %2539 = vmatpush.msrb.mxu2 %v3534_v38  ;;  %2426 = vmatpush.msra.mxu3 %v3515_v60  ;;  %v3550_v38 = vld [vmem:[%s5133_s7 + $0x68] sm:$0xff] }
 0x388   : > { %2540 = vmatpush.msrb.mxu2 %v3533_v61  ;;  %2427 = vmatpush.msra.mxu3 %v3514_v63  ;;  %v2627_v61 = vld [vmem:[%s5133_s7 + $0x20] sm:$0xff] }
 0x389   : > { %3471 = vmatmul.msk.f32.gmra.mxu3 %vm1985_vm12, %v2096_v52  ;;  %v3559_v63 = vld [vmem:[%s5133_s7 + $0xa0] sm:$0xff] }
 0x38a   : > { %3489 = vmatmul.msk.f32.gmra.mxu2 %vm1985_vm12, %v2210_v53 }
 0x38b   : > { %3506 = vmatmul.msk.f32.vlgmr.msrb.gmra.mxu1 %vm1985_vm12, %v2025_v39  ;;  %2541 = vmatpush.msrb.mxu2 %v3532_v7 }
 0x38c   : > { %3501 = vmatmul.msk.f32.gmra.mxu0 %vm1985_vm12, %v2286_v62  ;;  %2652 = vmatpush.msrb.mxu1 %v3552_v55  ;;  %v2626_v62 = vld [vmem:[%s5133_s7 + $0x18] sm:$0xff]  ;;  %v3579_v55 = vld [vmem:[%s5133_s7 + $0x130] sm:$0xff] }
 0x38e   : > { %2653 = vmatpush.msrb.mxu1 %v3551_v58  ;;  %v3595_v58 = vld [vmem:[%s5133_s7 + $0x1a0] sm:$0xff] }
 0x390   : > { %2654 = vmatpush.msrb.mxu1 %v3550_v38  ;;  %v3594_v38 = vld [vmem:[%s5133_s7 + $0x198] sm:$0xff] }
 0x391   : > { %3494 = vmatmul.msk.f32.vlgmr.msrb.gmra.mxu3 %vm1985_vm12, %v2247_v1 }
 0x392   : > { %3512 = vmatmul.msk.f32.vlgmr.msra.gmra.mxu2 %vm1985_vm12, %v2031_v23  ;;  %2576 = vmatpush.msrb.mxu3 %v3541_v0  ;;  %v3558_v0 = vld [vmem:[%s5133_s7 + $0x98] sm:$0xff] }
 0x393   : > { %3507 = vmatmul.msk.f32.gmra.mxu1 %vm1985_vm12, %v2324_v3  ;;  %2675 = vmatpush.msra.mxu2 %v2630_v5  ;;  %v3548_v3 = vld [vmem:[%s5133_s7 + $0x58] sm:$0xff]  ;;  %v3564_v5 = vld [vmem:[%s5133_s7 + $0xc0] sm:$0xff] }
 0x394   : > { %3524 = vmatmul.msk.f32.vlgmr.msra.gmra.mxu0 %vm1985_vm12, %v2134_v37  ;;  %2577 = vmatpush.msrb.mxu3 %v3540_v57  ;;  %v2625_v57 = vld [vmem:[%s5133_s7 + $0x10] sm:$0xff] }
 0x395   : > { %2676 = vmatpush.msra.mxu2 %v2629_v51  ;;  %v3588_v51 = vld [vmem:[%s5133_s7 + $0x170] sm:$0xff] }
 0x396   : > { %2578 = vmatpush.msrb.mxu3 %v3539_v45  ;;  %v3557_v45 = vld [vmem:[%s5133_s7 + $0x90] sm:$0xff] }
 0x398   : > { %2579 = vmatpush.msrb.mxu3 %v3538_v16 }
 0x399   : > { %3495 = vmatmul.msk.f32.gmra.mxu3 %vm1985_vm12, %v2248_v48 }
 0x39a   : > { %3513 = vmatmul.msk.f32.gmra.mxu2 %vm1985_vm12, %v2362_v40 }
 0x39b   : > { %3530 = vmatmul.msk.f32.vlgmr.msra.gmra.mxu1 %vm1985_vm12, %v2172_v12  ;;  %v2628_v12 = vld [vmem:[%s5133_s7 + $0x28] sm:$0xff] }
 0x39c   : > { %3525 = vmatmul.msk.f32.gmra.mxu0 %vm1985_vm12, %v2438_v10  ;;  %2677 = vmatpush.msra.mxu2 %v2628_v12  ;;  %v3578_v12 = vld [vmem:[%s5133_s7 + $0x128] sm:$0xff] }
 0x39e   : > { %2678 = vmatpush.msra.mxu2 %v2627_v61  ;;  %v3584_v61 = vld [vmem:[%s5133_s7 + $0x150] sm:$0xff] }
 0x3a0   : > { %2679 = vmatpush.msra.mxu2 %v2626_v62  ;;  %v3583_v62 = vld [vmem:[%s5133_s7 + $0x148] sm:$0xff] }
 0x3a1   : > { %3518 = vmatmul.msk.f32.vlgmr.msra.gmra.mxu3 %vm1985_vm12, %v2096_v52  ;;  %v3549_v52 = vld [vmem:[%s5133_s7 + $0x60] sm:$0xff] }
 0x3a2   : > { %3536 = vmatmul.msk.f32.vlgmr.msrb.gmra.mxu2 %vm1985_vm12, %v2210_v53  ;;  %2708 = vmatpush.msra.mxu3 %v3562_v54  ;;  %v3587_v54 = vld [vmem:[%s5133_s7 + $0x168] sm:$0xff] }
 0x3a3   : > { %3531 = vmatmul.msk.f32.gmra.mxu1 %vm1985_vm12, %v2476_v14  ;;  %v2624_v14 = vld [vmem:[%s5133_s7 + $0x8] sm:$0xff]  ;;  %2680 = vmatpush.msra.mxu2 %v2625_v57  ;;  %v3604_v57 = vld [vmem:[%s5133_s7 + $0x1e0] sm:$0xff] }
 0x3a4   : > { %2709 = vmatpush.msra.mxu3 %v3561_v56  ;;  %2655 = vmatpush.msrb.mxu1 %v3549_v52  ;;  %v3596_v56 = vld [vmem:[%s5133_s7 + $0x1a8] sm:$0xff]  ;;  %v3593_v52 = vld [vmem:[%s5133_s7 + $0x190] sm:$0xff] }
 0x3a5   : > { %2681 = vmatpush.msra.mxu2 %v2624_v14  ;;  %v3600_v14 = vld [vmem:[%s5133_s7 + $0x1c0] sm:$0xff] }
 0x3a6   : > { %2710 = vmatpush.msra.mxu3 %v3560_v59  ;;  %2656 = vmatpush.msrb.mxu1 %v3548_v3  ;;  %v3577_v59 = vld [vmem:[%s5133_s7 + $0x120] sm:$0xff]  ;;  %v3574_v3 = vld [vmem:[%s5133_s7 + $0x108] sm:$0xff] }
 0x3a8   : > { %2711 = vmatpush.msra.mxu3 %v3559_v63  ;;  %v3607_v63 = vld [vmem:[%s5133_s7 + $0x1f8] sm:$0xff] }
 0x3a9   : > { %3519 = vmatmul.msk.f32.gmra.mxu3 %vm1985_vm12, %v2400_v2  ;;  %v3556_v2 = vld [vmem:[%s5133_s7 + $0x88] sm:$0xff] }
 0x3aa   : > { %3537 = vmatmul.msk.f32.gmra.mxu2 %vm1985_vm12, %v2514_v4  ;;  %2712 = vmatpush.msra.mxu3 %v3558_v0  ;;  %v3605_v0 = vld [vmem:[%s5133_s7 + $0x1e8] sm:$0xff] }
 0x3ac   : > { %2713 = vmatpush.msra.mxu3 %v3557_v45  ;;  %v3591_v45 = vld [vmem:[%s5133_s7 + $0x180] sm:$0xff] }
 0x3ae   : > { %2714 = vmatpush.msra.mxu3 %v3556_v2  ;;  %v3724_v2 = vld [vmem:[%s5132_s6] ss:$0 sm:$0xff] }
 0x3b1   : > { %3542 = vmatmul.msk.f32.vlgmr.msrb.gmra.mxu3 %vm1985_vm12, %v2248_v48  ;;  %v3547_v48 = vld [vmem:[%s5133_s7 + $0x50] sm:$0xff] }
 0x3b2   : > { %2657 = vmatpush.msrb.mxu1 %v3547_v48  ;;  %v3603_v48 = vld [vmem:[%s5133_s7 + $0x1d8] sm:$0xff] }
 0x3b9   : > { %3543 = vmatmul.msk.f32.gmra.mxu3 %vm1985_vm12, %v2552_v22  ;;  %v3546_v22 = vld [vmem:[%s5133_s7 + $0x48] sm:$0xff] }
 0x3ba   : > { %2658 = vmatpush.msrb.mxu1 %v3546_v22 }
 0x3ef   : > { %v2060_v6 = vpop.f32.mrf.mxu1 }
 0x3f0   : > { %v2163_v29 = vpop.f32.mrf.mxu0 }
 0x3f4   : > { %v2089_v28 = vpop.f32.mrf.mxu2 }
 0x3f5   : > { %v2090_v35 = vadd.f32 %v2089_v28, %v2060_v6  ;;  %v2623_v28 = vld [vmem:[%s5133_s7] sm:$0xff] }
 0x3f6   : > { %v3555_v6 = vld [vmem:[%s5133_s7 + $0x80] sm:$0xff]  ;;  %2682 = vmatpush.msra.mxu2 %v2623_v28 }
 0x3f7   : > { %2715 = vmatpush.msra.mxu3 %v3555_v6  ;;  %v3625_v6 = vld [vmem:[%s5133_s7 + $0x278] sm:$0xff] }
 0x3f8   : > { %v2201_v13 = vpop.f32.mrf.mxu1  ;;  %v2166_v31 = vpop.f32.mrf.mxu0 }
 0x3fc   : > { %v2063_v15 = vpop.f32.mrf.mxu3 }
 0x3fd   : > { %v2092_v17 = vpop.f32.mrf.mxu2 }
 0x3fe   : > { %v2093_v19 = vadd.f32 %v2092_v17, %v2063_v15 }
 0x400   : > { %v2204_v24 = vpop.f32.mrf.mxu1  ;;  %v2315_v34 = vpop.f32.mrf.mxu0 }
 0x404   : > { %v2125_v32 = vpop.f32.mrf.mxu3 }
 0x405   : > { %v2239_v11 = vpop.f32.mrf.mxu2  ;;  %v2131_v42 = vadd.f32 %v2125_v32, %v2090_v35 }
 0x407   : > { %v2169_v44 = vadd.f32 %v2163_v29, %v2131_v42  ;;  %v3589_v29 = vld [vmem:[%s5133_s7 + $0x178] sm:$0xff] }
 0x408   : > { %v2353_v36 = vpop.f32.mrf.mxu1  ;;  %2810 = vmatpush.msrb.mxu2 %v3589_v29 }
 0x409   : > { %v2207_v26 = vadd.f32 %v2201_v13, %v2169_v44  ;;  %v2318_v25 = vpop.f32.mrf.mxu0  ;;  %v3571_v44 = vld [vmem:[%s5133_s7 + $0xf8] sm:$0xff] }
 0x40a   : > { %2811 = vmatpush.msrb.mxu2 %v3588_v51  ;;  %v3618_v51 = vld [vmem:[%s5133_s7 + $0x240] sm:$0xff] }
 0x40b   : > { %v2245_v30 = vadd.f32 %v2239_v11, %v2207_v26  ;;  %v3567_v26 = vld [vmem:[%s5133_s7 + $0xd8] sm:$0xff] }
 0x40c   : > { %v2128_v20 = vpop.f32.mrf.mxu3  ;;  %2812 = vmatpush.msrb.mxu2 %v3587_v54  ;;  %v3661_v54 = vld [vmem:[%s5133_s7 + $0x378] sm:$0xff] }
 0x40d   : > { %v2242_v21 = vpop.f32.mrf.mxu2  ;;  %v2132_v43 = vadd.f32 %v2128_v20, %v2093_v19 }
 0x40f   : > { %v2170_v33 = vadd.f32 %v2166_v31, %v2132_v43 }
 0x410   : > { %v2356_v50 = vpop.f32.mrf.mxu1 }
 0x411   : > { %v2208_v46 = vadd.f32 %v2204_v24, %v2170_v33  ;;  %v2467_v53 = vpop.f32.mrf.mxu0 }
 0x413   : > { %v2246_v37 = vadd.f32 %v2242_v21, %v2208_v46  ;;  %v3570_v46 = vld [vmem:[%s5133_s7 + $0xf0] sm:$0xff] }
 0x414   : > { %v2277_v8 = vpop.f32.mrf.mxu3 }
 0x415   : > { %v2391_v39 = vpop.f32.mrf.mxu2  ;;  %v2283_v49 = vadd.f32 %v2277_v8, %v2245_v30  ;;  %v3545_v30 = vld [vmem:[%s5133_s7 + $0x40] sm:$0xff] }
 0x416   : > { %2659 = vmatpush.msrb.mxu1 %v3545_v30  ;;  %v3619_v30 = vld [vmem:[%s5133_s7 + $0x248] sm:$0xff] }
 0x417   : > { %v2321_v7 = vadd.f32 %v2315_v34, %v2283_v49  ;;  %v3597_v49 = vld [vmem:[%s5133_s7 + $0x1b0] sm:$0xff] }
 0x418   : > { %v2505_v10 = vpop.f32.mrf.mxu1 }
 0x419   : > { %v2359_v16 = vadd.f32 %v2353_v36, %v2321_v7  ;;  %v2470_v11 = vpop.f32.mrf.mxu0  ;;  %v3606_v7 = vld [vmem:[%s5133_s7 + $0x1f0] sm:$0xff] }
 0x41b   : > { %v2397_v15 = vadd.f32 %v2391_v39, %v2359_v16  ;;  %v3568_v39 = vld [vmem:[%s5133_s7 + $0xe0] sm:$0xff] }
 0x41c   : > { %v2280_v23 = vpop.f32.mrf.mxu3  ;;  %v3573_v16 = vld [vmem:[%s5133_s7 + $0x100] sm:$0xff] }
 0x41d   : > { %v2284_v41 = vadd.f32 %v2280_v23, %v2246_v37  ;;  %v2394_v60 = vpop.f32.mrf.mxu2  ;;  %v3569_v23 = vld [vmem:[%s5133_s7 + $0xe8] sm:$0xff] }
 0x41e   : > { %v3565_v37 = vld [vmem:[%s5133_s7 + $0xc8] sm:$0xff] }
 0x41f   : > { %v2322_v18 = vadd.f32 %v2318_v25, %v2284_v41  ;;  %v3566_v25 = vld [vmem:[%s5133_s7 + $0xd0] sm:$0xff]  ;;  %v3598_v41 = vld [vmem:[%s5133_s7 + $0x1b8] sm:$0xff] }
 0x420   : > { %v2508_v19 = vpop.f32.mrf.mxu1  ;;  %2844 = vmatpush.msrb.mxu3 %v3598_v41  ;;  %v3611_v41 = vld [vmem:[%s5133_s7 + $0x210] sm:$0xff] }
 0x421   : > { %v2360_v1 = vadd.f32 %v2356_v50, %v2322_v18  ;;  %v3580_v50 = vld [vmem:[%s5133_s7 + $0x138] sm:$0xff] }
 0x422   : > { %2776 = vmatpush.msra.mxu1 %v3580_v50  ;;  %2845 = vmatpush.msrb.mxu3 %v3597_v49  ;;  %v3585_v18 = vld [vmem:[%s5133_s7 + $0x158] sm:$0xff]  ;;  %v3628_v50 = vld [vmem:[%s5133_s7 + $0x288] sm:$0xff] }
 0x423   : > { %v2398_v4 = vadd.f32 %v2394_v60, %v2360_v1  ;;  %v3576_v60 = vld [vmem:[%s5133_s7 + $0x118] sm:$0xff]  ;;  %v3592_v1 = vld [vmem:[%s5133_s7 + $0x188] sm:$0xff] }
 0x424   : > { %v2429_v9 = vpop.f32.mrf.mxu3  ;;  %2777 = vmatpush.msra.mxu1 %v3579_v55  ;;  %2846 = vmatpush.msrb.mxu3 %v3596_v56  ;;  %v3610_v49 = vld [vmem:[%s5133_s7 + $0x208] sm:$0xff]  ;;  %v3627_v56 = vld [vmem:[%s5133_s7 + $0x280] sm:$0xff] }
 0x425   : > { %v2543_v32 = vpop.f32.mrf.mxu2  ;;  %v2435_v13 = vadd.f32 %v2429_v9, %v2397_v15  ;;  %v3586_v9 = vld [vmem:[%s5133_s7 + $0x160] sm:$0xff]  ;;  %v3634_v15 = vld [vmem:[%s5133_s7 + $0x2b8] sm:$0xff] }
 0x426   : > { %2778 = vmatpush.msra.mxu1 %v3578_v12  ;;  %2813 = vmatpush.msrb.mxu2 %v3586_v9  ;;  %v3660_v9 = vld [vmem:[%s5133_s7 + $0x370] sm:$0xff]  ;;  %v3670_v12 = vld [vmem:[%s5133_s7 + $0x3b8] sm:$0xff] }
 0x427   : > { %v2473_v24 = vadd.f32 %v2467_v53, %v2435_v13  ;;  %2847 = vmatpush.msrb.mxu3 %v3595_v58  ;;  %v3575_v53 = vld [vmem:[%s5133_s7 + $0x110] sm:$0xff]  ;;  %v3609_v58 = vld [vmem:[%s5133_s7 + $0x200] sm:$0xff] }
 0x428   : > { %2779 = vmatpush.msra.mxu1 %v3577_v59  ;;  %2814 = vmatpush.msrb.mxu2 %v3585_v18  ;;  %v3624_v13 = vld [vmem:[%s5133_s7 + $0x270] sm:$0xff]  ;;  %v3652_v18 = vld [vmem:[%s5133_s7 + $0x338] sm:$0xff] }
 0x429   : > { %v2511_v35 = vadd.f32 %v2505_v10, %v2473_v24  ;;  %2848 = vmatpush.msrb.mxu3 %v3594_v38  ;;  %v3601_v10 = vld [vmem:[%s5133_s7 + $0x1c8] sm:$0xff]  ;;  %v3643_v24 = vld [vmem:[%s5133_s7 + $0x2f8] sm:$0xff] }
 0x42a   : > { %2780 = vmatpush.msra.mxu1 %v3576_v60  ;;  %2815 = vmatpush.msrb.mxu2 %v3584_v61  ;;  %v3659_v38 = vld [vmem:[%s5133_s7 + $0x368] sm:$0xff]  ;;  %v3669_v60 = vld [vmem:[%s5133_s7 + $0x3b0] sm:$0xff] }
 0x42b   : > { %v2549_v42 = vadd.f32 %v2543_v32, %v2511_v35  ;;  %2849 = vmatpush.msrb.mxu3 %v3593_v52  ;;  %v3632_v35 = vld [vmem:[%s5133_s7 + $0x2a8] sm:$0xff]  ;;  %v3658_v52 = vld [vmem:[%s5133_s7 + $0x360] sm:$0xff] }
 0x42c   : > { %v2432_v40 = vpop.f32.mrf.mxu3  ;;  %2781 = vmatpush.msra.mxu1 %v3575_v53  ;;  %2816 = vmatpush.msrb.mxu2 %v3583_v62  ;;  %v3668_v53 = vld [vmem:[%s5133_s7 + $0x3a8] sm:$0xff] }
 0x42d   : > { %v2436_v17 = vadd.f32 %v2432_v40, %v2398_v4  ;;  %v2546_v43 = vpop.f32.mrf.mxu2  ;;  %2850 = vmatpush.msrb.mxu3 %v3592_v1  ;;  %v3602_v40 = vld [vmem:[%s5133_s7 + $0x1d0] sm:$0xff]  ;;  %v3650_v62 = vld [vmem:[%s5133_s7 + $0x328] sm:$0xff]  ;;  %v3667_v1 = vld [vmem:[%s5133_s7 + $0x3a0] sm:$0xff] }
 0x42e   : > { %2782 = vmatpush.msra.mxu1 %v3574_v3  ;;  %2817 = vmatpush.msrb.mxu2 %v3582_v27  ;;  %v3638_v27 = vld [vmem:[%s5133_s7 + $0x2d0] sm:$0xff] }
 0x42f   : > { %v2474_v31 = vadd.f32 %v2470_v11, %v2436_v17  ;;  %2851 = vmatpush.msrb.mxu3 %v3591_v45  ;;  %v3616_v11 = vld [vmem:[%s5133_s7 + $0x238] sm:$0xff]  ;;  %v3656_v45 = vld [vmem:[%s5133_s7 + $0x350] sm:$0xff] }
 0x430   : > { %2783 = vmatpush.msra.mxu1 %v3573_v16  ;;  %v3666_v16 = vld [vmem:[%s5133_s7 + $0x398] sm:$0xff] }
 0x431   : > { %v2512_v21 = vadd.f32 %v2508_v19, %v2474_v31  ;;  %v3623_v19 = vld [vmem:[%s5133_s7 + $0x268] sm:$0xff] }
 0x433   : > { %v2550_v8 = vadd.f32 %v2546_v43, %v2512_v21  ;;  %v3615_v21 = vld [vmem:[%s5133_s7 + $0x230] sm:$0xff] }
 0x434   : > { %v2581_v20 = vpop.f32.mrf.mxu3  ;;  %v3642_v43 = vld [vmem:[%s5133_s7 + $0x2f0] sm:$0xff] }
 0x435   : > { %v2587_v36 = vadd.f32 %v2581_v20, %v2549_v42  ;;  %v3633_v20 = vld [vmem:[%s5133_s7 + $0x2b0] sm:$0xff]  ;;  %v3631_v42 = vld [vmem:[%s5133_s7 + $0x2a0] sm:$0xff] }
 0x43c   : > { %v2584_v34 = vpop.f32.mrf.mxu3 }
 0x43d   : > { %v2588_v33 = vadd.f32 %v2584_v34, %v2550_v8  ;;  %v3622_v8 = vld [vmem:[%s5133_s7 + $0x260] sm:$0xff]  ;;  %v3614_v34 = vld [vmem:[%s5133_s7 + $0x228] sm:$0xff] }
 0x43f   : > { %2609 = vmatpush.msrb.mxu0 %v2588_v33  ;;  %v3621_v33 = vld [vmem:[%s5133_s7 + $0x258] sm:$0xff] }
 0x441   : > { %2610 = vmatpush.msrb.mxu0 %v2587_v36  ;;  %v3613_v36 = vld [vmem:[%s5133_s7 + $0x220] sm:$0xff] }
 0x442   : > { %3544 = vmatmul.msk.f32.vlgmr.msrb.gmra.mxu0 %vm1190_vm10, %v4429_v47 }
 0x443   : > { %2742 = vmatpush.msra.mxu0 %v3571_v44  ;;  %v3630_v44 = vld [vmem:[%s5133_s7 + $0x298] sm:$0xff] }
 0x445   : > { %2743 = vmatpush.msra.mxu0 %v3570_v46 }
 0x447   : > { %2744 = vmatpush.msra.mxu0 %v3569_v23  ;;  %v3620_v23 = vld [vmem:[%s5133_s7 + $0x250] sm:$0xff] }
 0x449   : > { %2745 = vmatpush.msra.mxu0 %v3568_v39  ;;  %v3612_v39 = vld [vmem:[%s5133_s7 + $0x218] sm:$0xff] }
 0x44b   : > { %2746 = vmatpush.msra.mxu0 %v3567_v26  ;;  %v3629_v26 = vld [vmem:[%s5133_s7 + $0x290] sm:$0xff] }
 0x44d   : > { %2747 = vmatpush.msra.mxu0 %v3566_v25 }
 0x44f   : > { %2748 = vmatpush.msra.mxu0 %v3565_v37  ;;  %v3641_v37 = vld [vmem:[%s5133_s7 + $0x2e8] sm:$0xff] }
 0x451   : > { %2749 = vmatpush.msra.mxu0 %v3564_v5  ;;  %v3640_v5 = vld [vmem:[%s5133_s7 + $0x2e0] sm:$0xff] }
 0x453   : > { %2878 = vmatpush.msrb.mxu0 %v3607_v63  ;;  %v3639_v63 = vld [vmem:[%s5133_s7 + $0x2d8] sm:$0xff] }
 0x455   : > { %2879 = vmatpush.msrb.mxu0 %v3606_v7  ;;  %v3651_v7 = vld [vmem:[%s5133_s7 + $0x330] sm:$0xff] }
 0x457   : > { %2880 = vmatpush.msrb.mxu0 %v3605_v0  ;;  %v3657_v0 = vld [vmem:[%s5133_s7 + $0x358] sm:$0xff] }
 0x459   : > { %2881 = vmatpush.msrb.mxu0 %v3604_v57  ;;  %v3649_v57 = vld [vmem:[%s5133_s7 + $0x320] sm:$0xff] }
 0x45b   : > { %2882 = vmatpush.msrb.mxu0 %v3603_v48 }
 0x45d   : > { %2883 = vmatpush.msrb.mxu0 %v3602_v40  ;;  %v3648_v40 = vld [vmem:[%s5133_s7 + $0x318] sm:$0xff] }
 0x45f   : > { %2884 = vmatpush.msrb.mxu0 %v3601_v10  ;;  %v3637_v10 = vld [vmem:[%s5133_s7 + $0x2c8] sm:$0xff] }
 0x461   : > { %2885 = vmatpush.msrb.mxu0 %v3600_v14  ;;  %v3655_v14 = vld [vmem:[%s5133_s7 + $0x348] sm:$0xff] }
 0x4bf   : > { %v2612_v4 = vpop.f32.mrf.mxu0 }
 0x4c0   : > { %v2613_v22 = vadd.f32 %v3724_v2, %v2612_v4  ;;  %v3665_v2 = vld [vmem:[%s5133_s7 + $0x390] sm:$0xff] }
 0x4c1   : > { %v3647_v4 = vld [vmem:[%s5133_s7 + $0x310] sm:$0xff] }
 0x4c2   : > { %v2615_v28 = vmax.f32 %v2613_v22, 0.0  ;;  %v3636_v22 = vld [vmem:[%s5133_s7 + $0x2c0] sm:$0xff] }
 0x4c4   : > { %2621 = vst.msk [vmem:[#allocation4 + $0x7] sm:$0xff] %vm2616_vm0, %v2615_v28  ;;  %v3654_v28 = vld [vmem:[%s5133_s7 + $0x340] sm:$0xff] }
 0x4cb   : > { %v2622_v17 = vld [vmem:[#allocation4] sm:$0xff]  ;;  %v2925_v59 = vld [vmem:[#allocation4 + $0x9] sm:$0xff] }
 0x4cc   : > { %v2687_v29 = vld [vmem:[#allocation4 + $0x2] sm:$0xff]  ;;  %3554 = vmatmul.msk.f32.vlgmr.msra.gmra.mxu2 %vm2616_vm0, %v2622_v17  ;;  %v2959_v48 = vld [vmem:[#allocation4 + $0xa] sm:$0xff] }
 0x4cd   : > { %v2631_v32 = vld [vmem:[#allocation4 + $0x1] sm:$0xff]  ;;  %3563 = vmatmul.msk.f32.vlgmr.msra.gmra.mxu3 %vm2616_vm0, %v2687_v29  ;;  %2946 = vmatpush.msra.mxu2 %v3625_v6  ;;  %v3664_v6 = vld [vmem:[%s5133_s7 + $0x388] sm:$0xff]  ;;  %v3663_v17 = vld [vmem:[%s5133_s7 + $0x380] sm:$0xff] }
 0x4ce   : > { %v2721_v31 = vld [vmem:[#allocation4 + $0x3] sm:$0xff]  ;;  %2980 = vmatpush.msra.mxu3 %v3634_v15  ;;  %3553 = vmatmul.msk.f32.vlgmr.msrb.gmra.mxu1 %vm2616_vm0, %v2631_v32  ;;  %v3646_v15 = vld [vmem:[%s5133_s7 + $0x308] sm:$0xff]  ;;  %v3061_v29 = vld [vmem:[#allocation4 + $0xd] sm:$0xff] }
 0x4cf   : > { %3572 = vmatmul.msk.f32.vlgmr.msra.gmra.mxu0 %vm2616_vm0, %v2721_v31  ;;  %2947 = vmatpush.msra.mxu2 %v3624_v13  ;;  %v2789_v46 = vld [vmem:[#allocation4 + $0x5] sm:$0xff]  ;;  %v3645_v32 = vld [vmem:[%s5133_s7 + $0x300] sm:$0xff] }
 0x4d0   : > { %2912 = vmatpush.msrb.mxu1 %v3616_v11  ;;  %2981 = vmatpush.msra.mxu3 %v3633_v20  ;;  %v2755_v25 = vld [vmem:[#allocation4 + $0x4] sm:$0xff]  ;;  %v3095_v11 = vld [vmem:[#allocation4 + $0xe] sm:$0xff] }
 0x4d1   : > { %3014 = vmatpush.msra.mxu0 %v3643_v24  ;;  %2948 = vmatpush.msra.mxu2 %v3623_v19  ;;  %v2823_v55 = vld [vmem:[#allocation4 + $0x6] sm:$0xff] }
 0x4d2   : > { %2913 = vmatpush.msrb.mxu1 %v3615_v21  ;;  %2982 = vmatpush.msra.mxu3 %v3632_v35  ;;  %v2857_v61 = vld [vmem:[#allocation4 + $0x7] sm:$0xff] }
 0x4d3   : > { %3015 = vmatpush.msra.mxu0 %v3642_v43  ;;  %2949 = vmatpush.msra.mxu2 %v3622_v8  ;;  %v2891_v3 = vld [vmem:[#allocation4 + $0x8] sm:$0xff] }
 0x4d4   : > { %2914 = vmatpush.msrb.mxu1 %v3614_v34  ;;  %2983 = vmatpush.msra.mxu3 %v3631_v42  ;;  %v2993_v13 = vld [vmem:[#allocation4 + $0xb] sm:$0xff]  ;;  %v3171_v42 = vld [vmem:[%s5135_s9 + $0x70] sm:$0xff] }
 0x4d5   : > { %3590 = vmatmul.msk.f32.vlgmr.msrb.gmra.mxu2 %vm2616_vm0, %v2789_v46  ;;  %3016 = vmatpush.msra.mxu0 %v3641_v37  ;;  %v3027_v31 = vld [vmem:[#allocation4 + $0xc] sm:$0xff] }
 0x4d6   : > { %2950 = vmatpush.msra.mxu2 %v3621_v33  ;;  %2915 = vmatpush.msrb.mxu1 %v3613_v36  ;;  %v3172_v34 = vld [vmem:[%s5135_s9 + $0x78] sm:$0xff] }
 0x4d7   : > { %2984 = vmatpush.msra.mxu3 %v3630_v44  ;;  %3581 = vmatmul.msk.f32.vlgmr.msra.gmra.mxu1 %vm2616_vm0, %v2755_v25  ;;  %v3170_v44 = vld [vmem:[%s5135_s9 + $0x68] sm:$0xff]  ;;  %v3167_v25 = vld [vmem:[%s5135_s9 + $0x50] sm:$0xff] }
 0x4d8   : > { %2951 = vmatpush.msra.mxu2 %v3620_v23  ;;  %2916 = vmatpush.msrb.mxu1 %v3612_v39  ;;  %v3169_v23 = vld [vmem:[%s5135_s9 + $0x60] sm:$0xff] }
 0x4d9   : > { %2985 = vmatpush.msra.mxu3 %v3629_v26  ;;  %3017 = vmatpush.msra.mxu0 %v3640_v5  ;;  %v3168_v26 = vld [vmem:[%s5135_s9 + $0x58] sm:$0xff] }
 0x4da   : > { %2952 = vmatpush.msra.mxu2 %v3619_v30  ;;  %2917 = vmatpush.msrb.mxu1 %v3611_v41  ;;  %v3166_v41 = vld [vmem:[%s5135_s9 + $0x48] sm:$0xff] }
 0x4db   : > { %2986 = vmatpush.msra.mxu3 %v3628_v50  ;;  %3608 = vmatmul.msk.f32.vlgmr.msrb.gmra.mxu0 %vm2616_vm0, %v2857_v61  ;;  %v3160_v61 = vld [vmem:[%s5135_s9 + $0x18] sm:$0xff] }
 0x4dc   : > { %2953 = vmatpush.msra.mxu2 %v3618_v51  ;;  %3599 = vmatmul.msk.f32.vlgmr.msrb.gmra.mxu3 %vm2616_vm0, %v2823_v55  ;;  %v3165_v51 = vld [vmem:[%s5135_s9 + $0x40] sm:$0xff] }
 0x4dd   : > { %2918 = vmatpush.msrb.mxu1 %v3610_v49  ;;  %2987 = vmatpush.msra.mxu3 %v3627_v56  ;;  %v3164_v56 = vld [vmem:[%s5135_s9 + $0x38] sm:$0xff] }
 0x4de   : > { %3082 = vmatpush.msrb.mxu2 %v3661_v54  ;;  %3018 = vmatpush.msra.mxu0 %v3639_v63 }
 0x4df   : > { %3626 = vmatmul.msk.f32.vlgmr.msra.gmra.mxu2 %vm2616_vm0, %v2925_v59  ;;  %3116 = vmatpush.msrb.mxu3 %v3670_v12 }
 0x4e0   : > { %3083 = vmatpush.msrb.mxu2 %v3660_v9  ;;  %2919 = vmatpush.msrb.mxu1 %v3609_v58  ;;  %v3163_v9 = vld [vmem:[%s5135_s9 + $0x30] sm:$0xff]  ;;  %v3162_v58 = vld [vmem:[%s5135_s9 + $0x28] sm:$0xff] }
 0x4e1   : > { %3117 = vmatpush.msrb.mxu3 %v3669_v60  ;;  %3617 = vmatmul.msk.f32.vlgmr.msrb.gmra.mxu1 %vm2616_vm0, %v2891_v3  ;;  %v3159_v3 = vld [vmem:[%s5135_s9 + $0x10] sm:$0xff] }
 0x4e2   : > { %3048 = vmatpush.msra.mxu1 %v3652_v18  ;;  %3084 = vmatpush.msrb.mxu2 %v3659_v38  ;;  %v3161_v18 = vld [vmem:[%s5135_s9 + $0x20] sm:$0xff] }
 0x4e3   : > { %3118 = vmatpush.msrb.mxu3 %v3668_v53  ;;  %3019 = vmatpush.msra.mxu0 %v3638_v27  ;;  %v3158_v27 = vld [vmem:[%s5135_s9 + $0x8] sm:$0xff] }
 0x4e4   : > { %3049 = vmatpush.msra.mxu1 %v3651_v7  ;;  %3085 = vmatpush.msrb.mxu2 %v3658_v52 }
 0x4e5   : > { %3119 = vmatpush.msrb.mxu3 %v3667_v1  ;;  %3020 = vmatpush.msra.mxu0 %v3637_v10 }
 0x4e6   : > { %3050 = vmatpush.msra.mxu1 %v3650_v62  ;;  %3086 = vmatpush.msrb.mxu2 %v3657_v0 }
 0x4e7   : > { %3635 = vmatmul.msk.f32.vlgmr.msra.gmra.mxu3 %vm2616_vm0, %v2959_v48  ;;  %3021 = vmatpush.msra.mxu0 %v3636_v22 }
 0x4e8   : > { %3051 = vmatpush.msra.mxu1 %v3649_v57  ;;  %3087 = vmatpush.msrb.mxu2 %v3656_v45  ;;  %v3157_v57 = vld [vmem:[%s5135_s9] sm:$0xff] }
 0x4e9   : > { %3120 = vmatpush.msrb.mxu3 %v3666_v16  ;;  %3644 = vmatmul.msk.f32.vlgmr.msra.gmra.mxu0 %vm2616_vm0, %v2993_v13  ;;  %v3725_v45 = vld [vmem:[%s5134_s8] ss:$0 sm:$0xff] }
 0x4ea   : > { %3052 = vmatpush.msra.mxu1 %v3648_v40  ;;  %3088 = vmatpush.msrb.mxu2 %v3655_v14  ;;  %v3793_v40 = vmov 4.0  }
 0x4eb   : > { %3121 = vmatpush.msrb.mxu3 %v3665_v2  ;;  %3726 = vrcp.f32 %v3793_v40 }
 0x4ec   : > { %3053 = vmatpush.msra.mxu1 %v3647_v4  ;;  %3089 = vmatpush.msrb.mxu2 %v3654_v28 }
 0x4ed   : > { %3122 = vmatpush.msrb.mxu3 %v3664_v6  ;;  %3662 = vmatmul.msk.f32.vlgmr.msrb.gmra.mxu2 %vm2616_vm0, %v3061_v29 }
 0x4ee   : > { %3054 = vmatpush.msra.mxu1 %v3646_v15 }
 0x4ef   : > { %3123 = vmatpush.msrb.mxu3 %v3663_v17 }
 0x4f0   : > { %3671 = vmatmul.msk.f32.vlgmr.msrb.gmra.mxu3 %vm2616_vm0, %v3095_v11  ;;  %3055 = vmatpush.msra.mxu1 %v3645_v32 }
 0x4f1   : > { %3653 = vmatmul.msk.f32.vlgmr.msra.gmra.mxu1 %vm2616_vm0, %v3027_v31  ;;  %v3727_v10 = vpop.eup %3726 }
 0x4f2   : > { %3173 = vmatpush.msrb.mxu1 %v3172_v34  ;;  %v3202_v14 = vmul.f32 4.0, %v3727_v10  ;;  %vm3206_vm4 = vweird.f32 %v3727_v10 }
 0x4f4   : > { %3174 = vmatpush.msrb.mxu1 %v3171_v42  ;;  %v3203_v2 = vsub.f32 1.0, %v3202_v14 }
 0x4f6   : > { %3175 = vmatpush.msrb.mxu1 %v3170_v44  ;;  %v3204_v6 = vmul.f32 %v3727_v10, %v3203_v2 }
 0x4f8   : > { %3176 = vmatpush.msrb.mxu1 %v3169_v23  ;;  %v3205_v29 = vadd.f32 %v3727_v10, %v3204_v6 }
 0x4fa   : > { %3177 = vmatpush.msrb.mxu1 %v3168_v26  ;;  %v3207_v11 = vsel %vm3206_vm4, %v3727_v10, %v3205_v29 }
 0x4fc   : > { %3178 = vmatpush.msrb.mxu1 %v3167_v25 }
 0x4fe   : > { %3179 = vmatpush.msrb.mxu1 %v3166_v41 }
 0x500   : > { %3180 = vmatpush.msrb.mxu1 %v3165_v51 }
 0x502   : > { %3181 = vmatpush.msrb.mxu1 %v3164_v56 }
 0x504   : > { %3182 = vmatpush.msrb.mxu1 %v3163_v9 }
 0x506   : > { %3183 = vmatpush.msrb.mxu1 %v3162_v58 }
 0x508   : > { %3184 = vmatpush.msrb.mxu1 %v3161_v18 }
 0x50a   : > { %3185 = vmatpush.msrb.mxu1 %v3160_v61 }
 0x50c   : > { %3186 = vmatpush.msrb.mxu1 %v3159_v3 }
 0x50e   : > { %3187 = vmatpush.msrb.mxu1 %v3158_v27 }
 0x510   : > { %3188 = vmatpush.msrb.mxu1 %v3157_v57 }
 0x54b   : > { %v2661_v20 = vpop.f32.mrf.mxu1 }
 0x54c   : > { %v2751_v43 = vpop.f32.mrf.mxu0 }
 0x54f   : > { %v2684_v24 = vpop.f32.mrf.mxu2 }
 0x550   : > { %v2685_v19 = vadd.f32 %v2684_v24, %v2661_v20  ;;  %v2717_v21 = vpop.f32.mrf.mxu3  ;;  %v3209_v20 = vld [vmem:[%s5136_s10] sm:$0x1] }
 0x552   : > { %v2720_v35 = vadd.f32 %v2717_v21, %v2685_v19 }
 0x554   : > { %v2754_v8 = vadd.f32 %v2751_v43, %v2720_v35  ;;  %v2785_v33 = vpop.f32.mrf.mxu1 }
 0x556   : > { %v2788_v36 = vadd.f32 %v2785_v33, %v2754_v8 }
 0x558   : > { %v2819_v46 = vpop.f32.mrf.mxu2  ;;  %v2887_v50 = vpop.f32.mrf.mxu0 }
 0x559   : > { %v2822_v39 = vadd.f32 %v2819_v46, %v2788_v36 }
 0x55e   : > { %v2921_v54 = vpop.f32.mrf.mxu1 }
 0x55f   : > { %v2853_v37 = vpop.f32.mrf.mxu3 }
 0x560   : > { %v2856_v30 = vadd.f32 %v2853_v37, %v2822_v39 }
 0x562   : > { %v2890_v5 = vadd.f32 %v2887_v50, %v2856_v30  ;;  %v2955_v55 = vpop.f32.mrf.mxu2 }
 0x564   : > { %v2924_v49 = vadd.f32 %v2921_v54, %v2890_v5 }
 0x566   : > { %v2958_v12 = vadd.f32 %v2955_v55, %v2924_v49  ;;  %v3023_v60 = vpop.f32.mrf.mxu0 }
 0x56a   : > { %v2989_v59 = vpop.f32.mrf.mxu3 }
 0x56b   : > { %v2992_v38 = vadd.f32 %v2989_v59, %v2958_v12 }
 0x56d   : > { %v3026_v63 = vadd.f32 %v3023_v60, %v2992_v38 }
 0x56e   : > { %v3057_v7 = vpop.f32.mrf.mxu1 }
 0x56f   : > { %v3060_v52 = vadd.f32 %v3057_v7, %v3026_v63 }
 0x570   : > { %v3091_v53 = vpop.f32.mrf.mxu2 }
 0x571   : > { %v3094_v62 = vadd.f32 %v3091_v53, %v3060_v52 }
 0x573   : > { %v3125_v0 = vpop.f32.mrf.mxu3 }
 0x574   : > { %v3128_v1 = vadd.f32 %v3125_v0, %v3094_v62 }
 0x576   : > { %3151 = vmatpush.msrb.mxu0 %v3128_v1 }
 0x577   : > { %3672 = vmatmul.msk.f32.vlgmr.msrb.gmra.mxu0 %vm3133_vm2, %v4429_v47 }
 0x5f4   : > { %v3153_v47 = vpop.f32.mrf.mxu0 }
 0x5f5   : > { %v3154_v16 = vadd.f32 %v3725_v45, %v3153_v47 }
 0x5f7   : > { %v3156_v48 = vmax.f32 %v3154_v16, 0.0 }
 0x5f9   : > { %3189 = vmatmul.f32.vlgmr.msrb.gmra.mxu1 %v3156_v48 }
 0x676   : > { %v3190_v4 = vpop.f32.mrf.mxu1 }
 0x677   : > { %v3194_v22 = vsel %vm3193_vm3, %v3190_v4, 0.0 }
 0x678   : > { %v3195_v28 = vrot.slane %v3194_v22, 4 }
 0x67a   : > { %v3196_v15 = vadd.f32 %v3195_v28, %v3194_v22 }
 0x67c   : > { %v3197_v17 = vrot.slane %v3196_v15, 2 }
 0x67e   : > { %v3198_v32 = vadd.f32 %v3197_v17, %v3196_v15 }
 0x680   : > { %v3199_v13 = vrot.slane %v3198_v32, 1 }
 0x682   : > { %v3200_v31 = vadd.f32 %v3199_v13, %v3198_v32 }
 0x684   : > { %v3208_v24 = vmul.f32 %v3207_v11, %v3200_v31 }
 0x686   : > { %v3210_v19 = vadd.f32 %v3209_v20, %v3208_v24 }
 0x688   : > { %3212 = vst.msk [vmem:[%s378_s25] sm:$0x1] %vm3211_vm5, %v3210_v19 }
 0x689   : > { %3755 = shalt.err (!%p3752_p3)
}
 0x68a   : > { %3681 = dma.vmem_to_hbm [thread:$0]  (%p3892_p5), %s3225_s29, 16, %s3227_s30, %s3214_s12  }
 0x68b PF: > { %p3687_p4 = scmp.ge.s32.totalorder %s3790_s20, 2  ;;  %s3238_s13 = sand.u32 1, %s3778_s17  }
 0x68c   : > { %s3239_s25 = scalar_lea.sflag [#allocation6], %s3238_s13 }
 0x68d   : > { %p3684_p7 = pnand %p3687_p4, %p3896_p6 }
 0x68f   : > { %p3685_p8 = pneg %p3684_p7 }
 0x691   : > { %3773 = dma.done.wait (%p3685_p8), %s3239_s25, 16  }
 0x692   : > { %3775 = vsyncadd (%p3685_p8), %s3239_s25, 4294967280  ;;  %p21_p9 = scmp.ge.s32.totalorder %s3879_s23, 4   ;;  %s5170_s17 = smov %s3782_s18 }
 0x693   : > { %s5171_s18 = smov %s3786_s19  ;;  %s5172_s19 = smov %s3890_s26 }
 0x694   : > { %s5173_s20 = smov %s3879_s23  ;;  %23 = sbr.rel (!%p21_p9) target bundleno = 5 (0x5), region = 144 }
 0x699   :  { %3244 = vsyncpa [#allocation6], 1 }
 0x69a   :  { %3246 = vsyncpa [#allocation6 + $0x1], 1 }

</bundles_post_ra>
